<compile_context>
chip_gen: v6e
topology: v6e:2x2x1
jax: 0.10.0
libtpu: 0.0.40
codegen_flags: <defaults>
</compile_context>

<pallas_src>
import math

import jax
import jax.numpy as jnp
from jax.experimental import pallas as pl
from jax.experimental.pallas import tpu as pltpu


SUBLANES = 8  # f32 sublane count; batch is padded to a multiple of this.


# ----------------------------------------------------------------------------
# Pallas kernel: fused input projection + merged bidirectional GRU recurrence
# + final fc/tanh head.
# ----------------------------------------------------------------------------
def encoder_kernel(emb_ref, mask_ref,
                   w_ih_ref, b_ih_ref,      # fused input projection: (E, 6H), (1, 6H)
                   w_hh_ref, b_hh_ref,      # block-diag recurrent:    (2H, 6H), (1, 6H)
                   w_fc_ref, b_fc_ref,      # fc head:                 (2H, Hdec), (1, Hdec)
                   out_ref, hid_ref,        # (2, T, B, H), (B, Hdec)
                   gi_scr):                 # (T, B, 6H) scratch
    T, B, E = emb_ref.shape
    H6 = w_hh_ref.shape[1]
    H3 = H6 // 2
    H = H3 // 3

    # ---- hoisted input projection: one big MXU matmul, all timesteps & both directions ----
    gi = jnp.dot(emb_ref[...].reshape(T * B, E), w_ih_ref[...],
                 preferred_element_type=jnp.float32) + b_ih_ref[...]
    gi_scr[...] = gi.reshape(T, B, H6)

    w_hh = w_hh_ref[...]
    b_hh = b_hh_ref[...]

    def gru_gates(gi_d, gh_d, h_d):
        # PyTorch gate order (r, z, n)
        r = jax.nn.sigmoid(gi_d[:, :H] + gh_d[:, :H])
        z = jax.nn.sigmoid(gi_d[:, H:2 * H] + gh_d[:, H:2 * H])
        n = jnp.tanh(gi_d[:, 2 * H:] + r * gh_d[:, 2 * H:])
        return (1.0 - z) * n + z * h_d

    def step(k, h_cat):                       # h_cat = [h_fwd | h_bwd], (B, 2H)
        tf = k                                # forward time index
        tb = T - 1 - k                        # backward time index
        # single merged recurrent matmul — the only dot on the serial dependence chain
        gh = jnp.dot(h_cat, w_hh, preferred_element_type=jnp.float32) + b_hh   # (B, 6H)
        gi_f = gi_scr[tf]                     # (B, 6H); forward gates live in [:, :3H]
        gi_b = gi_scr[tb]                     # backward gates live in [:, 3H:]
        h_f = h_cat[:, :H]
        h_b = h_cat[:, H:]

        hf_new = gru_gates(gi_f[:, :H3], gh[:, :H3], h_f)
        hb_new = gru_gates(gi_b[:, H3:], gh[:, H3:], h_b)

        mf = mask_ref[tf]                     # (B, 1) validity mask (t < length)
        mb = mask_ref[tb]
        # contiguous full-tile, time-major writes straight into the output (no scratch, no concat)
        out_ref[0, tf] = mf * hf_new
        out_ref[1, tb] = mb * hb_new
        # packed-sequence semantics: hidden frozen at padded positions
        hf_next = mf * hf_new + (1.0 - mf) * h_f
        hb_next = mb * hb_new + (1.0 - mb) * h_b
        return jnp.concatenate([hf_next, hb_next], axis=-1)

    h0 = jnp.zeros((B, 2 * H), jnp.float32)
    h_final = jax.lax.fori_loop(0, T, step, h0, unroll=True)

    # hid = tanh(fc(cat([h_fwd_final, h_bwd_final], dim=1)))
    hid_ref[...] = jnp.tanh(
        jnp.dot(h_final, w_fc_ref[...], preferred_element_type=jnp.float32) + b_fc_ref[...])


# ----------------------------------------------------------------------------
# Wrapper (layout plumbing only: embedding gather, batch padding, time-major
# transpose, fused/block-diagonal parameter re-layout).
# ----------------------------------------------------------------------------
def encoder_forward(x, lengths, params, *, batch_block=SUBLANES):
    B, T = x.shape
    E = params['embedding'].shape[1]
    H = params['w_hh_f'].shape[1]
    Hdec = params['w_fc'].shape[0]

    # pad batch to a sublane multiple; padded rows get length 0 -> fully masked, then dropped
    Bp = ((B + batch_block - 1) // batch_block) * batch_block
    pad = Bp - B
    x_p = jnp.pad(x, ((0, pad), (0, 0)))
    len_p = jnp.pad(lengths, (0, pad))

    emb_tm = jnp.transpose(params['embedding'][x_p].astype(jnp.float32), (1, 0, 2))     # (T, Bp, E)
    mask_tm = (jnp.arange(T)[:, None] < len_p[None, :]).astype(jnp.float32)[..., None]  # (T, Bp, 1)

    # fused input-projection weights and block-diagonal recurrent weights (pure re-layout)
    w_ih = jnp.concatenate([params['w_ih_f'].T, params['w_ih_b'].T], axis=1)            # (E, 6H)
    b_ih = jnp.concatenate([params['b_ih_f'], params['b_ih_b']])[None, :]               # (1, 6H)
    zeros = jnp.zeros((H, 3 * H), jnp.float32)
    w_hh = jnp.concatenate([
        jnp.concatenate([params['w_hh_f'].T, zeros], axis=1),
        jnp.concatenate([zeros, params['w_hh_b'].T], axis=1)], axis=0)                  # (2H, 6H)
    b_hh = jnp.concatenate([params['b_hh_f'], params['b_hh_b']])[None, :]               # (1, 6H)
    w_fc = params['w_fc'].T                                                             # (2H, Hdec)
    b_fc = params['b_fc'][None, :]                                                      # (1, Hdec)

    BB = batch_block
    nb = Bp // BB

    in_specs = [
        pl.BlockSpec((T, BB, E), lambda i: (0, i, 0)),          # emb, time-major
        pl.BlockSpec((T, BB, 1), lambda i: (0, i, 0)),          # mask, time-major
        pl.BlockSpec((E, 6 * H), lambda i: (0, 0)),             # w_ih fused
        pl.BlockSpec((1, 6 * H), lambda i: (0, 0)),             # b_ih
        pl.BlockSpec((2 * H, 6 * H), lambda i: (0, 0)),         # w_hh block-diagonal
        pl.BlockSpec((1, 6 * H), lambda i: (0, 0)),             # b_hh
        pl.BlockSpec((2 * H, Hdec), lambda i: (0, 0)),          # w_fc
        pl.BlockSpec((1, Hdec), lambda i: (0, 0)),              # b_fc
    ]
    out_specs = (
        pl.BlockSpec((2, T, BB, H), lambda i: (0, 0, i, 0)),    # out, direction/time-major
        pl.BlockSpec((BB, Hdec), lambda i: (i, 0)),             # hid
    )

    flops = (2 * T * Bp * E * 6 * H            # hoisted input projection
             + 2 * T * Bp * 2 * H * 6 * H      # recurrent matmuls
             + 2 * Bp * 2 * H * Hdec)          # fc head
    transcendentals = 6 * T * Bp * H + Bp * Hdec
    bytes_accessed = 4 * (T * Bp * E + T * Bp + E * 6 * H + 2 * 6 * H
                          + 2 * H * 6 * H + 2 * H * Hdec + Hdec
                          + 2 * T * Bp * H + Bp * Hdec)

    out_dm, hid_p = pl.pallas_call(
        encoder_kernel,
        out_shape=(jax.ShapeDtypeStruct((2, T, Bp, H), jnp.float32),
                   jax.ShapeDtypeStruct((Bp, Hdec), jnp.float32)),
        grid=(nb,),
        in_specs=in_specs,
        out_specs=out_specs,
        scratch_shapes=[pltpu.VMEM((T, BB, 6 * H), jnp.float32)],   # hoisted gi for all timesteps
        compiler_params=pltpu.CompilerParams(
            dimension_semantics=("parallel",),
            vmem_limit_bytes=32 * 1024 * 1024),
        cost_estimate=pl.CostEstimate(flops=flops,
                                      transcendentals=transcendentals,
                                      bytes_accessed=bytes_accessed),
    )(emb_tm, mask_tm, w_ih, b_ih, w_hh, b_hh, w_fc, b_fc)

    # (2, T, Bp, H) -> (Bp, T, 2, H) -> (B, T, 2H): PyTorch bidirectional output layout
    out = jnp.transpose(out_dm, (2, 1, 0, 3)).reshape(Bp, T, 2 * H)[:B]
    hid = hid_p[:B][None, :, :]                                     # (1, B, dec_hidden)
    return out, hid


# ----------------------------------------------------------------------------
# Pure-JAX reference (mirrors the PyTorch packed bidirectional GRU semantics).
# ----------------------------------------------------------------------------
def reference_forward(x, lengths, params):
    emb = params['embedding'][x].astype(jnp.float32)
    B, T, _ = emb.shape
    H = params['w_hh_f'].shape[1]
    mask = (jnp.arange(T)[None, :] < lengths[:, None]).astype(jnp.float32)
    hp = jax.lax.Precision.HIGHEST

    def run_dir(w_ih, w_hh, b_ih, b_hh, reverse):
        ts = jnp.arange(T)
        if reverse:
            ts = ts[::-1]

        def step(h, t):
            x_t = emb[:, t]
            m = mask[:, t][:, None]
            gi = jnp.dot(x_t, w_ih.T, precision=hp) + b_ih
            gh = jnp.dot(h, w_hh.T, precision=hp) + b_hh
            r = jax.nn.sigmoid(gi[:, :H] + gh[:, :H])
            z = jax.nn.sigmoid(gi[:, H:2 * H] + gh[:, H:2 * H])
            n = jnp.tanh(gi[:, 2 * H:] + r * gh[:, 2 * H:])
            h_new = (1.0 - z) * n + z * h
            return m * h_new + (1.0 - m) * h, m * h_new

        hT, outs = jax.lax.scan(step, jnp.zeros((B, H), jnp.float32), ts)
        outs = jnp.transpose(outs, (1, 0, 2))
        if reverse:
            outs = outs[:, ::-1]
        return outs, hT

    out_f, hf = run_dir(params['w_ih_f'], params['w_hh_f'], params['b_ih_f'], params['b_hh_f'], False)
    out_b, hb = run_dir(params['w_ih_b'], params['w_hh_b'], params['b_ih_b'], params['b_hh_b'], True)
    out = jnp.concatenate([out_f, out_b], -1)
    hid = jnp.tanh(jnp.dot(jnp.concatenate([hf, hb], -1), params['w_fc'].T, precision=hp)
                   + params['b_fc'])
    return out, hid[None]


# ----------------------------------------------------------------------------
# Deterministic parameter init (shapes from Encoder.__init__).
# ----------------------------------------------------------------------------
def init_params(key, vocab_size, embed_size, enc_hidden, dec_hidden):
    keys = jax.random.split(key, 11)
    k_rnn = 1.0 / math.sqrt(enc_hidden)
    k_fc = 1.0 / math.sqrt(2 * enc_hidden)

    def u(k, shape, bound):
        return jax.random.uniform(k, shape, jnp.float32, -bound, bound)

    return {
        'embedding': jax.random.normal(keys[0], (vocab_size, embed_size), jnp.float32),
        # forward direction
        'w_ih_f': u(keys[1], (3 * enc_hidden, embed_size), k_rnn),
        'w_hh_f': u(keys[2], (3 * enc_hidden, enc_hidden), k_rnn),
        'b_ih_f': u(keys[3], (3 * enc_hidden,), k_rnn),
        'b_hh_f': u(keys[4], (3 * enc_hidden,), k_rnn),
        # backward direction
        'w_ih_b': u(keys[5], (3 * enc_hidden, embed_size), k_rnn),
        'w_hh_b': u(keys[6], (3 * enc_hidden, enc_hidden), k_rnn),
        'b_ih_b': u(keys[7], (3 * enc_hidden,), k_rnn),
        'b_hh_b': u(keys[8], (3 * enc_hidden,), k_rnn),
        # fc: enc_hidden*2 -> dec_hidden
        'w_fc': u(keys[9], (dec_hidden, 2 * enc_hidden), k_fc),
        'b_fc': u(keys[10], (dec_hidden,), k_fc),
    }


if __name__ == "__main__":
    VOCAB, E, H, HDEC = 50, 32, 32, 32
    B, T = 2, 8

    key = jax.random.PRNGKey(0)
    k_params, k_x = jax.random.split(key)
    params = init_params(k_params, VOCAB, E, H, HDEC)

    x = jax.random.randint(k_x, (B, T), 0, VOCAB, dtype=jnp.int32)
    lengths = jnp.array([T, 5], dtype=jnp.int32)   # max(lengths) == T so padded seq length == T

    out, hid = encoder_forward(x, lengths, params)
    jax.block_until_ready((out, hid))

    out_ref, hid_ref = reference_forward(x, lengths, params)
    assert out.shape == (B, T, 2 * H) and hid.shape == (1, B, HDEC)
    assert jnp.allclose(out, out_ref, atol=1e-3, rtol=1e-3), "out mismatch vs reference"
    assert jnp.allclose(hid, hid_ref, atol=1e-3, rtol=1e-3), "hid mismatch vs reference"

    print("KERNEL_OK")
</pallas_src>

<mosaic_0001>
module attributes {stable_mosaic.version = 11 : i64} {
  func.func @encoder_kernel(%arg0: i32, %arg1: memref<8x8x32xf32, #tpu.memory_space<vmem>>, %arg2: memref<8x8x1xf32, #tpu.memory_space<vmem>>, %arg3: memref<32x192xf32, #tpu.memory_space<vmem>>, %arg4: memref<1x192xf32, #tpu.memory_space<vmem>>, %arg5: memref<64x192xf32, #tpu.memory_space<vmem>>, %arg6: memref<1x192xf32, #tpu.memory_space<vmem>>, %arg7: memref<64x32xf32, #tpu.memory_space<vmem>>, %arg8: memref<1x32xf32, #tpu.memory_space<vmem>>, %arg9: memref<2x8x8x32xf32, #tpu.memory_space<vmem>>, %arg10: memref<8x32xf32, #tpu.memory_space<vmem>>, %arg11: memref<8x8x192xf32, #tpu.memory_space<vmem>>) attributes {dimension_semantics = [#tpu.dimension_semantics<parallel>], iteration_bounds = array<i64: 1>, scalar_prefetch = 0 : i64, scratch_operands = 1 : i64, tpu.core_type = #tpu.core_type<tc>, window_params = [{transform_indices = @transform_0, window_bounds = array<i64: 8, 8, 32>}, {transform_indices = @transform_1, window_bounds = array<i64: 8, 8, 1>}, {pipeline_mode = #tpu.pipeline_mode<synchronous>, transform_indices = @transform_2, window_bounds = array<i64: 32, 192>}, {pipeline_mode = #tpu.pipeline_mode<synchronous>, transform_indices = @transform_3, window_bounds = array<i64: 1, 192>}, {pipeline_mode = #tpu.pipeline_mode<synchronous>, transform_indices = @transform_4, window_bounds = array<i64: 64, 192>}, {pipeline_mode = #tpu.pipeline_mode<synchronous>, transform_indices = @transform_5, window_bounds = array<i64: 1, 192>}, {pipeline_mode = #tpu.pipeline_mode<synchronous>, transform_indices = @transform_6, window_bounds = array<i64: 64, 32>}, {pipeline_mode = #tpu.pipeline_mode<synchronous>, transform_indices = @transform_7, window_bounds = array<i64: 1, 32>}, {transform_indices = @transform_8, window_bounds = array<i64: 2, 8, 8, 32>}, {transform_indices = @transform_9, window_bounds = array<i64: 8, 32>}]} {
    %c0 = arith.constant 0 : index
    %c0_0 = arith.constant 0 : index
    %c0_1 = arith.constant 0 : index
    %0 = vector.load %arg1[%c0, %c0_0, %c0_1] : memref<8x8x32xf32, #tpu.memory_space<vmem>>, vector<8x8x32xf32>
    %1 = vector.shape_cast %0 : vector<8x8x32xf32> to vector<64x32xf32>
    %c0_2 = arith.constant 0 : index
    %c0_3 = arith.constant 0 : index
    %2 = vector.load %arg3[%c0_2, %c0_3] : memref<32x192xf32, #tpu.memory_space<vmem>>, vector<32x192xf32>
    %cst = arith.constant dense<0.000000e+00> : vector<64x192xf32>
    %3 = tpu.matmul %1, %2, %cst {dimension_numbers = #tpu.dot_dimension_numbers<[1], [0], [0], [1], [0, 0, 1, 1], [], []>} : vector<64x32xf32>, vector<32x192xf32>, vector<64x192xf32> -> vector<64x192xf32>
    %c0_4 = arith.constant 0 : index
    %c0_5 = arith.constant 0 : index
    %4 = vector.load %arg4[%c0_4, %c0_5] : memref<1x192xf32, #tpu.memory_space<vmem>>, vector<1x192xf32>
    %5 = vector.broadcast %4 : vector<1x192xf32> to vector<64x192xf32>
    %6 = arith.addf %3, %5 : vector<64x192xf32>
    %7 = vector.shape_cast %6 : vector<64x192xf32> to vector<8x8x192xf32>
    %c0_6 = arith.constant 0 : index
    %c0_7 = arith.constant 0 : index
    %c0_8 = arith.constant 0 : index
    %8 = vector.load %arg11[%c0_6, %c0_7, %c0_8] : memref<8x8x192xf32, #tpu.memory_space<vmem>>, vector<8x8x192xf32>
    tpu.vector_store %arg11[%c0_6, %c0_7, %c0_8], %7 {strides = array<i32>} : memref<8x8x192xf32, #tpu.memory_space<vmem>>, vector<8x8x192xf32>,
    %c0_9 = arith.constant 0 : index
    %c0_10 = arith.constant 0 : index
    %9 = vector.load %arg5[%c0_9, %c0_10] : memref<64x192xf32, #tpu.memory_space<vmem>>, vector<64x192xf32>
    %c0_11 = arith.constant 0 : index
    %c0_12 = arith.constant 0 : index
    %10 = vector.load %arg6[%c0_11, %c0_12] : memref<1x192xf32, #tpu.memory_space<vmem>>, vector<1x192xf32>
    %cst_13 = arith.constant 0.000000e+00 : f32
    %11 = vector.broadcast %cst_13 : f32 to vector<8x64xf32>
    %c0_i32 = arith.constant 0 : i32
    %c7_i32 = arith.constant 7 : i32
    %12 = arith.subi %c7_i32, %c0_i32 : i32
    %cst_14 = arith.constant dense<0.000000e+00> : vector<8x192xf32>
    %13 = tpu.matmul %11, %9, %cst_14 {dimension_numbers = #tpu.dot_dimension_numbers<[1], [0], [0], [1], [0, 0, 1, 1], [], []>} : vector<8x64xf32>, vector<64x192xf32>, vector<8x192xf32> -> vector<8x192xf32>
    %14 = vector.broadcast %10 : vector<1x192xf32> to vector<8x192xf32>
    %15 = arith.addf %13, %14 : vector<8x192xf32>
    %16 = arith.index_cast %c0_i32 : i32 to index
    %c0_15 = arith.constant 0 : index
    %c0_16 = arith.constant 0 : index
    %17 = vector.load %arg11[%16, %c0_15, %c0_16] : memref<8x8x192xf32, #tpu.memory_space<vmem>>, vector<1x8x192xf32>
    %18 = vector.shape_cast %17 : vector<1x8x192xf32> to vector<8x192xf32>
    %19 = arith.index_cast %12 : i32 to index
    %c0_17 = arith.constant 0 : index
    %c0_18 = arith.constant 0 : index
    %20 = vector.load %arg11[%19, %c0_17, %c0_18] : memref<8x8x192xf32, #tpu.memory_space<vmem>>, vector<1x8x192xf32>
    %21 = vector.shape_cast %20 : vector<1x8x192xf32> to vector<8x192xf32>
    %22 = vector.extract_strided_slice %11 {offsets = [0, 0], sizes = [8, 32], strides = [1, 1]} : vector<8x64xf32> to vector<8x32xf32>
    %23 = vector.extract_strided_slice %11 {offsets = [0, 32], sizes = [8, 32], strides = [1, 1]} : vector<8x64xf32> to vector<8x32xf32>
    %24 = vector.extract_strided_slice %18 {offsets = [0, 0], sizes = [8, 96], strides = [1, 1]} : vector<8x192xf32> to vector<8x96xf32>
    %25 = vector.extract_strided_slice %15 {offsets = [0, 0], sizes = [8, 96], strides = [1, 1]} : vector<8x192xf32> to vector<8x96xf32>
    %26 = vector.extract_strided_slice %24 {offsets = [0, 0], sizes = [8, 32], strides = [1, 1]} : vector<8x96xf32> to vector<8x32xf32>
    %27 = vector.extract_strided_slice %25 {offsets = [0, 0], sizes = [8, 32], strides = [1, 1]} : vector<8x96xf32> to vector<8x32xf32>
    %28 = arith.addf %26, %27 : vector<8x32xf32>
    %29 = arith.negf %28 : vector<8x32xf32>
    %30 = math.exp %29 : vector<8x32xf32>
    %cst_19 = arith.constant 1.000000e+00 : f32
    %31 = vector.broadcast %cst_19 : f32 to vector<8x32xf32>
    %32 = arith.addf %31, %30 : vector<8x32xf32>
    %33 = arith.divf %31, %32 : vector<8x32xf32>
    %34 = vector.extract_strided_slice %24 {offsets = [0, 32], sizes = [8, 32], strides = [1, 1]} : vector<8x96xf32> to vector<8x32xf32>
    %35 = vector.extract_strided_slice %25 {offsets = [0, 32], sizes = [8, 32], strides = [1, 1]} : vector<8x96xf32> to vector<8x32xf32>
    %36 = arith.addf %34, %35 : vector<8x32xf32>
    %37 = arith.negf %36 : vector<8x32xf32>
    %38 = math.exp %37 : vector<8x32xf32>
    %cst_20 = arith.constant 1.000000e+00 : f32
    %39 = vector.broadcast %cst_20 : f32 to vector<8x32xf32>
    %40 = arith.addf %39, %38 : vector<8x32xf32>
    %41 = arith.divf %39, %40 : vector<8x32xf32>
    %42 = vector.extract_strided_slice %24 {offsets = [0, 64], sizes = [8, 32], strides = [1, 1]} : vector<8x96xf32> to vector<8x32xf32>
    %43 = vector.extract_strided_slice %25 {offsets = [0, 64], sizes = [8, 32], strides = [1, 1]} : vector<8x96xf32> to vector<8x32xf32>
    %44 = arith.mulf %33, %43 : vector<8x32xf32>
    %45 = arith.addf %42, %44 : vector<8x32xf32>
    %46 = math.tanh %45 : vector<8x32xf32>
    %cst_21 = arith.constant 1.000000e+00 : f32
    %47 = vector.broadcast %cst_21 : f32 to vector<8x32xf32>
    %48 = arith.subf %47, %41 : vector<8x32xf32>
    %49 = arith.mulf %48, %46 : vector<8x32xf32>
    %50 = arith.mulf %41, %22 : vector<8x32xf32>
    %51 = arith.addf %49, %50 : vector<8x32xf32>
    %52 = vector.extract_strided_slice %21 {offsets = [0, 96], sizes = [8, 96], strides = [1, 1]} : vector<8x192xf32> to vector<8x96xf32>
    %53 = vector.extract_strided_slice %15 {offsets = [0, 96], sizes = [8, 96], strides = [1, 1]} : vector<8x192xf32> to vector<8x96xf32>
    %54 = vector.extract_strided_slice %52 {offsets = [0, 0], sizes = [8, 32], strides = [1, 1]} : vector<8x96xf32> to vector<8x32xf32>
    %55 = vector.extract_strided_slice %53 {offsets = [0, 0], sizes = [8, 32], strides = [1, 1]} : vector<8x96xf32> to vector<8x32xf32>
    %56 = arith.addf %54, %55 : vector<8x32xf32>
    %57 = arith.negf %56 : vector<8x32xf32>
    %58 = math.exp %57 : vector<8x32xf32>
    %cst_22 = arith.constant 1.000000e+00 : f32
    %59 = vector.broadcast %cst_22 : f32 to vector<8x32xf32>
    %60 = arith.addf %59, %58 : vector<8x32xf32>
    %61 = arith.divf %59, %60 : vector<8x32xf32>
    %62 = vector.extract_strided_slice %52 {offsets = [0, 32], sizes = [8, 32], strides = [1, 1]} : vector<8x96xf32> to vector<8x32xf32>
    %63 = vector.extract_strided_slice %53 {offsets = [0, 32], sizes = [8, 32], strides = [1, 1]} : vector<8x96xf32> to vector<8x32xf32>
    %64 = arith.addf %62, %63 : vector<8x32xf32>
    %65 = arith.negf %64 : vector<8x32xf32>
    %66 = math.exp %65 : vector<8x32xf32>
    %cst_23 = arith.constant 1.000000e+00 : f32
    %67 = vector.broadcast %cst_23 : f32 to vector<8x32xf32>
    %68 = arith.addf %67, %66 : vector<8x32xf32>
    %69 = arith.divf %67, %68 : vector<8x32xf32>
    %70 = vector.extract_strided_slice %52 {offsets = [0, 64], sizes = [8, 32], strides = [1, 1]} : vector<8x96xf32> to vector<8x32xf32>
    %71 = vector.extract_strided_slice %53 {offsets = [0, 64], sizes = [8, 32], strides = [1, 1]} : vector<8x96xf32> to vector<8x32xf32>
    %72 = arith.mulf %61, %71 : vector<8x32xf32>
    %73 = arith.addf %70, %72 : vector<8x32xf32>
    %74 = math.tanh %73 : vector<8x32xf32>
    %cst_24 = arith.constant 1.000000e+00 : f32
    %75 = vector.broadcast %cst_24 : f32 to vector<8x32xf32>
    %76 = arith.subf %75, %69 : vector<8x32xf32>
    %77 = arith.mulf %76, %74 : vector<8x32xf32>
    %78 = arith.mulf %69, %23 : vector<8x32xf32>
    %79 = arith.addf %77, %78 : vector<8x32xf32>
    %80 = arith.index_cast %c0_i32 : i32 to index
    %c0_25 = arith.constant 0 : index
    %c0_26 = arith.constant 0 : index
    %81 = vector.load %arg2[%80, %c0_25, %c0_26] : memref<8x8x1xf32, #tpu.memory_space<vmem>>, vector<1x8x1xf32>
    %82 = vector.shape_cast %81 : vector<1x8x1xf32> to vector<8x1xf32>
    %83 = arith.index_cast %12 : i32 to index
    %c0_27 = arith.constant 0 : index
    %c0_28 = arith.constant 0 : index
    %84 = vector.load %arg2[%83, %c0_27, %c0_28] : memref<8x8x1xf32, #tpu.memory_space<vmem>>, vector<1x8x1xf32>
    %85 = vector.shape_cast %84 : vector<1x8x1xf32> to vector<8x1xf32>
    %86 = vector.broadcast %82 : vector<8x1xf32> to vector<8x32xf32>
    %87 = arith.mulf %86, %51 : vector<8x32xf32>
    %c0_29 = arith.constant 0 : index
    %88 = arith.index_cast %c0_i32 : i32 to index
    %c0_30 = arith.constant 0 : index
    %c0_31 = arith.constant 0 : index
    %89 = vector.load %arg9[%c0_29, %88, %c0_30, %c0_31] : memref<2x8x8x32xf32, #tpu.memory_space<vmem>>, vector<1x1x8x32xf32>
    %90 = vector.shape_cast %89 : vector<1x1x8x32xf32> to vector<8x32xf32>
    %91 = vector.shape_cast %87 : vector<8x32xf32> to vector<1x1x8x32xf32>
    tpu.vector_store %arg9[%c0_29, %88, %c0_30, %c0_31], %91 {strides = array<i32>} : memref<2x8x8x32xf32, #tpu.memory_space<vmem>>, vector<1x1x8x32xf32>,
    %92 = vector.broadcast %85 : vector<8x1xf32> to vector<8x32xf32>
    %93 = arith.mulf %92, %79 : vector<8x32xf32>
    %c1 = arith.constant 1 : index
    %94 = arith.index_cast %12 : i32 to index
    %c0_32 = arith.constant 0 : index
    %c0_33 = arith.constant 0 : index
    %95 = vector.load %arg9[%c1, %94, %c0_32, %c0_33] : memref<2x8x8x32xf32, #tpu.memory_space<vmem>>, vector<1x1x8x32xf32>
    %96 = vector.shape_cast %95 : vector<1x1x8x32xf32> to vector<8x32xf32>
    %97 = vector.shape_cast %93 : vector<8x32xf32> to vector<1x1x8x32xf32>
    tpu.vector_store %arg9[%c1, %94, %c0_32, %c0_33], %97 {strides = array<i32>} : memref<2x8x8x32xf32, #tpu.memory_space<vmem>>, vector<1x1x8x32xf32>,
    %98 = vector.broadcast %82 : vector<8x1xf32> to vector<8x32xf32>
    %99 = arith.mulf %98, %51 : vector<8x32xf32>
    %cst_34 = arith.constant 1.000000e+00 : f32
    %100 = vector.broadcast %cst_34 : f32 to vector<8x1xf32>
    %101 = arith.subf %100, %82 : vector<8x1xf32>
    %102 = vector.broadcast %101 : vector<8x1xf32> to vector<8x32xf32>
    %103 = arith.mulf %102, %22 : vector<8x32xf32>
    %104 = arith.addf %99, %103 : vector<8x32xf32>
    %105 = vector.broadcast %85 : vector<8x1xf32> to vector<8x32xf32>
    %106 = arith.mulf %105, %79 : vector<8x32xf32>
    %cst_35 = arith.constant 1.000000e+00 : f32
    %107 = vector.broadcast %cst_35 : f32 to vector<8x1xf32>
    %108 = arith.subf %107, %85 : vector<8x1xf32>
    %109 = vector.broadcast %108 : vector<8x1xf32> to vector<8x32xf32>
    %110 = arith.mulf %109, %23 : vector<8x32xf32>
    %111 = arith.addf %106, %110 : vector<8x32xf32>
    %112 = tpu.concatenate %104, %111 in 1 : vector<8x32xf32>, vector<8x32xf32> -> vector<8x64xf32>
    %c1_i32 = arith.constant 1 : i32
    %c7_i32_36 = arith.constant 7 : i32
    %113 = arith.subi %c7_i32_36, %c1_i32 : i32
    %cst_37 = arith.constant dense<0.000000e+00> : vector<8x192xf32>
    %114 = tpu.matmul %112, %9, %cst_37 {dimension_numbers = #tpu.dot_dimension_numbers<[1], [0], [0], [1], [0, 0, 1, 1], [], []>} : vector<8x64xf32>, vector<64x192xf32>, vector<8x192xf32> -> vector<8x192xf32>
    %115 = vector.broadcast %10 : vector<1x192xf32> to vector<8x192xf32>
    %116 = arith.addf %114, %115 : vector<8x192xf32>
    %117 = arith.index_cast %c1_i32 : i32 to index
    %c0_38 = arith.constant 0 : index
    %c0_39 = arith.constant 0 : index
    %118 = vector.load %arg11[%117, %c0_38, %c0_39] : memref<8x8x192xf32, #tpu.memory_space<vmem>>, vector<1x8x192xf32>
    %119 = vector.shape_cast %118 : vector<1x8x192xf32> to vector<8x192xf32>
    %120 = arith.index_cast %113 : i32 to index
    %c0_40 = arith.constant 0 : index
    %c0_41 = arith.constant 0 : index
    %121 = vector.load %arg11[%120, %c0_40, %c0_41] : memref<8x8x192xf32, #tpu.memory_space<vmem>>, vector<1x8x192xf32>
    %122 = vector.shape_cast %121 : vector<1x8x192xf32> to vector<8x192xf32>
    %123 = vector.extract_strided_slice %112 {offsets = [0, 0], sizes = [8, 32], strides = [1, 1]} : vector<8x64xf32> to vector<8x32xf32>
    %124 = vector.extract_strided_slice %112 {offsets = [0, 32], sizes = [8, 32], strides = [1, 1]} : vector<8x64xf32> to vector<8x32xf32>
    %125 = vector.extract_strided_slice %119 {offsets = [0, 0], sizes = [8, 96], strides = [1, 1]} : vector<8x192xf32> to vector<8x96xf32>
    %126 = vector.extract_strided_slice %116 {offsets = [0, 0], sizes = [8, 96], strides = [1, 1]} : vector<8x192xf32> to vector<8x96xf32>
    %127 = vector.extract_strided_slice %125 {offsets = [0, 0], sizes = [8, 32], strides = [1, 1]} : vector<8x96xf32> to vector<8x32xf32>
    %128 = vector.extract_strided_slice %126 {offsets = [0, 0], sizes = [8, 32], strides = [1, 1]} : vector<8x96xf32> to vector<8x32xf32>
    %129 = arith.addf %127, %128 : vector<8x32xf32>
    %130 = arith.negf %129 : vector<8x32xf32>
    %131 = math.exp %130 : vector<8x32xf32>
    %cst_42 = arith.constant 1.000000e+00 : f32
    %132 = vector.broadcast %cst_42 : f32 to vector<8x32xf32>
    %133 = arith.addf %132, %131 : vector<8x32xf32>
    %134 = arith.divf %132, %133 : vector<8x32xf32>
    %135 = vector.extract_strided_slice %125 {offsets = [0, 32], sizes = [8, 32], strides = [1, 1]} : vector<8x96xf32> to vector<8x32xf32>
    %136 = vector.extract_strided_slice %126 {offsets = [0, 32], sizes = [8, 32], strides = [1, 1]} : vector<8x96xf32> to vector<8x32xf32>
    %137 = arith.addf %135, %136 : vector<8x32xf32>
    %138 = arith.negf %137 : vector<8x32xf32>
    %139 = math.exp %138 : vector<8x32xf32>
    %cst_43 = arith.constant 1.000000e+00 : f32
    %140 = vector.broadcast %cst_43 : f32 to vector<8x32xf32>
    %141 = arith.addf %140, %139 : vector<8x32xf32>
    %142 = arith.divf %140, %141 : vector<8x32xf32>
    %143 = vector.extract_strided_slice %125 {offsets = [0, 64], sizes = [8, 32], strides = [1, 1]} : vector<8x96xf32> to vector<8x32xf32>
    %144 = vector.extract_strided_slice %126 {offsets = [0, 64], sizes = [8, 32], strides = [1, 1]} : vector<8x96xf32> to vector<8x32xf32>
    %145 = arith.mulf %134, %144 : vector<8x32xf32>
    %146 = arith.addf %143, %145 : vector<8x32xf32>
    %147 = math.tanh %146 : vector<8x32xf32>
    %cst_44 = arith.constant 1.000000e+00 : f32
    %148 = vector.broadcast %cst_44 : f32 to vector<8x32xf32>
    %149 = arith.subf %148, %142 : vector<8x32xf32>
    %150 = arith.mulf %149, %147 : vector<8x32xf32>
    %151 = arith.mulf %142, %123 : vector<8x32xf32>
    %152 = arith.addf %150, %151 : vector<8x32xf32>
    %153 = vector.extract_strided_slice %122 {offsets = [0, 96], sizes = [8, 96], strides = [1, 1]} : vector<8x192xf32> to vector<8x96xf32>
    %154 = vector.extract_strided_slice %116 {offsets = [0, 96], sizes = [8, 96], strides = [1, 1]} : vector<8x192xf32> to vector<8x96xf32>
    %155 = vector.extract_strided_slice %153 {offsets = [0, 0], sizes = [8, 32], strides = [1, 1]} : vector<8x96xf32> to vector<8x32xf32>
    %156 = vector.extract_strided_slice %154 {offsets = [0, 0], sizes = [8, 32], strides = [1, 1]} : vector<8x96xf32> to vector<8x32xf32>
    %157 = arith.addf %155, %156 : vector<8x32xf32>
    %158 = arith.negf %157 : vector<8x32xf32>
    %159 = math.exp %158 : vector<8x32xf32>
    %cst_45 = arith.constant 1.000000e+00 : f32
    %160 = vector.broadcast %cst_45 : f32 to vector<8x32xf32>
    %161 = arith.addf %160, %159 : vector<8x32xf32>
    %162 = arith.divf %160, %161 : vector<8x32xf32>
    %163 = vector.extract_strided_slice %153 {offsets = [0, 32], sizes = [8, 32], strides = [1, 1]} : vector<8x96xf32> to vector<8x32xf32>
    %164 = vector.extract_strided_slice %154 {offsets = [0, 32], sizes = [8, 32], strides = [1, 1]} : vector<8x96xf32> to vector<8x32xf32>
    %165 = arith.addf %163, %164 : vector<8x32xf32>
    %166 = arith.negf %165 : vector<8x32xf32>
    %167 = math.exp %166 : vector<8x32xf32>
    %cst_46 = arith.constant 1.000000e+00 : f32
    %168 = vector.broadcast %cst_46 : f32 to vector<8x32xf32>
    %169 = arith.addf %168, %167 : vector<8x32xf32>
    %170 = arith.divf %168, %169 : vector<8x32xf32>
    %171 = vector.extract_strided_slice %153 {offsets = [0, 64], sizes = [8, 32], strides = [1, 1]} : vector<8x96xf32> to vector<8x32xf32>
    %172 = vector.extract_strided_slice %154 {offsets = [0, 64], sizes = [8, 32], strides = [1, 1]} : vector<8x96xf32> to vector<8x32xf32>
    %173 = arith.mulf %162, %172 : vector<8x32xf32>
    %174 = arith.addf %171, %173 : vector<8x32xf32>
    %175 = math.tanh %174 : vector<8x32xf32>
    %cst_47 = arith.constant 1.000000e+00 : f32
    %176 = vector.broadcast %cst_47 : f32 to vector<8x32xf32>
    %177 = arith.subf %176, %170 : vector<8x32xf32>
    %178 = arith.mulf %177, %175 : vector<8x32xf32>
    %179 = arith.mulf %170, %124 : vector<8x32xf32>
    %180 = arith.addf %178, %179 : vector<8x32xf32>
    %181 = arith.index_cast %c1_i32 : i32 to index
    %c0_48 = arith.constant 0 : index
    %c0_49 = arith.constant 0 : index
    %182 = vector.load %arg2[%181, %c0_48, %c0_49] : memref<8x8x1xf32, #tpu.memory_space<vmem>>, vector<1x8x1xf32>
    %183 = vector.shape_cast %182 : vector<1x8x1xf32> to vector<8x1xf32>
    %184 = arith.index_cast %113 : i32 to index
    %c0_50 = arith.constant 0 : index
    %c0_51 = arith.constant 0 : index
    %185 = vector.load %arg2[%184, %c0_50, %c0_51] : memref<8x8x1xf32, #tpu.memory_space<vmem>>, vector<1x8x1xf32>
    %186 = vector.shape_cast %185 : vector<1x8x1xf32> to vector<8x1xf32>
    %187 = vector.broadcast %183 : vector<8x1xf32> to vector<8x32xf32>
    %188 = arith.mulf %187, %152 : vector<8x32xf32>
    %c0_52 = arith.constant 0 : index
    %189 = arith.index_cast %c1_i32 : i32 to index
    %c0_53 = arith.constant 0 : index
    %c0_54 = arith.constant 0 : index
    %190 = vector.load %arg9[%c0_52, %189, %c0_53, %c0_54] : memref<2x8x8x32xf32, #tpu.memory_space<vmem>>, vector<1x1x8x32xf32>
    %191 = vector.shape_cast %190 : vector<1x1x8x32xf32> to vector<8x32xf32>
    %192 = vector.shape_cast %188 : vector<8x32xf32> to vector<1x1x8x32xf32>
    tpu.vector_store %arg9[%c0_52, %189, %c0_53, %c0_54], %192 {strides = array<i32>} : memref<2x8x8x32xf32, #tpu.memory_space<vmem>>, vector<1x1x8x32xf32>,
    %193 = vector.broadcast %186 : vector<8x1xf32> to vector<8x32xf32>
    %194 = arith.mulf %193, %180 : vector<8x32xf32>
    %c1_55 = arith.constant 1 : index
    %195 = arith.index_cast %113 : i32 to index
    %c0_56 = arith.constant 0 : index
    %c0_57 = arith.constant 0 : index
    %196 = vector.load %arg9[%c1_55, %195, %c0_56, %c0_57] : memref<2x8x8x32xf32, #tpu.memory_space<vmem>>, vector<1x1x8x32xf32>
    %197 = vector.shape_cast %196 : vector<1x1x8x32xf32> to vector<8x32xf32>
    %198 = vector.shape_cast %194 : vector<8x32xf32> to vector<1x1x8x32xf32>
    tpu.vector_store %arg9[%c1_55, %195, %c0_56, %c0_57], %198 {strides = array<i32>} : memref<2x8x8x32xf32, #tpu.memory_space<vmem>>, vector<1x1x8x32xf32>,
    %199 = vector.broadcast %183 : vector<8x1xf32> to vector<8x32xf32>
    %200 = arith.mulf %199, %152 : vector<8x32xf32>
    %cst_58 = arith.constant 1.000000e+00 : f32
    %201 = vector.broadcast %cst_58 : f32 to vector<8x1xf32>
    %202 = arith.subf %201, %183 : vector<8x1xf32>
    %203 = vector.broadcast %202 : vector<8x1xf32> to vector<8x32xf32>
    %204 = arith.mulf %203, %123 : vector<8x32xf32>
    %205 = arith.addf %200, %204 : vector<8x32xf32>
    %206 = vector.broadcast %186 : vector<8x1xf32> to vector<8x32xf32>
    %207 = arith.mulf %206, %180 : vector<8x32xf32>
    %cst_59 = arith.constant 1.000000e+00 : f32
    %208 = vector.broadcast %cst_59 : f32 to vector<8x1xf32>
    %209 = arith.subf %208, %186 : vector<8x1xf32>
    %210 = vector.broadcast %209 : vector<8x1xf32> to vector<8x32xf32>
    %211 = arith.mulf %210, %124 : vector<8x32xf32>
    %212 = arith.addf %207, %211 : vector<8x32xf32>
    %213 = tpu.concatenate %205, %212 in 1 : vector<8x32xf32>, vector<8x32xf32> -> vector<8x64xf32>
    %c2_i32 = arith.constant 2 : i32
    %c7_i32_60 = arith.constant 7 : i32
    %214 = arith.subi %c7_i32_60, %c2_i32 : i32
    %cst_61 = arith.constant dense<0.000000e+00> : vector<8x192xf32>
    %215 = tpu.matmul %213, %9, %cst_61 {dimension_numbers = #tpu.dot_dimension_numbers<[1], [0], [0], [1], [0, 0, 1, 1], [], []>} : vector<8x64xf32>, vector<64x192xf32>, vector<8x192xf32> -> vector<8x192xf32>
    %216 = vector.broadcast %10 : vector<1x192xf32> to vector<8x192xf32>
    %217 = arith.addf %215, %216 : vector<8x192xf32>
    %218 = arith.index_cast %c2_i32 : i32 to index
    %c0_62 = arith.constant 0 : index
    %c0_63 = arith.constant 0 : index
    %219 = vector.load %arg11[%218, %c0_62, %c0_63] : memref<8x8x192xf32, #tpu.memory_space<vmem>>, vector<1x8x192xf32>
    %220 = vector.shape_cast %219 : vector<1x8x192xf32> to vector<8x192xf32>
    %221 = arith.index_cast %214 : i32 to index
    %c0_64 = arith.constant 0 : index
    %c0_65 = arith.constant 0 : index
    %222 = vector.load %arg11[%221, %c0_64, %c0_65] : memref<8x8x192xf32, #tpu.memory_space<vmem>>, vector<1x8x192xf32>
    %223 = vector.shape_cast %222 : vector<1x8x192xf32> to vector<8x192xf32>
    %224 = vector.extract_strided_slice %213 {offsets = [0, 0], sizes = [8, 32], strides = [1, 1]} : vector<8x64xf32> to vector<8x32xf32>
    %225 = vector.extract_strided_slice %213 {offsets = [0, 32], sizes = [8, 32], strides = [1, 1]} : vector<8x64xf32> to vector<8x32xf32>
    %226 = vector.extract_strided_slice %220 {offsets = [0, 0], sizes = [8, 96], strides = [1, 1]} : vector<8x192xf32> to vector<8x96xf32>
    %227 = vector.extract_strided_slice %217 {offsets = [0, 0], sizes = [8, 96], strides = [1, 1]} : vector<8x192xf32> to vector<8x96xf32>
    %228 = vector.extract_strided_slice %226 {offsets = [0, 0], sizes = [8, 32], strides = [1, 1]} : vector<8x96xf32> to vector<8x32xf32>
    %229 = vector.extract_strided_slice %227 {offsets = [0, 0], sizes = [8, 32], strides = [1, 1]} : vector<8x96xf32> to vector<8x32xf32>
    %230 = arith.addf %228, %229 : vector<8x32xf32>
    %231 = arith.negf %230 : vector<8x32xf32>
    %232 = math.exp %231 : vector<8x32xf32>
    %cst_66 = arith.constant 1.000000e+00 : f32
    %233 = vector.broadcast %cst_66 : f32 to vector<8x32xf32>
    %234 = arith.addf %233, %232 : vector<8x32xf32>
    %235 = arith.divf %233, %234 : vector<8x32xf32>
    %236 = vector.extract_strided_slice %226 {offsets = [0, 32], sizes = [8, 32], strides = [1, 1]} : vector<8x96xf32> to vector<8x32xf32>
    %237 = vector.extract_strided_slice %227 {offsets = [0, 32], sizes = [8, 32], strides = [1, 1]} : vector<8x96xf32> to vector<8x32xf32>
    %238 = arith.addf %236, %237 : vector<8x32xf32>
    %239 = arith.negf %238 : vector<8x32xf32>
    %240 = math.exp %239 : vector<8x32xf32>
    %cst_67 = arith.constant 1.000000e+00 : f32
    %241 = vector.broadcast %cst_67 : f32 to vector<8x32xf32>
    %242 = arith.addf %241, %240 : vector<8x32xf32>
    %243 = arith.divf %241, %242 : vector<8x32xf32>
    %244 = vector.extract_strided_slice %226 {offsets = [0, 64], sizes = [8, 32], strides = [1, 1]} : vector<8x96xf32> to vector<8x32xf32>
    %245 = vector.extract_strided_slice %227 {offsets = [0, 64], sizes = [8, 32], strides = [1, 1]} : vector<8x96xf32> to vector<8x32xf32>
    %246 = arith.mulf %235, %245 : vector<8x32xf32>
    %247 = arith.addf %244, %246 : vector<8x32xf32>
    %248 = math.tanh %247 : vector<8x32xf32>
    %cst_68 = arith.constant 1.000000e+00 : f32
    %249 = vector.broadcast %cst_68 : f32 to vector<8x32xf32>
    %250 = arith.subf %249, %243 : vector<8x32xf32>
    %251 = arith.mulf %250, %248 : vector<8x32xf32>
    %252 = arith.mulf %243, %224 : vector<8x32xf32>
    %253 = arith.addf %251, %252 : vector<8x32xf32>
    %254 = vector.extract_strided_slice %223 {offsets = [0, 96], sizes = [8, 96], strides = [1, 1]} : vector<8x192xf32> to vector<8x96xf32>
    %255 = vector.extract_strided_slice %217 {offsets = [0, 96], sizes = [8, 96], strides = [1, 1]} : vector<8x192xf32> to vector<8x96xf32>
    %256 = vector.extract_strided_slice %254 {offsets = [0, 0], sizes = [8, 32], strides = [1, 1]} : vector<8x96xf32> to vector<8x32xf32>
    %257 = vector.extract_strided_slice %255 {offsets = [0, 0], sizes = [8, 32], strides = [1, 1]} : vector<8x96xf32> to vector<8x32xf32>
    %258 = arith.addf %256, %257 : vector<8x32xf32>
    %259 = arith.negf %258 : vector<8x32xf32>
    %260 = math.exp %259 : vector<8x32xf32>
    %cst_69 = arith.constant 1.000000e+00 : f32
    %261 = vector.broadcast %cst_69 : f32 to vector<8x32xf32>
    %262 = arith.addf %261, %260 : vector<8x32xf32>
    %263 = arith.divf %261, %262 : vector<8x32xf32>
    %264 = vector.extract_strided_slice %254 {offsets = [0, 32], sizes = [8, 32], strides = [1, 1]} : vector<8x96xf32> to vector<8x32xf32>
    %265 = vector.extract_strided_slice %255 {offsets = [0, 32], sizes = [8, 32], strides = [1, 1]} : vector<8x96xf32> to vector<8x32xf32>
    %266 = arith.addf %264, %265 : vector<8x32xf32>
    %267 = arith.negf %266 : vector<8x32xf32>
    %268 = math.exp %267 : vector<8x32xf32>
    %cst_70 = arith.constant 1.000000e+00 : f32
    %269 = vector.broadcast %cst_70 : f32 to vector<8x32xf32>
    %270 = arith.addf %269, %268 : vector<8x32xf32>
    %271 = arith.divf %269, %270 : vector<8x32xf32>
    %272 = vector.extract_strided_slice %254 {offsets = [0, 64], sizes = [8, 32], strides = [1, 1]} : vector<8x96xf32> to vector<8x32xf32>
    %273 = vector.extract_strided_slice %255 {offsets = [0, 64], sizes = [8, 32], strides = [1, 1]} : vector<8x96xf32> to vector<8x32xf32>
    %274 = arith.mulf %263, %273 : vector<8x32xf32>
    %275 = arith.addf %272, %274 : vector<8x32xf32>
    %276 = math.tanh %275 : vector<8x32xf32>
    %cst_71 = arith.constant 1.000000e+00 : f32
    %277 = vector.broadcast %cst_71 : f32 to vector<8x32xf32>
    %278 = arith.subf %277, %271 : vector<8x32xf32>
    %279 = arith.mulf %278, %276 : vector<8x32xf32>
    %280 = arith.mulf %271, %225 : vector<8x32xf32>
    %281 = arith.addf %279, %280 : vector<8x32xf32>
    %282 = arith.index_cast %c2_i32 : i32 to index
    %c0_72 = arith.constant 0 : index
    %c0_73 = arith.constant 0 : index
    %283 = vector.load %arg2[%282, %c0_72, %c0_73] : memref<8x8x1xf32, #tpu.memory_space<vmem>>, vector<1x8x1xf32>
    %284 = vector.shape_cast %283 : vector<1x8x1xf32> to vector<8x1xf32>
    %285 = arith.index_cast %214 : i32 to index
    %c0_74 = arith.constant 0 : index
    %c0_75 = arith.constant 0 : index
    %286 = vector.load %arg2[%285, %c0_74, %c0_75] : memref<8x8x1xf32, #tpu.memory_space<vmem>>, vector<1x8x1xf32>
    %287 = vector.shape_cast %286 : vector<1x8x1xf32> to vector<8x1xf32>
    %288 = vector.broadcast %284 : vector<8x1xf32> to vector<8x32xf32>
    %289 = arith.mulf %288, %253 : vector<8x32xf32>
    %c0_76 = arith.constant 0 : index
    %290 = arith.index_cast %c2_i32 : i32 to index
    %c0_77 = arith.constant 0 : index
    %c0_78 = arith.constant 0 : index
    %291 = vector.load %arg9[%c0_76, %290, %c0_77, %c0_78] : memref<2x8x8x32xf32, #tpu.memory_space<vmem>>, vector<1x1x8x32xf32>
    %292 = vector.shape_cast %291 : vector<1x1x8x32xf32> to vector<8x32xf32>
    %293 = vector.shape_cast %289 : vector<8x32xf32> to vector<1x1x8x32xf32>
    tpu.vector_store %arg9[%c0_76, %290, %c0_77, %c0_78], %293 {strides = array<i32>} : memref<2x8x8x32xf32, #tpu.memory_space<vmem>>, vector<1x1x8x32xf32>,
    %294 = vector.broadcast %287 : vector<8x1xf32> to vector<8x32xf32>
    %295 = arith.mulf %294, %281 : vector<8x32xf32>
    %c1_79 = arith.constant 1 : index
    %296 = arith.index_cast %214 : i32 to index
    %c0_80 = arith.constant 0 : index
    %c0_81 = arith.constant 0 : index
    %297 = vector.load %arg9[%c1_79, %296, %c0_80, %c0_81] : memref<2x8x8x32xf32, #tpu.memory_space<vmem>>, vector<1x1x8x32xf32>
    %298 = vector.shape_cast %297 : vector<1x1x8x32xf32> to vector<8x32xf32>
    %299 = vector.shape_cast %295 : vector<8x32xf32> to vector<1x1x8x32xf32>
    tpu.vector_store %arg9[%c1_79, %296, %c0_80, %c0_81], %299 {strides = array<i32>} : memref<2x8x8x32xf32, #tpu.memory_space<vmem>>, vector<1x1x8x32xf32>,
    %300 = vector.broadcast %284 : vector<8x1xf32> to vector<8x32xf32>
    %301 = arith.mulf %300, %253 : vector<8x32xf32>
    %cst_82 = arith.constant 1.000000e+00 : f32
    %302 = vector.broadcast %cst_82 : f32 to vector<8x1xf32>
    %303 = arith.subf %302, %284 : vector<8x1xf32>
    %304 = vector.broadcast %303 : vector<8x1xf32> to vector<8x32xf32>
    %305 = arith.mulf %304, %224 : vector<8x32xf32>
    %306 = arith.addf %301, %305 : vector<8x32xf32>
    %307 = vector.broadcast %287 : vector<8x1xf32> to vector<8x32xf32>
    %308 = arith.mulf %307, %281 : vector<8x32xf32>
    %cst_83 = arith.constant 1.000000e+00 : f32
    %309 = vector.broadcast %cst_83 : f32 to vector<8x1xf32>
    %310 = arith.subf %309, %287 : vector<8x1xf32>
    %311 = vector.broadcast %310 : vector<8x1xf32> to vector<8x32xf32>
    %312 = arith.mulf %311, %225 : vector<8x32xf32>
    %313 = arith.addf %308, %312 : vector<8x32xf32>
    %314 = tpu.concatenate %306, %313 in 1 : vector<8x32xf32>, vector<8x32xf32> -> vector<8x64xf32>
    %c3_i32 = arith.constant 3 : i32
    %c7_i32_84 = arith.constant 7 : i32
    %315 = arith.subi %c7_i32_84, %c3_i32 : i32
    %cst_85 = arith.constant dense<0.000000e+00> : vector<8x192xf32>
    %316 = tpu.matmul %314, %9, %cst_85 {dimension_numbers = #tpu.dot_dimension_numbers<[1], [0], [0], [1], [0, 0, 1, 1], [], []>} : vector<8x64xf32>, vector<64x192xf32>, vector<8x192xf32> -> vector<8x192xf32>
    %317 = vector.broadcast %10 : vector<1x192xf32> to vector<8x192xf32>
    %318 = arith.addf %316, %317 : vector<8x192xf32>
    %319 = arith.index_cast %c3_i32 : i32 to index
    %c0_86 = arith.constant 0 : index
    %c0_87 = arith.constant 0 : index
    %320 = vector.load %arg11[%319, %c0_86, %c0_87] : memref<8x8x192xf32, #tpu.memory_space<vmem>>, vector<1x8x192xf32>
    %321 = vector.shape_cast %320 : vector<1x8x192xf32> to vector<8x192xf32>
    %322 = arith.index_cast %315 : i32 to index
    %c0_88 = arith.constant 0 : index
    %c0_89 = arith.constant 0 : index
    %323 = vector.load %arg11[%322, %c0_88, %c0_89] : memref<8x8x192xf32, #tpu.memory_space<vmem>>, vector<1x8x192xf32>
    %324 = vector.shape_cast %323 : vector<1x8x192xf32> to vector<8x192xf32>
    %325 = vector.extract_strided_slice %314 {offsets = [0, 0], sizes = [8, 32], strides = [1, 1]} : vector<8x64xf32> to vector<8x32xf32>
    %326 = vector.extract_strided_slice %314 {offsets = [0, 32], sizes = [8, 32], strides = [1, 1]} : vector<8x64xf32> to vector<8x32xf32>
    %327 = vector.extract_strided_slice %321 {offsets = [0, 0], sizes = [8, 96], strides = [1, 1]} : vector<8x192xf32> to vector<8x96xf32>
    %328 = vector.extract_strided_slice %318 {offsets = [0, 0], sizes = [8, 96], strides = [1, 1]} : vector<8x192xf32> to vector<8x96xf32>
    %329 = vector.extract_strided_slice %327 {offsets = [0, 0], sizes = [8, 32], strides = [1, 1]} : vector<8x96xf32> to vector<8x32xf32>
    %330 = vector.extract_strided_slice %328 {offsets = [0, 0], sizes = [8, 32], strides = [1, 1]} : vector<8x96xf32> to vector<8x32xf32>
    %331 = arith.addf %329, %330 : vector<8x32xf32>
    %332 = arith.negf %331 : vector<8x32xf32>
    %333 = math.exp %332 : vector<8x32xf32>
    %cst_90 = arith.constant 1.000000e+00 : f32
    %334 = vector.broadcast %cst_90 : f32 to vector<8x32xf32>
    %335 = arith.addf %334, %333 : vector<8x32xf32>
    %336 = arith.divf %334, %335 : vector<8x32xf32>
    %337 = vector.extract_strided_slice %327 {offsets = [0, 32], sizes = [8, 32], strides = [1, 1]} : vector<8x96xf32> to vector<8x32xf32>
    %338 = vector.extract_strided_slice %328 {offsets = [0, 32], sizes = [8, 32], strides = [1, 1]} : vector<8x96xf32> to vector<8x32xf32>
    %339 = arith.addf %337, %338 : vector<8x32xf32>
    %340 = arith.negf %339 : vector<8x32xf32>
    %341 = math.exp %340 : vector<8x32xf32>
    %cst_91 = arith.constant 1.000000e+00 : f32
    %342 = vector.broadcast %cst_91 : f32 to vector<8x32xf32>
    %343 = arith.addf %342, %341 : vector<8x32xf32>
    %344 = arith.divf %342, %343 : vector<8x32xf32>
    %345 = vector.extract_strided_slice %327 {offsets = [0, 64], sizes = [8, 32], strides = [1, 1]} : vector<8x96xf32> to vector<8x32xf32>
    %346 = vector.extract_strided_slice %328 {offsets = [0, 64], sizes = [8, 32], strides = [1, 1]} : vector<8x96xf32> to vector<8x32xf32>
    %347 = arith.mulf %336, %346 : vector<8x32xf32>
    %348 = arith.addf %345, %347 : vector<8x32xf32>
    %349 = math.tanh %348 : vector<8x32xf32>
    %cst_92 = arith.constant 1.000000e+00 : f32
    %350 = vector.broadcast %cst_92 : f32 to vector<8x32xf32>
    %351 = arith.subf %350, %344 : vector<8x32xf32>
    %352 = arith.mulf %351, %349 : vector<8x32xf32>
    %353 = arith.mulf %344, %325 : vector<8x32xf32>
    %354 = arith.addf %352, %353 : vector<8x32xf32>
    %355 = vector.extract_strided_slice %324 {offsets = [0, 96], sizes = [8, 96], strides = [1, 1]} : vector<8x192xf32> to vector<8x96xf32>
    %356 = vector.extract_strided_slice %318 {offsets = [0, 96], sizes = [8, 96], strides = [1, 1]} : vector<8x192xf32> to vector<8x96xf32>
    %357 = vector.extract_strided_slice %355 {offsets = [0, 0], sizes = [8, 32], strides = [1, 1]} : vector<8x96xf32> to vector<8x32xf32>
    %358 = vector.extract_strided_slice %356 {offsets = [0, 0], sizes = [8, 32], strides = [1, 1]} : vector<8x96xf32> to vector<8x32xf32>
    %359 = arith.addf %357, %358 : vector<8x32xf32>
    %360 = arith.negf %359 : vector<8x32xf32>
    %361 = math.exp %360 : vector<8x32xf32>
    %cst_93 = arith.constant 1.000000e+00 : f32
    %362 = vector.broadcast %cst_93 : f32 to vector<8x32xf32>
    %363 = arith.addf %362, %361 : vector<8x32xf32>
    %364 = arith.divf %362, %363 : vector<8x32xf32>
    %365 = vector.extract_strided_slice %355 {offsets = [0, 32], sizes = [8, 32], strides = [1, 1]} : vector<8x96xf32> to vector<8x32xf32>
    %366 = vector.extract_strided_slice %356 {offsets = [0, 32], sizes = [8, 32], strides = [1, 1]} : vector<8x96xf32> to vector<8x32xf32>
    %367 = arith.addf %365, %366 : vector<8x32xf32>
    %368 = arith.negf %367 : vector<8x32xf32>
    %369 = math.exp %368 : vector<8x32xf32>
    %cst_94 = arith.constant 1.000000e+00 : f32
    %370 = vector.broadcast %cst_94 : f32 to vector<8x32xf32>
    %371 = arith.addf %370, %369 : vector<8x32xf32>
    %372 = arith.divf %370, %371 : vector<8x32xf32>
    %373 = vector.extract_strided_slice %355 {offsets = [0, 64], sizes = [8, 32], strides = [1, 1]} : vector<8x96xf32> to vector<8x32xf32>
    %374 = vector.extract_strided_slice %356 {offsets = [0, 64], sizes = [8, 32], strides = [1, 1]} : vector<8x96xf32> to vector<8x32xf32>
    %375 = arith.mulf %364, %374 : vector<8x32xf32>
    %376 = arith.addf %373, %375 : vector<8x32xf32>
    %377 = math.tanh %376 : vector<8x32xf32>
    %cst_95 = arith.constant 1.000000e+00 : f32
    %378 = vector.broadcast %cst_95 : f32 to vector<8x32xf32>
    %379 = arith.subf %378, %372 : vector<8x32xf32>
    %380 = arith.mulf %379, %377 : vector<8x32xf32>
    %381 = arith.mulf %372, %326 : vector<8x32xf32>
    %382 = arith.addf %380, %381 : vector<8x32xf32>
    %383 = arith.index_cast %c3_i32 : i32 to index
    %c0_96 = arith.constant 0 : index
    %c0_97 = arith.constant 0 : index
    %384 = vector.load %arg2[%383, %c0_96, %c0_97] : memref<8x8x1xf32, #tpu.memory_space<vmem>>, vector<1x8x1xf32>
    %385 = vector.shape_cast %384 : vector<1x8x1xf32> to vector<8x1xf32>
    %386 = arith.index_cast %315 : i32 to index
    %c0_98 = arith.constant 0 : index
    %c0_99 = arith.constant 0 : index
    %387 = vector.load %arg2[%386, %c0_98, %c0_99] : memref<8x8x1xf32, #tpu.memory_space<vmem>>, vector<1x8x1xf32>
    %388 = vector.shape_cast %387 : vector<1x8x1xf32> to vector<8x1xf32>
    %389 = vector.broadcast %385 : vector<8x1xf32> to vector<8x32xf32>
    %390 = arith.mulf %389, %354 : vector<8x32xf32>
    %c0_100 = arith.constant 0 : index
    %391 = arith.index_cast %c3_i32 : i32 to index
    %c0_101 = arith.constant 0 : index
    %c0_102 = arith.constant 0 : index
    %392 = vector.load %arg9[%c0_100, %391, %c0_101, %c0_102] : memref<2x8x8x32xf32, #tpu.memory_space<vmem>>, vector<1x1x8x32xf32>
    %393 = vector.shape_cast %392 : vector<1x1x8x32xf32> to vector<8x32xf32>
    %394 = vector.shape_cast %390 : vector<8x32xf32> to vector<1x1x8x32xf32>
    tpu.vector_store %arg9[%c0_100, %391, %c0_101, %c0_102], %394 {strides = array<i32>} : memref<2x8x8x32xf32, #tpu.memory_space<vmem>>, vector<1x1x8x32xf32>,
    %395 = vector.broadcast %388 : vector<8x1xf32> to vector<8x32xf32>
    %396 = arith.mulf %395, %382 : vector<8x32xf32>
    %c1_103 = arith.constant 1 : index
    %397 = arith.index_cast %315 : i32 to index
    %c0_104 = arith.constant 0 : index
    %c0_105 = arith.constant 0 : index
    %398 = vector.load %arg9[%c1_103, %397, %c0_104, %c0_105] : memref<2x8x8x32xf32, #tpu.memory_space<vmem>>, vector<1x1x8x32xf32>
    %399 = vector.shape_cast %398 : vector<1x1x8x32xf32> to vector<8x32xf32>
    %400 = vector.shape_cast %396 : vector<8x32xf32> to vector<1x1x8x32xf32>
    tpu.vector_store %arg9[%c1_103, %397, %c0_104, %c0_105], %400 {strides = array<i32>} : memref<2x8x8x32xf32, #tpu.memory_space<vmem>>, vector<1x1x8x32xf32>,
    %401 = vector.broadcast %385 : vector<8x1xf32> to vector<8x32xf32>
    %402 = arith.mulf %401, %354 : vector<8x32xf32>
    %cst_106 = arith.constant 1.000000e+00 : f32
    %403 = vector.broadcast %cst_106 : f32 to vector<8x1xf32>
    %404 = arith.subf %403, %385 : vector<8x1xf32>
    %405 = vector.broadcast %404 : vector<8x1xf32> to vector<8x32xf32>
    %406 = arith.mulf %405, %325 : vector<8x32xf32>
    %407 = arith.addf %402, %406 : vector<8x32xf32>
    %408 = vector.broadcast %388 : vector<8x1xf32> to vector<8x32xf32>
    %409 = arith.mulf %408, %382 : vector<8x32xf32>
    %cst_107 = arith.constant 1.000000e+00 : f32
    %410 = vector.broadcast %cst_107 : f32 to vector<8x1xf32>
    %411 = arith.subf %410, %388 : vector<8x1xf32>
    %412 = vector.broadcast %411 : vector<8x1xf32> to vector<8x32xf32>
    %413 = arith.mulf %412, %326 : vector<8x32xf32>
    %414 = arith.addf %409, %413 : vector<8x32xf32>
    %415 = tpu.concatenate %407, %414 in 1 : vector<8x32xf32>, vector<8x32xf32> -> vector<8x64xf32>
    %c4_i32 = arith.constant 4 : i32
    %c7_i32_108 = arith.constant 7 : i32
    %416 = arith.subi %c7_i32_108, %c4_i32 : i32
    %cst_109 = arith.constant dense<0.000000e+00> : vector<8x192xf32>
    %417 = tpu.matmul %415, %9, %cst_109 {dimension_numbers = #tpu.dot_dimension_numbers<[1], [0], [0], [1], [0, 0, 1, 1], [], []>} : vector<8x64xf32>, vector<64x192xf32>, vector<8x192xf32> -> vector<8x192xf32>
    %418 = vector.broadcast %10 : vector<1x192xf32> to vector<8x192xf32>
    %419 = arith.addf %417, %418 : vector<8x192xf32>
    %420 = arith.index_cast %c4_i32 : i32 to index
    %c0_110 = arith.constant 0 : index
    %c0_111 = arith.constant 0 : index
    %421 = vector.load %arg11[%420, %c0_110, %c0_111] : memref<8x8x192xf32, #tpu.memory_space<vmem>>, vector<1x8x192xf32>
    %422 = vector.shape_cast %421 : vector<1x8x192xf32> to vector<8x192xf32>
    %423 = arith.index_cast %416 : i32 to index
    %c0_112 = arith.constant 0 : index
    %c0_113 = arith.constant 0 : index
    %424 = vector.load %arg11[%423, %c0_112, %c0_113] : memref<8x8x192xf32, #tpu.memory_space<vmem>>, vector<1x8x192xf32>
    %425 = vector.shape_cast %424 : vector<1x8x192xf32> to vector<8x192xf32>
    %426 = vector.extract_strided_slice %415 {offsets = [0, 0], sizes = [8, 32], strides = [1, 1]} : vector<8x64xf32> to vector<8x32xf32>
    %427 = vector.extract_strided_slice %415 {offsets = [0, 32], sizes = [8, 32], strides = [1, 1]} : vector<8x64xf32> to vector<8x32xf32>
    %428 = vector.extract_strided_slice %422 {offsets = [0, 0], sizes = [8, 96], strides = [1, 1]} : vector<8x192xf32> to vector<8x96xf32>
    %429 = vector.extract_strided_slice %419 {offsets = [0, 0], sizes = [8, 96], strides = [1, 1]} : vector<8x192xf32> to vector<8x96xf32>
    %430 = vector.extract_strided_slice %428 {offsets = [0, 0], sizes = [8, 32], strides = [1, 1]} : vector<8x96xf32> to vector<8x32xf32>
    %431 = vector.extract_strided_slice %429 {offsets = [0, 0], sizes = [8, 32], strides = [1, 1]} : vector<8x96xf32> to vector<8x32xf32>
    %432 = arith.addf %430, %431 : vector<8x32xf32>
    %433 = arith.negf %432 : vector<8x32xf32>
    %434 = math.exp %433 : vector<8x32xf32>
    %cst_114 = arith.constant 1.000000e+00 : f32
    %435 = vector.broadcast %cst_114 : f32 to vector<8x32xf32>
    %436 = arith.addf %435, %434 : vector<8x32xf32>
    %437 = arith.divf %435, %436 : vector<8x32xf32>
    %438 = vector.extract_strided_slice %428 {offsets = [0, 32], sizes = [8, 32], strides = [1, 1]} : vector<8x96xf32> to vector<8x32xf32>
    %439 = vector.extract_strided_slice %429 {offsets = [0, 32], sizes = [8, 32], strides = [1, 1]} : vector<8x96xf32> to vector<8x32xf32>
    %440 = arith.addf %438, %439 : vector<8x32xf32>
    %441 = arith.negf %440 : vector<8x32xf32>
    %442 = math.exp %441 : vector<8x32xf32>
    %cst_115 = arith.constant 1.000000e+00 : f32
    %443 = vector.broadcast %cst_115 : f32 to vector<8x32xf32>
    %444 = arith.addf %443, %442 : vector<8x32xf32>
    %445 = arith.divf %443, %444 : vector<8x32xf32>
    %446 = vector.extract_strided_slice %428 {offsets = [0, 64], sizes = [8, 32], strides = [1, 1]} : vector<8x96xf32> to vector<8x32xf32>
    %447 = vector.extract_strided_slice %429 {offsets = [0, 64], sizes = [8, 32], strides = [1, 1]} : vector<8x96xf32> to vector<8x32xf32>
    %448 = arith.mulf %437, %447 : vector<8x32xf32>
    %449 = arith.addf %446, %448 : vector<8x32xf32>
    %450 = math.tanh %449 : vector<8x32xf32>
    %cst_116 = arith.constant 1.000000e+00 : f32
    %451 = vector.broadcast %cst_116 : f32 to vector<8x32xf32>
    %452 = arith.subf %451, %445 : vector<8x32xf32>
    %453 = arith.mulf %452, %450 : vector<8x32xf32>
    %454 = arith.mulf %445, %426 : vector<8x32xf32>
    %455 = arith.addf %453, %454 : vector<8x32xf32>
    %456 = vector.extract_strided_slice %425 {offsets = [0, 96], sizes = [8, 96], strides = [1, 1]} : vector<8x192xf32> to vector<8x96xf32>
    %457 = vector.extract_strided_slice %419 {offsets = [0, 96], sizes = [8, 96], strides = [1, 1]} : vector<8x192xf32> to vector<8x96xf32>
    %458 = vector.extract_strided_slice %456 {offsets = [0, 0], sizes = [8, 32], strides = [1, 1]} : vector<8x96xf32> to vector<8x32xf32>
    %459 = vector.extract_strided_slice %457 {offsets = [0, 0], sizes = [8, 32], strides = [1, 1]} : vector<8x96xf32> to vector<8x32xf32>
    %460 = arith.addf %458, %459 : vector<8x32xf32>
    %461 = arith.negf %460 : vector<8x32xf32>
    %462 = math.exp %461 : vector<8x32xf32>
    %cst_117 = arith.constant 1.000000e+00 : f32
    %463 = vector.broadcast %cst_117 : f32 to vector<8x32xf32>
    %464 = arith.addf %463, %462 : vector<8x32xf32>
    %465 = arith.divf %463, %464 : vector<8x32xf32>
    %466 = vector.extract_strided_slice %456 {offsets = [0, 32], sizes = [8, 32], strides = [1, 1]} : vector<8x96xf32> to vector<8x32xf32>
    %467 = vector.extract_strided_slice %457 {offsets = [0, 32], sizes = [8, 32], strides = [1, 1]} : vector<8x96xf32> to vector<8x32xf32>
    %468 = arith.addf %466, %467 : vector<8x32xf32>
    %469 = arith.negf %468 : vector<8x32xf32>
    %470 = math.exp %469 : vector<8x32xf32>
    %cst_118 = arith.constant 1.000000e+00 : f32
    %471 = vector.broadcast %cst_118 : f32 to vector<8x32xf32>
    %472 = arith.addf %471, %470 : vector<8x32xf32>
    %473 = arith.divf %471, %472 : vector<8x32xf32>
    %474 = vector.extract_strided_slice %456 {offsets = [0, 64], sizes = [8, 32], strides = [1, 1]} : vector<8x96xf32> to vector<8x32xf32>
    %475 = vector.extract_strided_slice %457 {offsets = [0, 64], sizes = [8, 32], strides = [1, 1]} : vector<8x96xf32> to vector<8x32xf32>
    %476 = arith.mulf %465, %475 : vector<8x32xf32>
    %477 = arith.addf %474, %476 : vector<8x32xf32>
    %478 = math.tanh %477 : vector<8x32xf32>
    %cst_119 = arith.constant 1.000000e+00 : f32
    %479 = vector.broadcast %cst_119 : f32 to vector<8x32xf32>
    %480 = arith.subf %479, %473 : vector<8x32xf32>
    %481 = arith.mulf %480, %478 : vector<8x32xf32>
    %482 = arith.mulf %473, %427 : vector<8x32xf32>
    %483 = arith.addf %481, %482 : vector<8x32xf32>
    %484 = arith.index_cast %c4_i32 : i32 to index
    %c0_120 = arith.constant 0 : index
    %c0_121 = arith.constant 0 : index
    %485 = vector.load %arg2[%484, %c0_120, %c0_121] : memref<8x8x1xf32, #tpu.memory_space<vmem>>, vector<1x8x1xf32>
    %486 = vector.shape_cast %485 : vector<1x8x1xf32> to vector<8x1xf32>
    %487 = arith.index_cast %416 : i32 to index
    %c0_122 = arith.constant 0 : index
    %c0_123 = arith.constant 0 : index
    %488 = vector.load %arg2[%487, %c0_122, %c0_123] : memref<8x8x1xf32, #tpu.memory_space<vmem>>, vector<1x8x1xf32>
    %489 = vector.shape_cast %488 : vector<1x8x1xf32> to vector<8x1xf32>
    %490 = vector.broadcast %486 : vector<8x1xf32> to vector<8x32xf32>
    %491 = arith.mulf %490, %455 : vector<8x32xf32>
    %c0_124 = arith.constant 0 : index
    %492 = arith.index_cast %c4_i32 : i32 to index
    %c0_125 = arith.constant 0 : index
    %c0_126 = arith.constant 0 : index
    %493 = vector.load %arg9[%c0_124, %492, %c0_125, %c0_126] : memref<2x8x8x32xf32, #tpu.memory_space<vmem>>, vector<1x1x8x32xf32>
    %494 = vector.shape_cast %493 : vector<1x1x8x32xf32> to vector<8x32xf32>
    %495 = vector.shape_cast %491 : vector<8x32xf32> to vector<1x1x8x32xf32>
    tpu.vector_store %arg9[%c0_124, %492, %c0_125, %c0_126], %495 {strides = array<i32>} : memref<2x8x8x32xf32, #tpu.memory_space<vmem>>, vector<1x1x8x32xf32>,
    %496 = vector.broadcast %489 : vector<8x1xf32> to vector<8x32xf32>
    %497 = arith.mulf %496, %483 : vector<8x32xf32>
    %c1_127 = arith.constant 1 : index
    %498 = arith.index_cast %416 : i32 to index
    %c0_128 = arith.constant 0 : index
    %c0_129 = arith.constant 0 : index
    %499 = vector.load %arg9[%c1_127, %498, %c0_128, %c0_129] : memref<2x8x8x32xf32, #tpu.memory_space<vmem>>, vector<1x1x8x32xf32>
    %500 = vector.shape_cast %499 : vector<1x1x8x32xf32> to vector<8x32xf32>
    %501 = vector.shape_cast %497 : vector<8x32xf32> to vector<1x1x8x32xf32>
    tpu.vector_store %arg9[%c1_127, %498, %c0_128, %c0_129], %501 {strides = array<i32>} : memref<2x8x8x32xf32, #tpu.memory_space<vmem>>, vector<1x1x8x32xf32>,
    %502 = vector.broadcast %486 : vector<8x1xf32> to vector<8x32xf32>
    %503 = arith.mulf %502, %455 : vector<8x32xf32>
    %cst_130 = arith.constant 1.000000e+00 : f32
    %504 = vector.broadcast %cst_130 : f32 to vector<8x1xf32>
    %505 = arith.subf %504, %486 : vector<8x1xf32>
    %506 = vector.broadcast %505 : vector<8x1xf32> to vector<8x32xf32>
    %507 = arith.mulf %506, %426 : vector<8x32xf32>
    %508 = arith.addf %503, %507 : vector<8x32xf32>
    %509 = vector.broadcast %489 : vector<8x1xf32> to vector<8x32xf32>
    %510 = arith.mulf %509, %483 : vector<8x32xf32>
    %cst_131 = arith.constant 1.000000e+00 : f32
    %511 = vector.broadcast %cst_131 : f32 to vector<8x1xf32>
    %512 = arith.subf %511, %489 : vector<8x1xf32>
    %513 = vector.broadcast %512 : vector<8x1xf32> to vector<8x32xf32>
    %514 = arith.mulf %513, %427 : vector<8x32xf32>
    %515 = arith.addf %510, %514 : vector<8x32xf32>
    %516 = tpu.concatenate %508, %515 in 1 : vector<8x32xf32>, vector<8x32xf32> -> vector<8x64xf32>
    %c5_i32 = arith.constant 5 : i32
    %c7_i32_132 = arith.constant 7 : i32
    %517 = arith.subi %c7_i32_132, %c5_i32 : i32
    %cst_133 = arith.constant dense<0.000000e+00> : vector<8x192xf32>
    %518 = tpu.matmul %516, %9, %cst_133 {dimension_numbers = #tpu.dot_dimension_numbers<[1], [0], [0], [1], [0, 0, 1, 1], [], []>} : vector<8x64xf32>, vector<64x192xf32>, vector<8x192xf32> -> vector<8x192xf32>
    %519 = vector.broadcast %10 : vector<1x192xf32> to vector<8x192xf32>
    %520 = arith.addf %518, %519 : vector<8x192xf32>
    %521 = arith.index_cast %c5_i32 : i32 to index
    %c0_134 = arith.constant 0 : index
    %c0_135 = arith.constant 0 : index
    %522 = vector.load %arg11[%521, %c0_134, %c0_135] : memref<8x8x192xf32, #tpu.memory_space<vmem>>, vector<1x8x192xf32>
    %523 = vector.shape_cast %522 : vector<1x8x192xf32> to vector<8x192xf32>
    %524 = arith.index_cast %517 : i32 to index
    %c0_136 = arith.constant 0 : index
    %c0_137 = arith.constant 0 : index
    %525 = vector.load %arg11[%524, %c0_136, %c0_137] : memref<8x8x192xf32, #tpu.memory_space<vmem>>, vector<1x8x192xf32>
    %526 = vector.shape_cast %525 : vector<1x8x192xf32> to vector<8x192xf32>
    %527 = vector.extract_strided_slice %516 {offsets = [0, 0], sizes = [8, 32], strides = [1, 1]} : vector<8x64xf32> to vector<8x32xf32>
    %528 = vector.extract_strided_slice %516 {offsets = [0, 32], sizes = [8, 32], strides = [1, 1]} : vector<8x64xf32> to vector<8x32xf32>
    %529 = vector.extract_strided_slice %523 {offsets = [0, 0], sizes = [8, 96], strides = [1, 1]} : vector<8x192xf32> to vector<8x96xf32>
    %530 = vector.extract_strided_slice %520 {offsets = [0, 0], sizes = [8, 96], strides = [1, 1]} : vector<8x192xf32> to vector<8x96xf32>
    %531 = vector.extract_strided_slice %529 {offsets = [0, 0], sizes = [8, 32], strides = [1, 1]} : vector<8x96xf32> to vector<8x32xf32>
    %532 = vector.extract_strided_slice %530 {offsets = [0, 0], sizes = [8, 32], strides = [1, 1]} : vector<8x96xf32> to vector<8x32xf32>
    %533 = arith.addf %531, %532 : vector<8x32xf32>
    %534 = arith.negf %533 : vector<8x32xf32>
    %535 = math.exp %534 : vector<8x32xf32>
    %cst_138 = arith.constant 1.000000e+00 : f32
    %536 = vector.broadcast %cst_138 : f32 to vector<8x32xf32>
    %537 = arith.addf %536, %535 : vector<8x32xf32>
    %538 = arith.divf %536, %537 : vector<8x32xf32>
    %539 = vector.extract_strided_slice %529 {offsets = [0, 32], sizes = [8, 32], strides = [1, 1]} : vector<8x96xf32> to vector<8x32xf32>
    %540 = vector.extract_strided_slice %530 {offsets = [0, 32], sizes = [8, 32], strides = [1, 1]} : vector<8x96xf32> to vector<8x32xf32>
    %541 = arith.addf %539, %540 : vector<8x32xf32>
    %542 = arith.negf %541 : vector<8x32xf32>
    %543 = math.exp %542 : vector<8x32xf32>
    %cst_139 = arith.constant 1.000000e+00 : f32
    %544 = vector.broadcast %cst_139 : f32 to vector<8x32xf32>
    %545 = arith.addf %544, %543 : vector<8x32xf32>
    %546 = arith.divf %544, %545 : vector<8x32xf32>
    %547 = vector.extract_strided_slice %529 {offsets = [0, 64], sizes = [8, 32], strides = [1, 1]} : vector<8x96xf32> to vector<8x32xf32>
    %548 = vector.extract_strided_slice %530 {offsets = [0, 64], sizes = [8, 32], strides = [1, 1]} : vector<8x96xf32> to vector<8x32xf32>
    %549 = arith.mulf %538, %548 : vector<8x32xf32>
    %550 = arith.addf %547, %549 : vector<8x32xf32>
    %551 = math.tanh %550 : vector<8x32xf32>
    %cst_140 = arith.constant 1.000000e+00 : f32
    %552 = vector.broadcast %cst_140 : f32 to vector<8x32xf32>
    %553 = arith.subf %552, %546 : vector<8x32xf32>
    %554 = arith.mulf %553, %551 : vector<8x32xf32>
    %555 = arith.mulf %546, %527 : vector<8x32xf32>
    %556 = arith.addf %554, %555 : vector<8x32xf32>
    %557 = vector.extract_strided_slice %526 {offsets = [0, 96], sizes = [8, 96], strides = [1, 1]} : vector<8x192xf32> to vector<8x96xf32>
    %558 = vector.extract_strided_slice %520 {offsets = [0, 96], sizes = [8, 96], strides = [1, 1]} : vector<8x192xf32> to vector<8x96xf32>
    %559 = vector.extract_strided_slice %557 {offsets = [0, 0], sizes = [8, 32], strides = [1, 1]} : vector<8x96xf32> to vector<8x32xf32>
    %560 = vector.extract_strided_slice %558 {offsets = [0, 0], sizes = [8, 32], strides = [1, 1]} : vector<8x96xf32> to vector<8x32xf32>
    %561 = arith.addf %559, %560 : vector<8x32xf32>
    %562 = arith.negf %561 : vector<8x32xf32>
    %563 = math.exp %562 : vector<8x32xf32>
    %cst_141 = arith.constant 1.000000e+00 : f32
    %564 = vector.broadcast %cst_141 : f32 to vector<8x32xf32>
    %565 = arith.addf %564, %563 : vector<8x32xf32>
    %566 = arith.divf %564, %565 : vector<8x32xf32>
    %567 = vector.extract_strided_slice %557 {offsets = [0, 32], sizes = [8, 32], strides = [1, 1]} : vector<8x96xf32> to vector<8x32xf32>
    %568 = vector.extract_strided_slice %558 {offsets = [0, 32], sizes = [8, 32], strides = [1, 1]} : vector<8x96xf32> to vector<8x32xf32>
    %569 = arith.addf %567, %568 : vector<8x32xf32>
    %570 = arith.negf %569 : vector<8x32xf32>
    %571 = math.exp %570 : vector<8x32xf32>
    %cst_142 = arith.constant 1.000000e+00 : f32
    %572 = vector.broadcast %cst_142 : f32 to vector<8x32xf32>
    %573 = arith.addf %572, %571 : vector<8x32xf32>
    %574 = arith.divf %572, %573 : vector<8x32xf32>
    %575 = vector.extract_strided_slice %557 {offsets = [0, 64], sizes = [8, 32], strides = [1, 1]} : vector<8x96xf32> to vector<8x32xf32>
    %576 = vector.extract_strided_slice %558 {offsets = [0, 64], sizes = [8, 32], strides = [1, 1]} : vector<8x96xf32> to vector<8x32xf32>
    %577 = arith.mulf %566, %576 : vector<8x32xf32>
    %578 = arith.addf %575, %577 : vector<8x32xf32>
    %579 = math.tanh %578 : vector<8x32xf32>
    %cst_143 = arith.constant 1.000000e+00 : f32
    %580 = vector.broadcast %cst_143 : f32 to vector<8x32xf32>
    %581 = arith.subf %580, %574 : vector<8x32xf32>
    %582 = arith.mulf %581, %579 : vector<8x32xf32>
    %583 = arith.mulf %574, %528 : vector<8x32xf32>
    %584 = arith.addf %582, %583 : vector<8x32xf32>
    %585 = arith.index_cast %c5_i32 : i32 to index
    %c0_144 = arith.constant 0 : index
    %c0_145 = arith.constant 0 : index
    %586 = vector.load %arg2[%585, %c0_144, %c0_145] : memref<8x8x1xf32, #tpu.memory_space<vmem>>, vector<1x8x1xf32>
    %587 = vector.shape_cast %586 : vector<1x8x1xf32> to vector<8x1xf32>
    %588 = arith.index_cast %517 : i32 to index
    %c0_146 = arith.constant 0 : index
    %c0_147 = arith.constant 0 : index
    %589 = vector.load %arg2[%588, %c0_146, %c0_147] : memref<8x8x1xf32, #tpu.memory_space<vmem>>, vector<1x8x1xf32>
    %590 = vector.shape_cast %589 : vector<1x8x1xf32> to vector<8x1xf32>
    %591 = vector.broadcast %587 : vector<8x1xf32> to vector<8x32xf32>
    %592 = arith.mulf %591, %556 : vector<8x32xf32>
    %c0_148 = arith.constant 0 : index
    %593 = arith.index_cast %c5_i32 : i32 to index
    %c0_149 = arith.constant 0 : index
    %c0_150 = arith.constant 0 : index
    %594 = vector.load %arg9[%c0_148, %593, %c0_149, %c0_150] : memref<2x8x8x32xf32, #tpu.memory_space<vmem>>, vector<1x1x8x32xf32>
    %595 = vector.shape_cast %594 : vector<1x1x8x32xf32> to vector<8x32xf32>
    %596 = vector.shape_cast %592 : vector<8x32xf32> to vector<1x1x8x32xf32>
    tpu.vector_store %arg9[%c0_148, %593, %c0_149, %c0_150], %596 {strides = array<i32>} : memref<2x8x8x32xf32, #tpu.memory_space<vmem>>, vector<1x1x8x32xf32>,
    %597 = vector.broadcast %590 : vector<8x1xf32> to vector<8x32xf32>
    %598 = arith.mulf %597, %584 : vector<8x32xf32>
    %c1_151 = arith.constant 1 : index
    %599 = arith.index_cast %517 : i32 to index
    %c0_152 = arith.constant 0 : index
    %c0_153 = arith.constant 0 : index
    %600 = vector.load %arg9[%c1_151, %599, %c0_152, %c0_153] : memref<2x8x8x32xf32, #tpu.memory_space<vmem>>, vector<1x1x8x32xf32>
    %601 = vector.shape_cast %600 : vector<1x1x8x32xf32> to vector<8x32xf32>
    %602 = vector.shape_cast %598 : vector<8x32xf32> to vector<1x1x8x32xf32>
    tpu.vector_store %arg9[%c1_151, %599, %c0_152, %c0_153], %602 {strides = array<i32>} : memref<2x8x8x32xf32, #tpu.memory_space<vmem>>, vector<1x1x8x32xf32>,
    %603 = vector.broadcast %587 : vector<8x1xf32> to vector<8x32xf32>
    %604 = arith.mulf %603, %556 : vector<8x32xf32>
    %cst_154 = arith.constant 1.000000e+00 : f32
    %605 = vector.broadcast %cst_154 : f32 to vector<8x1xf32>
    %606 = arith.subf %605, %587 : vector<8x1xf32>
    %607 = vector.broadcast %606 : vector<8x1xf32> to vector<8x32xf32>
    %608 = arith.mulf %607, %527 : vector<8x32xf32>
    %609 = arith.addf %604, %608 : vector<8x32xf32>
    %610 = vector.broadcast %590 : vector<8x1xf32> to vector<8x32xf32>
    %611 = arith.mulf %610, %584 : vector<8x32xf32>
    %cst_155 = arith.constant 1.000000e+00 : f32
    %612 = vector.broadcast %cst_155 : f32 to vector<8x1xf32>
    %613 = arith.subf %612, %590 : vector<8x1xf32>
    %614 = vector.broadcast %613 : vector<8x1xf32> to vector<8x32xf32>
    %615 = arith.mulf %614, %528 : vector<8x32xf32>
    %616 = arith.addf %611, %615 : vector<8x32xf32>
    %617 = tpu.concatenate %609, %616 in 1 : vector<8x32xf32>, vector<8x32xf32> -> vector<8x64xf32>
    %c6_i32 = arith.constant 6 : i32
    %c7_i32_156 = arith.constant 7 : i32
    %618 = arith.subi %c7_i32_156, %c6_i32 : i32
    %cst_157 = arith.constant dense<0.000000e+00> : vector<8x192xf32>
    %619 = tpu.matmul %617, %9, %cst_157 {dimension_numbers = #tpu.dot_dimension_numbers<[1], [0], [0], [1], [0, 0, 1, 1], [], []>} : vector<8x64xf32>, vector<64x192xf32>, vector<8x192xf32> -> vector<8x192xf32>
    %620 = vector.broadcast %10 : vector<1x192xf32> to vector<8x192xf32>
    %621 = arith.addf %619, %620 : vector<8x192xf32>
    %622 = arith.index_cast %c6_i32 : i32 to index
    %c0_158 = arith.constant 0 : index
    %c0_159 = arith.constant 0 : index
    %623 = vector.load %arg11[%622, %c0_158, %c0_159] : memref<8x8x192xf32, #tpu.memory_space<vmem>>, vector<1x8x192xf32>
    %624 = vector.shape_cast %623 : vector<1x8x192xf32> to vector<8x192xf32>
    %625 = arith.index_cast %618 : i32 to index
    %c0_160 = arith.constant 0 : index
    %c0_161 = arith.constant 0 : index
    %626 = vector.load %arg11[%625, %c0_160, %c0_161] : memref<8x8x192xf32, #tpu.memory_space<vmem>>, vector<1x8x192xf32>
    %627 = vector.shape_cast %626 : vector<1x8x192xf32> to vector<8x192xf32>
    %628 = vector.extract_strided_slice %617 {offsets = [0, 0], sizes = [8, 32], strides = [1, 1]} : vector<8x64xf32> to vector<8x32xf32>
    %629 = vector.extract_strided_slice %617 {offsets = [0, 32], sizes = [8, 32], strides = [1, 1]} : vector<8x64xf32> to vector<8x32xf32>
    %630 = vector.extract_strided_slice %624 {offsets = [0, 0], sizes = [8, 96], strides = [1, 1]} : vector<8x192xf32> to vector<8x96xf32>
    %631 = vector.extract_strided_slice %621 {offsets = [0, 0], sizes = [8, 96], strides = [1, 1]} : vector<8x192xf32> to vector<8x96xf32>
    %632 = vector.extract_strided_slice %630 {offsets = [0, 0], sizes = [8, 32], strides = [1, 1]} : vector<8x96xf32> to vector<8x32xf32>
    %633 = vector.extract_strided_slice %631 {offsets = [0, 0], sizes = [8, 32], strides = [1, 1]} : vector<8x96xf32> to vector<8x32xf32>
    %634 = arith.addf %632, %633 : vector<8x32xf32>
    %635 = arith.negf %634 : vector<8x32xf32>
    %636 = math.exp %635 : vector<8x32xf32>
    %cst_162 = arith.constant 1.000000e+00 : f32
    %637 = vector.broadcast %cst_162 : f32 to vector<8x32xf32>
    %638 = arith.addf %637, %636 : vector<8x32xf32>
    %639 = arith.divf %637, %638 : vector<8x32xf32>
    %640 = vector.extract_strided_slice %630 {offsets = [0, 32], sizes = [8, 32], strides = [1, 1]} : vector<8x96xf32> to vector<8x32xf32>
    %641 = vector.extract_strided_slice %631 {offsets = [0, 32], sizes = [8, 32], strides = [1, 1]} : vector<8x96xf32> to vector<8x32xf32>
    %642 = arith.addf %640, %641 : vector<8x32xf32>
    %643 = arith.negf %642 : vector<8x32xf32>
    %644 = math.exp %643 : vector<8x32xf32>
    %cst_163 = arith.constant 1.000000e+00 : f32
    %645 = vector.broadcast %cst_163 : f32 to vector<8x32xf32>
    %646 = arith.addf %645, %644 : vector<8x32xf32>
    %647 = arith.divf %645, %646 : vector<8x32xf32>
    %648 = vector.extract_strided_slice %630 {offsets = [0, 64], sizes = [8, 32], strides = [1, 1]} : vector<8x96xf32> to vector<8x32xf32>
    %649 = vector.extract_strided_slice %631 {offsets = [0, 64], sizes = [8, 32], strides = [1, 1]} : vector<8x96xf32> to vector<8x32xf32>
    %650 = arith.mulf %639, %649 : vector<8x32xf32>
    %651 = arith.addf %648, %650 : vector<8x32xf32>
    %652 = math.tanh %651 : vector<8x32xf32>
    %cst_164 = arith.constant 1.000000e+00 : f32
    %653 = vector.broadcast %cst_164 : f32 to vector<8x32xf32>
    %654 = arith.subf %653, %647 : vector<8x32xf32>
    %655 = arith.mulf %654, %652 : vector<8x32xf32>
    %656 = arith.mulf %647, %628 : vector<8x32xf32>
    %657 = arith.addf %655, %656 : vector<8x32xf32>
    %658 = vector.extract_strided_slice %627 {offsets = [0, 96], sizes = [8, 96], strides = [1, 1]} : vector<8x192xf32> to vector<8x96xf32>
    %659 = vector.extract_strided_slice %621 {offsets = [0, 96], sizes = [8, 96], strides = [1, 1]} : vector<8x192xf32> to vector<8x96xf32>
    %660 = vector.extract_strided_slice %658 {offsets = [0, 0], sizes = [8, 32], strides = [1, 1]} : vector<8x96xf32> to vector<8x32xf32>
    %661 = vector.extract_strided_slice %659 {offsets = [0, 0], sizes = [8, 32], strides = [1, 1]} : vector<8x96xf32> to vector<8x32xf32>
    %662 = arith.addf %660, %661 : vector<8x32xf32>
    %663 = arith.negf %662 : vector<8x32xf32>
    %664 = math.exp %663 : vector<8x32xf32>
    %cst_165 = arith.constant 1.000000e+00 : f32
    %665 = vector.broadcast %cst_165 : f32 to vector<8x32xf32>
    %666 = arith.addf %665, %664 : vector<8x32xf32>
    %667 = arith.divf %665, %666 : vector<8x32xf32>
    %668 = vector.extract_strided_slice %658 {offsets = [0, 32], sizes = [8, 32], strides = [1, 1]} : vector<8x96xf32> to vector<8x32xf32>
    %669 = vector.extract_strided_slice %659 {offsets = [0, 32], sizes = [8, 32], strides = [1, 1]} : vector<8x96xf32> to vector<8x32xf32>
    %670 = arith.addf %668, %669 : vector<8x32xf32>
    %671 = arith.negf %670 : vector<8x32xf32>
    %672 = math.exp %671 : vector<8x32xf32>
    %cst_166 = arith.constant 1.000000e+00 : f32
    %673 = vector.broadcast %cst_166 : f32 to vector<8x32xf32>
    %674 = arith.addf %673, %672 : vector<8x32xf32>
    %675 = arith.divf %673, %674 : vector<8x32xf32>
    %676 = vector.extract_strided_slice %658 {offsets = [0, 64], sizes = [8, 32], strides = [1, 1]} : vector<8x96xf32> to vector<8x32xf32>
    %677 = vector.extract_strided_slice %659 {offsets = [0, 64], sizes = [8, 32], strides = [1, 1]} : vector<8x96xf32> to vector<8x32xf32>
    %678 = arith.mulf %667, %677 : vector<8x32xf32>
    %679 = arith.addf %676, %678 : vector<8x32xf32>
    %680 = math.tanh %679 : vector<8x32xf32>
    %cst_167 = arith.constant 1.000000e+00 : f32
    %681 = vector.broadcast %cst_167 : f32 to vector<8x32xf32>
    %682 = arith.subf %681, %675 : vector<8x32xf32>
    %683 = arith.mulf %682, %680 : vector<8x32xf32>
    %684 = arith.mulf %675, %629 : vector<8x32xf32>
    %685 = arith.addf %683, %684 : vector<8x32xf32>
    %686 = arith.index_cast %c6_i32 : i32 to index
    %c0_168 = arith.constant 0 : index
    %c0_169 = arith.constant 0 : index
    %687 = vector.load %arg2[%686, %c0_168, %c0_169] : memref<8x8x1xf32, #tpu.memory_space<vmem>>, vector<1x8x1xf32>
    %688 = vector.shape_cast %687 : vector<1x8x1xf32> to vector<8x1xf32>
    %689 = arith.index_cast %618 : i32 to index
    %c0_170 = arith.constant 0 : index
    %c0_171 = arith.constant 0 : index
    %690 = vector.load %arg2[%689, %c0_170, %c0_171] : memref<8x8x1xf32, #tpu.memory_space<vmem>>, vector<1x8x1xf32>
    %691 = vector.shape_cast %690 : vector<1x8x1xf32> to vector<8x1xf32>
    %692 = vector.broadcast %688 : vector<8x1xf32> to vector<8x32xf32>
    %693 = arith.mulf %692, %657 : vector<8x32xf32>
    %c0_172 = arith.constant 0 : index
    %694 = arith.index_cast %c6_i32 : i32 to index
    %c0_173 = arith.constant 0 : index
    %c0_174 = arith.constant 0 : index
    %695 = vector.load %arg9[%c0_172, %694, %c0_173, %c0_174] : memref<2x8x8x32xf32, #tpu.memory_space<vmem>>, vector<1x1x8x32xf32>
    %696 = vector.shape_cast %695 : vector<1x1x8x32xf32> to vector<8x32xf32>
    %697 = vector.shape_cast %693 : vector<8x32xf32> to vector<1x1x8x32xf32>
    tpu.vector_store %arg9[%c0_172, %694, %c0_173, %c0_174], %697 {strides = array<i32>} : memref<2x8x8x32xf32, #tpu.memory_space<vmem>>, vector<1x1x8x32xf32>,
    %698 = vector.broadcast %691 : vector<8x1xf32> to vector<8x32xf32>
    %699 = arith.mulf %698, %685 : vector<8x32xf32>
    %c1_175 = arith.constant 1 : index
    %700 = arith.index_cast %618 : i32 to index
    %c0_176 = arith.constant 0 : index
    %c0_177 = arith.constant 0 : index
    %701 = vector.load %arg9[%c1_175, %700, %c0_176, %c0_177] : memref<2x8x8x32xf32, #tpu.memory_space<vmem>>, vector<1x1x8x32xf32>
    %702 = vector.shape_cast %701 : vector<1x1x8x32xf32> to vector<8x32xf32>
    %703 = vector.shape_cast %699 : vector<8x32xf32> to vector<1x1x8x32xf32>
    tpu.vector_store %arg9[%c1_175, %700, %c0_176, %c0_177], %703 {strides = array<i32>} : memref<2x8x8x32xf32, #tpu.memory_space<vmem>>, vector<1x1x8x32xf32>,
    %704 = vector.broadcast %688 : vector<8x1xf32> to vector<8x32xf32>
    %705 = arith.mulf %704, %657 : vector<8x32xf32>
    %cst_178 = arith.constant 1.000000e+00 : f32
    %706 = vector.broadcast %cst_178 : f32 to vector<8x1xf32>
    %707 = arith.subf %706, %688 : vector<8x1xf32>
    %708 = vector.broadcast %707 : vector<8x1xf32> to vector<8x32xf32>
    %709 = arith.mulf %708, %628 : vector<8x32xf32>
    %710 = arith.addf %705, %709 : vector<8x32xf32>
    %711 = vector.broadcast %691 : vector<8x1xf32> to vector<8x32xf32>
    %712 = arith.mulf %711, %685 : vector<8x32xf32>
    %cst_179 = arith.constant 1.000000e+00 : f32
    %713 = vector.broadcast %cst_179 : f32 to vector<8x1xf32>
    %714 = arith.subf %713, %691 : vector<8x1xf32>
    %715 = vector.broadcast %714 : vector<8x1xf32> to vector<8x32xf32>
    %716 = arith.mulf %715, %629 : vector<8x32xf32>
    %717 = arith.addf %712, %716 : vector<8x32xf32>
    %718 = tpu.concatenate %710, %717 in 1 : vector<8x32xf32>, vector<8x32xf32> -> vector<8x64xf32>
    %c7_i32_180 = arith.constant 7 : i32
    %c7_i32_181 = arith.constant 7 : i32
    %719 = arith.subi %c7_i32_181, %c7_i32_180 : i32
    %cst_182 = arith.constant dense<0.000000e+00> : vector<8x192xf32>
    %720 = tpu.matmul %718, %9, %cst_182 {dimension_numbers = #tpu.dot_dimension_numbers<[1], [0], [0], [1], [0, 0, 1, 1], [], []>} : vector<8x64xf32>, vector<64x192xf32>, vector<8x192xf32> -> vector<8x192xf32>
    %721 = vector.broadcast %10 : vector<1x192xf32> to vector<8x192xf32>
    %722 = arith.addf %720, %721 : vector<8x192xf32>
    %723 = arith.index_cast %c7_i32_180 : i32 to index
    %c0_183 = arith.constant 0 : index
    %c0_184 = arith.constant 0 : index
    %724 = vector.load %arg11[%723, %c0_183, %c0_184] : memref<8x8x192xf32, #tpu.memory_space<vmem>>, vector<1x8x192xf32>
    %725 = vector.shape_cast %724 : vector<1x8x192xf32> to vector<8x192xf32>
    %726 = arith.index_cast %719 : i32 to index
    %c0_185 = arith.constant 0 : index
    %c0_186 = arith.constant 0 : index
    %727 = vector.load %arg11[%726, %c0_185, %c0_186] : memref<8x8x192xf32, #tpu.memory_space<vmem>>, vector<1x8x192xf32>
    %728 = vector.shape_cast %727 : vector<1x8x192xf32> to vector<8x192xf32>
    %729 = vector.extract_strided_slice %718 {offsets = [0, 0], sizes = [8, 32], strides = [1, 1]} : vector<8x64xf32> to vector<8x32xf32>
    %730 = vector.extract_strided_slice %718 {offsets = [0, 32], sizes = [8, 32], strides = [1, 1]} : vector<8x64xf32> to vector<8x32xf32>
    %731 = vector.extract_strided_slice %725 {offsets = [0, 0], sizes = [8, 96], strides = [1, 1]} : vector<8x192xf32> to vector<8x96xf32>
    %732 = vector.extract_strided_slice %722 {offsets = [0, 0], sizes = [8, 96], strides = [1, 1]} : vector<8x192xf32> to vector<8x96xf32>
    %733 = vector.extract_strided_slice %731 {offsets = [0, 0], sizes = [8, 32], strides = [1, 1]} : vector<8x96xf32> to vector<8x32xf32>
    %734 = vector.extract_strided_slice %732 {offsets = [0, 0], sizes = [8, 32], strides = [1, 1]} : vector<8x96xf32> to vector<8x32xf32>
    %735 = arith.addf %733, %734 : vector<8x32xf32>
    %736 = arith.negf %735 : vector<8x32xf32>
    %737 = math.exp %736 : vector<8x32xf32>
    %cst_187 = arith.constant 1.000000e+00 : f32
    %738 = vector.broadcast %cst_187 : f32 to vector<8x32xf32>
    %739 = arith.addf %738, %737 : vector<8x32xf32>
    %740 = arith.divf %738, %739 : vector<8x32xf32>
    %741 = vector.extract_strided_slice %731 {offsets = [0, 32], sizes = [8, 32], strides = [1, 1]} : vector<8x96xf32> to vector<8x32xf32>
    %742 = vector.extract_strided_slice %732 {offsets = [0, 32], sizes = [8, 32], strides = [1, 1]} : vector<8x96xf32> to vector<8x32xf32>
    %743 = arith.addf %741, %742 : vector<8x32xf32>
    %744 = arith.negf %743 : vector<8x32xf32>
    %745 = math.exp %744 : vector<8x32xf32>
    %cst_188 = arith.constant 1.000000e+00 : f32
    %746 = vector.broadcast %cst_188 : f32 to vector<8x32xf32>
    %747 = arith.addf %746, %745 : vector<8x32xf32>
    %748 = arith.divf %746, %747 : vector<8x32xf32>
    %749 = vector.extract_strided_slice %731 {offsets = [0, 64], sizes = [8, 32], strides = [1, 1]} : vector<8x96xf32> to vector<8x32xf32>
    %750 = vector.extract_strided_slice %732 {offsets = [0, 64], sizes = [8, 32], strides = [1, 1]} : vector<8x96xf32> to vector<8x32xf32>
    %751 = arith.mulf %740, %750 : vector<8x32xf32>
    %752 = arith.addf %749, %751 : vector<8x32xf32>
    %753 = math.tanh %752 : vector<8x32xf32>
    %cst_189 = arith.constant 1.000000e+00 : f32
    %754 = vector.broadcast %cst_189 : f32 to vector<8x32xf32>
    %755 = arith.subf %754, %748 : vector<8x32xf32>
    %756 = arith.mulf %755, %753 : vector<8x32xf32>
    %757 = arith.mulf %748, %729 : vector<8x32xf32>
    %758 = arith.addf %756, %757 : vector<8x32xf32>
    %759 = vector.extract_strided_slice %728 {offsets = [0, 96], sizes = [8, 96], strides = [1, 1]} : vector<8x192xf32> to vector<8x96xf32>
    %760 = vector.extract_strided_slice %722 {offsets = [0, 96], sizes = [8, 96], strides = [1, 1]} : vector<8x192xf32> to vector<8x96xf32>
    %761 = vector.extract_strided_slice %759 {offsets = [0, 0], sizes = [8, 32], strides = [1, 1]} : vector<8x96xf32> to vector<8x32xf32>
    %762 = vector.extract_strided_slice %760 {offsets = [0, 0], sizes = [8, 32], strides = [1, 1]} : vector<8x96xf32> to vector<8x32xf32>
    %763 = arith.addf %761, %762 : vector<8x32xf32>
    %764 = arith.negf %763 : vector<8x32xf32>
    %765 = math.exp %764 : vector<8x32xf32>
    %cst_190 = arith.constant 1.000000e+00 : f32
    %766 = vector.broadcast %cst_190 : f32 to vector<8x32xf32>
    %767 = arith.addf %766, %765 : vector<8x32xf32>
    %768 = arith.divf %766, %767 : vector<8x32xf32>
    %769 = vector.extract_strided_slice %759 {offsets = [0, 32], sizes = [8, 32], strides = [1, 1]} : vector<8x96xf32> to vector<8x32xf32>
    %770 = vector.extract_strided_slice %760 {offsets = [0, 32], sizes = [8, 32], strides = [1, 1]} : vector<8x96xf32> to vector<8x32xf32>
    %771 = arith.addf %769, %770 : vector<8x32xf32>
    %772 = arith.negf %771 : vector<8x32xf32>
    %773 = math.exp %772 : vector<8x32xf32>
    %cst_191 = arith.constant 1.000000e+00 : f32
    %774 = vector.broadcast %cst_191 : f32 to vector<8x32xf32>
    %775 = arith.addf %774, %773 : vector<8x32xf32>
    %776 = arith.divf %774, %775 : vector<8x32xf32>
    %777 = vector.extract_strided_slice %759 {offsets = [0, 64], sizes = [8, 32], strides = [1, 1]} : vector<8x96xf32> to vector<8x32xf32>
    %778 = vector.extract_strided_slice %760 {offsets = [0, 64], sizes = [8, 32], strides = [1, 1]} : vector<8x96xf32> to vector<8x32xf32>
    %779 = arith.mulf %768, %778 : vector<8x32xf32>
    %780 = arith.addf %777, %779 : vector<8x32xf32>
    %781 = math.tanh %780 : vector<8x32xf32>
    %cst_192 = arith.constant 1.000000e+00 : f32
    %782 = vector.broadcast %cst_192 : f32 to vector<8x32xf32>
    %783 = arith.subf %782, %776 : vector<8x32xf32>
    %784 = arith.mulf %783, %781 : vector<8x32xf32>
    %785 = arith.mulf %776, %730 : vector<8x32xf32>
    %786 = arith.addf %784, %785 : vector<8x32xf32>
    %787 = arith.index_cast %c7_i32_180 : i32 to index
    %c0_193 = arith.constant 0 : index
    %c0_194 = arith.constant 0 : index
    %788 = vector.load %arg2[%787, %c0_193, %c0_194] : memref<8x8x1xf32, #tpu.memory_space<vmem>>, vector<1x8x1xf32>
    %789 = vector.shape_cast %788 : vector<1x8x1xf32> to vector<8x1xf32>
    %790 = arith.index_cast %719 : i32 to index
    %c0_195 = arith.constant 0 : index
    %c0_196 = arith.constant 0 : index
    %791 = vector.load %arg2[%790, %c0_195, %c0_196] : memref<8x8x1xf32, #tpu.memory_space<vmem>>, vector<1x8x1xf32>
    %792 = vector.shape_cast %791 : vector<1x8x1xf32> to vector<8x1xf32>
    %793 = vector.broadcast %789 : vector<8x1xf32> to vector<8x32xf32>
    %794 = arith.mulf %793, %758 : vector<8x32xf32>
    %c0_197 = arith.constant 0 : index
    %795 = arith.index_cast %c7_i32_180 : i32 to index
    %c0_198 = arith.constant 0 : index
    %c0_199 = arith.constant 0 : index
    %796 = vector.load %arg9[%c0_197, %795, %c0_198, %c0_199] : memref<2x8x8x32xf32, #tpu.memory_space<vmem>>, vector<1x1x8x32xf32>
    %797 = vector.shape_cast %796 : vector<1x1x8x32xf32> to vector<8x32xf32>
    %798 = vector.shape_cast %794 : vector<8x32xf32> to vector<1x1x8x32xf32>
    tpu.vector_store %arg9[%c0_197, %795, %c0_198, %c0_199], %798 {strides = array<i32>} : memref<2x8x8x32xf32, #tpu.memory_space<vmem>>, vector<1x1x8x32xf32>,
    %799 = vector.broadcast %792 : vector<8x1xf32> to vector<8x32xf32>
    %800 = arith.mulf %799, %786 : vector<8x32xf32>
    %c1_200 = arith.constant 1 : index
    %801 = arith.index_cast %719 : i32 to index
    %c0_201 = arith.constant 0 : index
    %c0_202 = arith.constant 0 : index
    %802 = vector.load %arg9[%c1_200, %801, %c0_201, %c0_202] : memref<2x8x8x32xf32, #tpu.memory_space<vmem>>, vector<1x1x8x32xf32>
    %803 = vector.shape_cast %802 : vector<1x1x8x32xf32> to vector<8x32xf32>
    %804 = vector.shape_cast %800 : vector<8x32xf32> to vector<1x1x8x32xf32>
    tpu.vector_store %arg9[%c1_200, %801, %c0_201, %c0_202], %804 {strides = array<i32>} : memref<2x8x8x32xf32, #tpu.memory_space<vmem>>, vector<1x1x8x32xf32>,
    %805 = vector.broadcast %789 : vector<8x1xf32> to vector<8x32xf32>
    %806 = arith.mulf %805, %758 : vector<8x32xf32>
    %cst_203 = arith.constant 1.000000e+00 : f32
    %807 = vector.broadcast %cst_203 : f32 to vector<8x1xf32>
    %808 = arith.subf %807, %789 : vector<8x1xf32>
    %809 = vector.broadcast %808 : vector<8x1xf32> to vector<8x32xf32>
    %810 = arith.mulf %809, %729 : vector<8x32xf32>
    %811 = arith.addf %806, %810 : vector<8x32xf32>
    %812 = vector.broadcast %792 : vector<8x1xf32> to vector<8x32xf32>
    %813 = arith.mulf %812, %786 : vector<8x32xf32>
    %cst_204 = arith.constant 1.000000e+00 : f32
    %814 = vector.broadcast %cst_204 : f32 to vector<8x1xf32>
    %815 = arith.subf %814, %792 : vector<8x1xf32>
    %816 = vector.broadcast %815 : vector<8x1xf32> to vector<8x32xf32>
    %817 = arith.mulf %816, %730 : vector<8x32xf32>
    %818 = arith.addf %813, %817 : vector<8x32xf32>
    %819 = tpu.concatenate %811, %818 in 1 : vector<8x32xf32>, vector<8x32xf32> -> vector<8x64xf32>
    %c8_i32 = arith.constant 8 : i32
    %c0_205 = arith.constant 0 : index
    %c0_206 = arith.constant 0 : index
    %820 = vector.load %arg7[%c0_205, %c0_206] : memref<64x32xf32, #tpu.memory_space<vmem>>, vector<64x32xf32>
    %cst_207 = arith.constant dense<0.000000e+00> : vector<8x32xf32>
    %821 = tpu.matmul %819, %820, %cst_207 {dimension_numbers = #tpu.dot_dimension_numbers<[1], [0], [0], [1], [0, 0, 1, 1], [], []>} : vector<8x64xf32>, vector<64x32xf32>, vector<8x32xf32> -> vector<8x32xf32>
    %c0_208 = arith.constant 0 : index
    %c0_209 = arith.constant 0 : index
    %822 = vector.load %arg8[%c0_208, %c0_209] : memref<1x32xf32, #tpu.memory_space<vmem>>, vector<1x32xf32>
    %823 = vector.broadcast %822 : vector<1x32xf32> to vector<8x32xf32>
    %824 = arith.addf %821, %823 : vector<8x32xf32>
    %825 = math.tanh %824 : vector<8x32xf32>
    %c0_210 = arith.constant 0 : index
    %c0_211 = arith.constant 0 : index
    %826 = vector.load %arg10[%c0_210, %c0_211] : memref<8x32xf32, #tpu.memory_space<vmem>>, vector<8x32xf32>
    tpu.vector_store %arg10[%c0_210, %c0_211], %825 {strides = array<i32>} : memref<8x32xf32, #tpu.memory_space<vmem>>, vector<8x32xf32>,
    return
  }
  func.func @transform_0(%arg0: i32) -> (i32, i32, i32) {
    %c0_i32 = arith.constant 0 : i32
    %c0_i32_0 = arith.constant 0 : i32
    %c0_i32_1 = arith.constant 0 : i32
    return %c0_i32, %arg0, %c0_i32_0 : i32, i32, i32
  }
  func.func @transform_1(%arg0: i32) -> (i32, i32, i32) {
    %c0_i32 = arith.constant 0 : i32
    %c0_i32_0 = arith.constant 0 : i32
    %c0_i32_1 = arith.constant 0 : i32
    return %c0_i32, %arg0, %c0_i32_0 : i32, i32, i32
  }
  func.func @transform_2(%arg0: i32) -> (i32, i32) {
    %c0_i32 = arith.constant 0 : i32
    %c0_i32_0 = arith.constant 0 : i32
    %c0_i32_1 = arith.constant 0 : i32
    return %c0_i32, %c0_i32_0 : i32, i32
  }
  func.func @transform_3(%arg0: i32) -> (i32, i32) {
    %c0_i32 = arith.constant 0 : i32
    %c0_i32_0 = arith.constant 0 : i32
    %c0_i32_1 = arith.constant 0 : i32
    return %c0_i32, %c0_i32_0 : i32, i32
  }
  func.func @transform_4(%arg0: i32) -> (i32, i32) {
    %c0_i32 = arith.constant 0 : i32
    %c0_i32_0 = arith.constant 0 : i32
    %c0_i32_1 = arith.constant 0 : i32
    return %c0_i32, %c0_i32_0 : i32, i32
  }
  func.func @transform_5(%arg0: i32) -> (i32, i32) {
    %c0_i32 = arith.constant 0 : i32
    %c0_i32_0 = arith.constant 0 : i32
    %c0_i32_1 = arith.constant 0 : i32
    return %c0_i32, %c0_i32_0 : i32, i32
  }
  func.func @transform_6(%arg0: i32) -> (i32, i32) {
    %c0_i32 = arith.constant 0 : i32
    %c0_i32_0 = arith.constant 0 : i32
    %c0_i32_1 = arith.constant 0 : i32
    return %c0_i32, %c0_i32_0 : i32, i32
  }
  func.func @transform_7(%arg0: i32) -> (i32, i32) {
    %c0_i32 = arith.constant 0 : i32
    %c0_i32_0 = arith.constant 0 : i32
    %c0_i32_1 = arith.constant 0 : i32
    return %c0_i32, %c0_i32_0 : i32, i32
  }
  func.func @transform_8(%arg0: i32) -> (i32, i32, i32, i32) {
    %c0_i32 = arith.constant 0 : i32
    %c0_i32_0 = arith.constant 0 : i32
    %c0_i32_1 = arith.constant 0 : i32
    %c0_i32_2 = arith.constant 0 : i32
    return %c0_i32, %c0_i32_0, %arg0, %c0_i32_1 : i32, i32, i32, i32
  }
  func.func @transform_9(%arg0: i32) -> (i32, i32) {
    %c0_i32 = arith.constant 0 : i32
    %c0_i32_0 = arith.constant 0 : i32
    return %arg0, %c0_i32 : i32, i32
  }
}

</mosaic_0001>

<bundles_post_ra>
// kernel: tpu_custom_call.1
= control target key start
LH: loop header
LB: loop body
LE: loop exit
PB: predicated region body
PF: predicated region fallthrough
CT: control target
= control target key end

     0   :  { %15 = vsyncpa [#allocation4], 0  ;;  %s3098_s0 = inlined_call_operand.hbm [shape: f32[8,8,32], index: 0, kind: input, shape index: {}]   ;;  %s3099_s1 = inlined_call_operand.vmem [shape: f32[8,8,1], index: 1, kind: input, shape index: {}]   ;;  %s3100_s2 = inlined_call_operand.hbm [shape: f32[32,192], index: 2, kind: input, shape index: {}]   ;;  %s3101_s3 = inlined_call_operand.vmem [shape: f32[1,192], index: 3, kind: input, shape index: {}]   ;;  %s3102_s4 = inlined_call_operand.vmem [shape: f32[64,192], index: 4, kind: input, shape index: {}]   ;;  %s3103_s5 = inlined_call_operand.vmem [shape: f32[1,192], index: 5, kind: input, shape index: {}]   ;;  %s3104_s6 = inlined_call_operand.vmem [shape: f32[64,32], index: 6, kind: input, shape index: {}]   ;;  %s3105_s7 = inlined_call_operand.vmem [shape: f32[1,32], index: 7, kind: input, shape index: {}]   ;;  %s3106_s8 = inlined_call_operand.hbm [shape: f32[2,8,8,32], index: 8, kind: output, shape index: {0}]   ;;  %s3107_s9 = inlined_call_operand.hbm [shape: f32[8,32], index: 9, kind: output, shape index: {1}]  }
   0x1   :  { %16 = vsyncpa [#allocation7], 0 }
   0x2   :  { %17 = vsyncpa [#allocation5], 0 }
   0x3   :  { %18 = vsyncpa [#allocation10], 0  ;;  %s2302_s30 = smov [#allocation3]  }
   0x4   :  { %s24_s10 = sshll.u32 %s2302_s30, 4  ;;  %s25_s10 = int_to_ptr.vmem [resolvable:$true] %s24_s10 }
   0x5   :  { %s2222_s11 = scalar_lea.vmem %s25_s10, 1024  ;;  %p2227_p1 = scmp.lt.s32.totalorder %s25_s10, %s25_s10 }
   0x6   :  { %p2223_p0 = scmp.ne.s32.totalorder %s25_s10, %s2222_s11  ;;  %p2228_p2 = scmp.lt.s32.totalorder %s2222_s11, %s2222_s11 }
   0x8   :  { %p2229_p3 = por %p2228_p2, %p2227_p1 }
   0xa   :  { %p2230_p4 = pnand %p2229_p3, %p2223_p0 }
   0xc   :  { %2233 = shalt.err (!%p2230_p4)
}
   0xd   :  { %s2303_s12 = smov 128   ;;  %s2304_s13 = smov 8  }
   0xe   :  { %30 = dma.hbm_to_vmem [thread:$0]  %s3098_s0, 1024, %s25_s10, [#allocation4], %s2303_s12, %s2303_s12, %s2304_s13  }
   0xf   :  { %s2305_s16 = smov [#allocation6]  }
  0x10   :  { %s38_s17 = sshll.u32 %s2305_s16, 4  ;;  %s39_s17 = int_to_ptr.vmem [resolvable:$true] %s38_s17 }
  0x11   :  { %s2242_s18 = scalar_lea.vmem %s39_s17, 1024  ;;  %p2247_p6 = scmp.lt.s32.totalorder %s39_s17, %s39_s17 }
  0x12   :  { %p2243_p5 = scmp.ne.s32.totalorder %s39_s17, %s2242_s18  ;;  %p2248_p7 = scmp.lt.s32.totalorder %s2242_s18, %s2242_s18 }
  0x14   :  { %p2249_p8 = por %p2248_p7, %p2247_p6 }
  0x16   :  { %p2250_p9 = pnand %p2249_p8, %p2243_p5 }
  0x18   :  { %2253 = shalt.err (!%p2250_p9)
}
  0x19   :  { %s2306_s19 = smov 256   ;;  %s2307_s20 = smov 16  }
  0x1a   :  { %44 = dma.hbm_to_vmem [thread:$0]  %s3100_s2, 1024, %s39_s17, [#allocation7], %s2306_s19, %s2306_s19, %s2307_s20  }
  0x1b   :  { %2294 = dma.done.wait [#allocation4], 1024  }
  0x1c   :  { %2295 = vsyncadd [#allocation4], 4294966272 }
  0x1d   :  { %2296 = dma.done.wait [#allocation7], 1024  }
  0x1e   :  { %2297 = vsyncadd [#allocation7], 4294966272  ;;  %v2308_v0 = vmov 0.0   ;;  %v76_v1 = vld [vmem:[#allocation6 + $0x38] sm:$0xff]  ;;  %v75_v3 = vld [vmem:[#allocation6 + $0x30] sm:$0xff]  ;;  %vm89_vm0 = vcmask 261120   ;;  %v79_v33 = vlaneseq }
  0x1f   :  { %178 = vmatprep.mubr.f32.mxu0 %v2308_v0  ;;  %339 = vmatprep.mubr.f32.mxu1 %v2308_v0  ;;  %v2380_v2 = vld [vmem:[%s3102_s4 + $0x78] sm:$0xff]  ;;  %v2386_v4 = vld [vmem:[%s3102_s4 + $0x70] sm:$0xff]  ;;  %v74_v5 = vld [vmem:[#allocation6 + $0x28] sm:$0xff]  ;;  %vm228_vm1 = vcmask 523264   ;;  %v2309_v48 = vmov 0   ;;  %s2311_s20 = smov 96  }
  0x20   :  { %138 = vmatprep.subr.mxu0 %v76_v1  ;;  %291 = vmatprep.subr.mxu1 %v2380_v2  ;;  %v2391_v6 = vld [vmem:[%s3102_s4 + $0x68] sm:$0xff]  ;;  %v73_v7 = vld [vmem:[#allocation6 + $0x20] sm:$0xff]  ;;  %v72_v9 = vld [vmem:[#allocation6 + $0x18] sm:$0xff]  ;;  %v80_v34 = vshrl.u32 %v79_v33, 7  ;;  %s2312_s21 = smov 32   ;;  %vm2313_vm2 = vmmov 0  }
  0x21   :  { %139 = vmatpush1.msra.mxu0 %v75_v3  ;;  %292 = vmatpush1.msra.mxu1 %v2386_v4  ;;  %v2397_v8 = vld [vmem:[%s3102_s4 + $0x60] sm:$0xff]  ;;  %v2403_v10 = vld [vmem:[%s3102_s4 + $0x58] sm:$0xff]  ;;  %v71_v11 = vld [vmem:[#allocation6 + $0x10] sm:$0xff] }
  0x22   :  { %140 = vmatprep.subr.mxu0 %v74_v5  ;;  %293 = vmatprep.subr.mxu1 %v2391_v6  ;;  %v2408_v12 = vld [vmem:[%s3102_s4 + $0x50] sm:$0xff]  ;;  %v70_v13 = vld [vmem:[#allocation6 + $0x8] sm:$0xff]  ;;  %v69_v15 = vld [vmem:[#allocation6] sm:$0xff]  ;;  %v81_v35 = vsub.s32 0, %v80_v34  ;;  %v85_v38 = vsub.s32 1, %v80_v34 }
  0x23   :  { %141 = vmatpush1.msra.mxu0 %v73_v7  ;;  %294 = vmatpush1.msra.mxu1 %v2397_v8  ;;  %v2414_v14 = vld [vmem:[%s3102_s4 + $0x48] sm:$0xff]  ;;  %v2420_v16 = vld [vmem:[%s3102_s4 + $0x40] sm:$0xff]  ;;  %v2426_v18 = vld [vmem:[%s3102_s4 + $0x38] sm:$0xff] }
  0x24   :  { %142 = vmatprep.subr.mxu0 %v72_v9  ;;  %295 = vmatprep.subr.mxu1 %v2403_v10  ;;  %v61_v17 = vld [vmem:[#allocation3] sm:$0xff]  ;;  %v2432_v19 = vld [vmem:[%s3102_s4 + $0x30] sm:$0xff]  ;;  %v2438_v20 = vld [vmem:[%s3102_s4 + $0x28] sm:$0xff] }
  0x25   :  { %143 = vmatpush1.msra.mxu0 %v71_v11  ;;  %296 = vmatpush1.msra.mxu1 %v2408_v12  ;;  %v2445_v21 = vld [vmem:[%s3102_s4 + $0x20] sm:$0xff]  ;;  %v62_v22 = vld [vmem:[#allocation3 + $0x8] sm:$0xff]  ;;  %v2452_v23 = vld [vmem:[%s3102_s4 + $0x18] sm:$0xff] }
  0x26   :  { %144 = vmatprep.subr.mxu0 %v70_v13  ;;  %297 = vmatprep.subr.mxu1 %v2414_v14  ;;  %v2458_v24 = vld [vmem:[%s3102_s4 + $0x10] sm:$0xff]  ;;  %v2465_v25 = vld [vmem:[%s3102_s4 + $0x8] sm:$0xff]  ;;  %v2473_v26 = vld [vmem:[%s3102_s4] sm:$0xff] }
  0x27   :  { %145 = vmatpush1.msra.mxu0 %v69_v15  ;;  %298 = vmatpush1.msra.mxu1 %v2420_v16  ;;  %v63_v27 = vld [vmem:[#allocation3 + $0x10] sm:$0xff]  ;;  %v64_v28 = vld [vmem:[#allocation3 + $0x18] sm:$0xff]  ;;  %v65_v29 = vld [vmem:[#allocation3 + $0x20] sm:$0xff] }
  0x28   :  { %1969 = vmatmul.mubr.msk.f32.vlgmr.msra.gmra.mxu0 %vm89_vm0, %v61_v17  ;;  %299 = vmatprep.subr.mxu1 %v2426_v18  ;;  %v66_v30 = vld [vmem:[#allocation3 + $0x28] sm:$0xff]  ;;  %v67_v31 = vld [vmem:[#allocation3 + $0x30] sm:$0xff]  ;;  %v68_v32 = vld [vmem:[#allocation3 + $0x38] sm:$0xff] }
  0x29   :  { %300 = vmatpush1.msra.mxu1 %v2432_v19  ;;  %184 = vmatprep.mubr.f32.mxu0 %v2308_v0  ;;  %v77_v36 = vld [vmem:[%s3101_s3] sm:$0x3]  ;;  %s2310_s3 = smov 64   ;;  %v1980_v9 = vld [vmem:[%s3099_s1 + $0x38] sm:$0xff] }
  0x2a   :  { %301 = vmatprep.subr.mxu1 %v2438_v20  ;;  %676 = vmatprep.subr.mxu0 %v2380_v2  ;;  %v2528_v37 = vrot.slane %v77_v36, %v81_v35  ;;  %v86_v41 = vrot.slane %v77_v36, %v85_v38  ;;  %v260_v43 = vld [vmem:[%s3103_s5] sm:$0x3]  ;;  %v439_v13 = vsub.f32 1.0, %v1980_v9 }
  0x2b   :  { %302 = vmatpush1.msra.mxu1 %v2445_v21  ;;  %677 = vmatpush1.msra.mxu0 %v2386_v4  ;;  %v2541_v47 = vrot.slane %v260_v43, %v81_v35  ;;  %v2549_v55 = vrot.slane %v260_v43, %v85_v38  ;;  %v409_v3 = vld [vmem:[%s3099_s1] sm:$0xff] }
  0x2c   :  { %1970 = vmatmul.mubr.msk.f32.gmra.mxu0 %vm89_vm0, %v62_v22  ;;  %303 = vmatprep.subr.mxu1 %v2452_v23 }
  0x2d   :  { %304 = vmatpush1.msra.mxu1 %v2458_v24  ;;  %190 = vmatprep.mubr.f32.mxu0 %v2308_v0 }
  0x2e   :  { %305 = vmatprep.subr.mxu1 %v2465_v25  ;;  %678 = vmatprep.subr.mxu0 %v2391_v6 }
  0x2f   :  { %306 = vmatpush1.msra.mxu1 %v2473_v26  ;;  %679 = vmatpush1.msra.mxu0 %v2397_v8 }
  0x30   :  { %1971 = vmatmul.mubr.msk.f32.gmra.mxu0 %vm89_vm0, %v63_v27  ;;  %340 = vmatmul.mubr.f32.vlgmr.msra.gmra.mxu1 %v2308_v0 }
  0x31   :  { %196 = vmatprep.mubr.f32.mxu0 %v2308_v0  ;;  %475 = vmatprep.subr.mxu1 %v2380_v2 }
  0x32   :  { %476 = vmatpush1.msra.mxu1 %v2386_v4  ;;  %523 = vmatprep.mubr.f32.mxu1 %v2308_v0 }
  0x33   :  { %477 = vmatprep.subr.mxu1 %v2391_v6  ;;  %680 = vmatprep.subr.mxu0 %v2403_v10 }
  0x34   :  { %1972 = vmatmul.mubr.msk.f32.gmra.mxu0 %vm89_vm0, %v64_v28  ;;  %478 = vmatpush1.msra.mxu1 %v2397_v8 }
  0x35   :  { %202 = vmatprep.mubr.f32.mxu0 %v2308_v0  ;;  %479 = vmatprep.subr.mxu1 %v2403_v10 }
  0x36   :  { %480 = vmatpush1.msra.mxu1 %v2408_v12  ;;  %681 = vmatpush1.msra.mxu0 %v2408_v12 }
  0x37   :  { %481 = vmatprep.subr.mxu1 %v2414_v14  ;;  %682 = vmatprep.subr.mxu0 %v2414_v14 }
  0x38   :  { %1973 = vmatmul.mubr.msk.f32.gmra.mxu0 %vm89_vm0, %v65_v29  ;;  %482 = vmatpush1.msra.mxu1 %v2420_v16 }
  0x39   :  { %208 = vmatprep.mubr.f32.mxu0 %v2308_v0  ;;  %483 = vmatprep.subr.mxu1 %v2426_v18 }
  0x3a   :  { %484 = vmatpush1.msra.mxu1 %v2432_v19  ;;  %683 = vmatpush1.msra.mxu0 %v2420_v16 }
  0x3b   :  { %485 = vmatprep.subr.mxu1 %v2438_v20  ;;  %684 = vmatprep.subr.mxu0 %v2426_v18 }
  0x3c   :  { %1974 = vmatmul.mubr.msk.f32.gmra.mxu0 %vm89_vm0, %v66_v30  ;;  %486 = vmatpush1.msra.mxu1 %v2445_v21 }
  0x3d   :  { %214 = vmatprep.mubr.f32.mxu0 %v2308_v0  ;;  %487 = vmatprep.subr.mxu1 %v2452_v23 }
  0x3e   :  { %488 = vmatpush1.msra.mxu1 %v2458_v24  ;;  %685 = vmatpush1.msra.mxu0 %v2432_v19 }
  0x3f   :  { %489 = vmatprep.subr.mxu1 %v2465_v25  ;;  %686 = vmatprep.subr.mxu0 %v2438_v20 }
  0x40   :  { %1975 = vmatmul.mubr.msk.f32.gmra.mxu0 %vm89_vm0, %v67_v31  ;;  %490 = vmatpush1.msra.mxu1 %v2473_v26 }
  0x41   :  { %220 = vmatprep.mubr.f32.mxu0 %v2308_v0  ;;  %687 = vmatpush1.msra.mxu0 %v2445_v21 }
  0x42   :  { %688 = vmatprep.subr.mxu0 %v2452_v23  ;;  %877 = vmatprep.subr.mxu1 %v2380_v2 }
  0x43   :  { %689 = vmatpush1.msra.mxu0 %v2458_v24  ;;  %2067 = vset.pattern.permute.xlu1 %v2309_v48 }
  0x44   :  { %1976 = vmatmul.mubr.msk.f32.gmra.mxu0 %vm89_vm0, %v68_v32  ;;  %690 = vmatprep.subr.mxu0 %v2465_v25 }
  0x45   :  { %691 = vmatpush1.msra.mxu0 %v2473_v26  ;;  %724 = vmatprep.mubr.f32.mxu0 %v2308_v0 }
  0x46   :  { %1078 = vmatprep.subr.mxu0 %v2380_v2  ;;  %2066 = vset.pattern.permute.xlu0 %v2309_v48 }
  0xe8   :  { %v180_v39 = vpop.f32.mrf.mxu0 }
  0xe9   :  { %v2531_v40 = vadd.f32 %v180_v39, %v2528_v37 }
  0xea   :  { %v182_v42 = vpop.f32.mrf.mxu0 }
  0xeb   :  { %227 = vst [vmem:[#allocation2] sm:$0xff] %v2531_v40  ;;  %v183_v44 = vadd.f32 %v182_v42, %v86_v41 }
  0xec   :  { %v186_v45 = vpop.f32.mrf.mxu0 }
  0xed   :  { %229 = vst.msk [vmem:[#allocation2 + $0x8] sm:$0xff] %vm228_vm1, %v183_v44  ;;  %v2539_v46 = vadd.f32 %v186_v45, %v2528_v37 }
  0xee   :  { %v188_v49 = vpop.f32.mrf.mxu0 }
  0xef   :  { %230 = vst [vmem:[#allocation2 + $0x10] sm:$0xff] %v2539_v46  ;;  %v189_v50 = vadd.f32 %v188_v49, %v86_v41 }
  0xf0   :  { %v192_v51 = vpop.f32.mrf.mxu0  ;;  %v341_v52 = vpop.f32.mrf.mxu1 }
  0xf1   :  { %231 = vst.msk [vmem:[#allocation2 + $0x18] sm:$0xff] %vm228_vm1, %v189_v50  ;;  %v2546_v53 = vadd.f32 %v192_v51, %v2528_v37  ;;  %v342_v54 = vadd.f32 %v341_v52, %v2541_v47 }
  0xf2   :  { %v194_v56 = vpop.f32.mrf.mxu0  ;;  %v343_v57 = vpop.f32.mrf.mxu1 }
  0xf3   :  { %232 = vst [vmem:[#allocation2 + $0x20] sm:$0xff] %v2546_v53  ;;  %v195_v58 = vadd.f32 %v194_v56, %v86_v41  ;;  %358 = vrot.lane.b32.xlu0 %v342_v54, %s2310_s3  ;;  %v2555_v60 = vadd.f32 %v343_v57, %v2549_v55  ;;  %v350_v38 = vadd.f32 %v342_v54, %v2531_v40 }
  0xf4   :  { %v198_v59 = vpop.f32.mrf.mxu0 }
  0xf5   :  { %233 = vst.msk [vmem:[#allocation2 + $0x28] sm:$0xff] %vm228_vm1, %v195_v58  ;;  %v2558_v61 = vadd.f32 %v198_v59, %v2528_v37  ;;  %v1977_v39 = vmul.f32 -1.442695, %v350_v38 }
  0xf6   :  { %v200_v62 = vpop.f32.mrf.mxu0 }
  0xf7   :  { %v201_v63 = vadd.f32 %v200_v62, %v86_v41  ;;  %391 = vrot.lane.b32.xlu0 %v2555_v60, %s2310_s3  ;;  %2068 = vpow2.f32 %v1977_v39 }
  0xf8   :  { %v204_v1 = vpop.f32.mrf.mxu0 }
  0xf9   :  { %235 = vst.msk [vmem:[#allocation2 + $0x38] sm:$0xff] %vm228_vm1, %v201_v63  ;;  %v2567_v5 = vadd.f32 %v204_v1, %v2528_v37 }
  0xfa   :  { %v206_v7 = vpop.f32.mrf.mxu0 }
  0xfb   :  { %v207_v11 = vadd.f32 %v206_v7, %v86_v41  ;;  %414 = vperm.xlu0 %2066, %v409_v3  }
  0xfc   :  { %v210_v15 = vpop.f32.mrf.mxu0 }
  0xfd   :  { %237 = vst.msk [vmem:[#allocation2 + $0x48] sm:$0xff] %vm228_vm1, %v207_v11  ;;  %v2574_v17 = vadd.f32 %v210_v15, %v2528_v37 }
  0xfe   :  { %v212_v22 = vpop.f32.mrf.mxu0 }
  0xff   :  { %238 = vst [vmem:[#allocation2 + $0x50] sm:$0xff] %v2574_v17  ;;  %v213_v27 = vadd.f32 %v212_v22, %v86_v41  ;;  %442 = vperm.xlu0 %2066, %v439_v13  }
 0x100   :  { %v216_v28 = vpop.f32.mrf.mxu0 }
 0x101   :  { %239 = vst.msk [vmem:[#allocation2 + $0x58] sm:$0xff] %vm228_vm1, %v213_v27  ;;  %v2579_v29 = vadd.f32 %v216_v28, %v2528_v37 }
 0x102   :  { %v218_v30 = vpop.f32.mrf.mxu0 }
 0x103   :  { %240 = vst [vmem:[#allocation2 + $0x60] sm:$0xff] %v2579_v29  ;;  %v219_v31 = vadd.f32 %v218_v30, %v86_v41 }
 0x104   :  { %v222_v32 = vpop.f32.mrf.mxu0  ;;  %v2069_v43 = vpop.eup %2068 }
 0x105   :  { %241 = vst.msk [vmem:[#allocation2 + $0x68] sm:$0xff] %vm228_vm1, %v219_v31  ;;  %v223_v33 = vadd.f32 %v222_v32, %v2528_v37  ;;  %v354_v44 = vadd.f32 1.0, %v2069_v43 }
 0x106   :  { %v224_v34 = vpop.f32.mrf.mxu0 }
 0x107   :  { %242 = vst [vmem:[#allocation2 + $0x70] sm:$0xff] %v223_v33  ;;  %v225_v35 = vadd.f32 %v224_v34, %v86_v41  ;;  %v376_v36 = vadd.f32 %v342_v54, %v223_v33  ;;  %v431_v54 = vsub.f32 1.0, %v409_v3 }
 0x109   :  { %243 = vst.msk [vmem:[#allocation2 + $0x78] sm:$0xff] %vm228_vm1, %v225_v35  ;;  %v1978_v42 = vmul.f32 -1.442695, %v376_v36 }
 0x10b   :  { %2070 = vpow2.f32 %v1978_v42 }
 0x10c   :  { %2072 = vrcp.f32 %v354_v44 }
 0x110   :  { %v349_v58 = vld [vmem:[#allocation2 + $0x78] sm:$0xff] }
 0x111   :  { %v383_v7 = vadd.f32 %v349_v58, %v2555_v60 }
 0x113   :  { %v1979_v3 = vmul.f32 -1.442695, %v383_v7 }
 0x118   :  { %v2071_v45 = vpop.eup %2070 }
 0x119   :  { %v380_v48 = vadd.f32 1.0, %v2071_v45  ;;  %v2073_v49 = vpop.eup %2072 }
 0x11a   :  { %v368_v22 = vsub.f32 1.0, %v2073_v49  ;;  %v374_v31 = vmul.f32 0.0, %v2073_v49 }
 0x11b   :  { %2074 = vrcp.f32 %v380_v48 }
 0x128   :  { %v2075_v41 = vpop.eup %2074 }
 0x165   :  { %v359_v37 = vpop.permute.xlu0 %358 }
 0x166   :  { %v361_v50 = vmul.f32 %v2073_v49, %v359_v37 }
 0x168   :  { %363 = vrot.lane.b32.xlu1 %v361_v50, %s2310_s3 }
 0x169   :  { %v392_v51 = vpop.permute.xlu0 %391 }
 0x16a   :  { %v394_v52 = vmul.f32 %v2075_v41, %v392_v51 }
 0x16c   :  { %396 = vrot.lane.b32.xlu1 %v394_v52, %s2310_s3 }
 0x170   :  { %425 = vperm.xlu1 %2067, %v1980_v9  }
 0x174   :  { %434 = vperm.xlu1 %2067, %v431_v54  }
 0x176   :  { %v415_v13 = vpop.permute.xlu0 %414 }
 0x17a   :  { %v443_v28 = vpop.permute.xlu0 %442 }
 0x17b   :  { %v445_v44 = vmul.f32 0.0, %v443_v28 }
 0x1da   :  { %v364_v56 = vpop.permute.xlu1 %363 }
 0x1db   :  { %v366_v57 = vadd.f32 %v364_v56, %v2531_v40 }
 0x1dd   :  { %2076 = vtanh.f32 %v366_v57 }
 0x1de   :  { %v397_v59 = vpop.permute.xlu1 %396 }
 0x1df   :  { %v399_v62 = vadd.f32 %v397_v59, %v349_v58 }
 0x1e1   :  { %2078 = vtanh.f32 %v399_v62 }
 0x1e2   :  { %2080 = vpow2.f32 %v1979_v3 }
 0x1ea   :  { %v2077_v63 = vpop.eup %2076 }
 0x1eb   :  { %370 = vrot.lane.b32.xlu1 %v2077_v63, %s2311_s20  ;;  %v426_v40 = vpop.permute.xlu1 %425 }
 0x1ee   :  { %v2079_v1 = vpop.eup %2078 }
 0x1ef   :  { %403 = vrot.lane.b32.xlu0 %v2079_v1, %s2311_s20  ;;  %v2081_v9 = vpop.eup %2080  ;;  %v435_v15 = vpop.permute.xlu1 %434 }
 0x1f0   :  { %v387_v11 = vadd.f32 1.0, %v2081_v9  ;;  %v437_v36 = vmul.f32 0.0, %v435_v15  ;;  %v2634_v15 = vld [vmem:[%s3099_s1 + $0x30] sm:$0xff] }
 0x1f1   :  { %v636_v28 = vsub.f32 1.0, %v2634_v15 }
 0x1f2   :  { %2082 = vrcp.f32 %v387_v11  ;;  %v2629_v11 = vld [vmem:[%s3099_s1 + $0x8] sm:$0xff] }
 0x1ff   :  { %v2083_v27 = vpop.eup %2082 }
 0x200   :  { %v401_v34 = vsub.f32 1.0, %v2083_v27  ;;  %v407_v60 = vmul.f32 0.0, %v2083_v27  ;;  %v624_v27 = vsub.f32 1.0, %v2629_v11 }
 0x25d   :  { %v371_v30 = vpop.permute.xlu1 %370 }
 0x25e   :  { %v373_v32 = vmul.f32 %v371_v30, %v368_v22 }
 0x260   :  { %v375_v33 = vadd.f32 %v374_v31, %v373_v32  ;;  %v534_v32 = vld [vmem:[#allocation2 + $0x68] sm:$0xff] }
 0x261   :  { %v404_v35 = vpop.permute.xlu0 %403 }
 0x262   :  { %v2592_v38 = vmul.f32 %v415_v13, %v375_v33  ;;  %v406_v39 = vmul.f32 %v404_v35, %v401_v34 }
 0x264   :  { %v408_v42 = vadd.f32 %v407_v60, %v406_v39  ;;  %v438_v43 = vadd.f32 %v437_v36, %v2592_v38 }
 0x266   :  { %v428_v45 = vmul.f32 %v426_v40, %v408_v42  ;;  %448 = vrot.lane.b32.xlu1 %v438_v43, %s2311_s20 }
 0x268   :  { %430 = vst.msk [vmem:[#allocation8 + $0x78] sm:$0xff] %vm89_vm0, %v428_v45  ;;  %v446_v48 = vadd.f32 %v445_v44, %v428_v45 }
 0x26a   :  { %452 = vrot.lane.b32.xlu0 %v446_v48, %s2312_s21 }
 0x2d8   :  { %v449_v49 = vpop.permute.xlu1 %448 }
 0x2dc   :  { %v453_v37 = vpop.permute.xlu0 %452 }
 0x2dd   :  { %v2599_v50 = vsel %vm89_vm0, %v449_v49, %v453_v37 }
 0x2de   :  { %1981 = vmatmul.mubr.msk.f32.vlgmr.msra.gmra.mxu1 %vm228_vm1, %v2599_v50 }
 0x2df   :  { %878 = vmatpush1.msra.mxu1 %v2386_v4  ;;  %925 = vmatprep.mubr.f32.mxu1 %v2308_v0 }
 0x2e0   :  { %879 = vmatprep.subr.mxu1 %v2391_v6 }
 0x2e1   :  { %880 = vmatpush1.msra.mxu1 %v2397_v8 }
 0x2e2   :  { %881 = vmatprep.subr.mxu1 %v2403_v10 }
 0x2e3   :  { %882 = vmatpush1.msra.mxu1 %v2408_v12 }
 0x2e4   :  { %883 = vmatprep.subr.mxu1 %v2414_v14 }
 0x2e5   :  { %884 = vmatpush1.msra.mxu1 %v2420_v16 }
 0x2e6   :  { %885 = vmatprep.subr.mxu1 %v2426_v18 }
 0x2e7   :  { %886 = vmatpush1.msra.mxu1 %v2432_v19 }
 0x2e8   :  { %887 = vmatprep.subr.mxu1 %v2438_v20 }
 0x2e9   :  { %888 = vmatpush1.msra.mxu1 %v2445_v21 }
 0x2ea   :  { %889 = vmatprep.subr.mxu1 %v2452_v23 }
 0x2eb   :  { %890 = vmatpush1.msra.mxu1 %v2458_v24 }
 0x2ec   :  { %891 = vmatprep.subr.mxu1 %v2465_v25 }
 0x2ed   :  { %892 = vmatpush1.msra.mxu1 %v2473_v26 }
 0x2ee   :  { %1275 = vmatprep.subr.mxu1 %v2380_v2 }
 0x39e   :  { %v525_v41 = vpop.f32.mrf.mxu1 }
 0x39f   :  { %v526_v51 = vadd.f32 %v525_v41, %v2541_v47 }
 0x3a0   :  { %v527_v52 = vpop.f32.mrf.mxu1 }
 0x3a1   :  { %v528_v54 = vadd.f32 %v527_v52, %v2549_v55  ;;  %543 = vrot.lane.b32.xlu1 %v526_v51, %s2310_s3  ;;  %v535_v56 = vadd.f32 %v526_v51, %v2539_v46  ;;  %v564_v57 = vadd.f32 %v526_v51, %v2579_v29 }
 0x3a3   :  { %579 = vrot.lane.b32.xlu0 %v528_v54, %s2310_s3  ;;  %v1982_v58 = vmul.f32 -1.442695, %v535_v56  ;;  %v1983_v59 = vmul.f32 -1.442695, %v564_v57 }
 0x3a5   :  { %2084 = vpow2.f32 %v1982_v58 }
 0x3a6   :  { %2086 = vpow2.f32 %v1983_v59 }
 0x3b2   :  { %v2085_v62 = vpop.eup %2084 }
 0x3b3   :  { %v2087_v63 = vpop.eup %2086  ;;  %v539_v1 = vadd.f32 1.0, %v2085_v62 }
 0x3b4   :  { %v568_v7 = vadd.f32 1.0, %v2087_v63 }
 0x3b5   :  { %2088 = vrcp.f32 %v539_v1 }
 0x3b6   :  { %2090 = vrcp.f32 %v568_v7 }
 0x3c2   :  { %v2089_v3 = vpop.eup %2088 }
 0x3c3   :  { %v2091_v13 = vpop.eup %2090  ;;  %v553_v51 = vsub.f32 1.0, %v2089_v3 }
 0x413   :  { %v544_v9 = vpop.permute.xlu1 %543 }
 0x414   :  { %v546_v40 = vmul.f32 %v2089_v3, %v544_v9 }
 0x415   :  { %v580_v29 = vpop.permute.xlu0 %579 }
 0x416   :  { %v582_v22 = vmul.f32 %v2091_v13, %v580_v29  ;;  %548 = vrot.lane.b32.xlu1 %v546_v40, %s2310_s3 }
 0x418   :  { %584 = vrot.lane.b32.xlu0 %v582_v22, %s2310_s3 }
 0x41a   :  { %627 = vperm.xlu1 %2067, %v624_v27  }
 0x41c   :  { %639 = vperm.xlu0 %2066, %v636_v28  }
 0x41e   :  { %606 = vperm.xlu1 %2067, %v2629_v11  }
 0x420   :  { %618 = vperm.xlu0 %2066, %v2634_v15  }
 0x424   :  { %559 = vrot.lane.b32.xlu0 %v2599_v50, %s2312_s21 }
 0x428   :  { %595 = vrot.lane.b32.xlu0 %v2599_v50, %s2311_s20 }
 0x488   :  { %v549_v30 = vpop.permute.xlu1 %548 }
 0x489   :  { %v551_v31 = vadd.f32 %v549_v30, %v2539_v46  ;;  %v571_v46 = vadd.f32 %v534_v32, %v528_v54 }
 0x48a   :  { %v585_v33 = vpop.permute.xlu0 %584 }
 0x48b   :  { %2092 = vtanh.f32 %v551_v31  ;;  %v587_v34 = vadd.f32 %v585_v33, %v534_v32  ;;  %v1984_v44 = vmul.f32 -1.442695, %v571_v46 }
 0x48d   :  { %2094 = vtanh.f32 %v587_v34 }
 0x48e   :  { %2096 = vpow2.f32 %v1984_v44 }
 0x495   :  { %v628_v42 = vpop.permute.xlu1 %627 }
 0x496   :  { %v630_v43 = vmul.f32 %v628_v42, %v2599_v50 }
 0x497   :  { %v640_v35 = vpop.permute.xlu0 %639 }
 0x498   :  { %v2093_v36 = vpop.eup %2092  ;;  %v642_v60 = vmul.f32 %v640_v35, %v2599_v50 }
 0x499   :  { %555 = vrot.lane.b32.xlu1 %v2093_v36, %s2311_s20  ;;  %v607_v37 = vpop.permute.xlu1 %606 }
 0x49a   :  { %644 = vrot.lane.b32.xlu0 %v642_v60, %s2311_s20  ;;  %v2095_v39 = vpop.eup %2094 }
 0x49b   :  { %v2097_v45 = vpop.eup %2096  ;;  %v619_v49 = vpop.permute.xlu0 %618 }
 0x49c   :  { %v575_v48 = vadd.f32 1.0, %v2097_v45 }
 0x49d   :  { %591 = vrot.lane.b32.xlu1 %v2095_v39, %s2311_s20 }
 0x49e   :  { %2098 = vrcp.f32 %v575_v48 }
 0x49f   :  { %v560_v41 = vpop.permute.xlu0 %559 }
 0x4a0   :  { %v562_v57 = vmul.f32 %v2089_v3, %v560_v41  ;;  %v2694_v41 = vld [vmem:[%s3099_s1 + $0x10] sm:$0xff] }
 0x4a1   :  { %632 = vrot.lane.b32.xlu1 %v630_v43, %s2312_s21 }
 0x4a3   :  { %v596_v59 = vpop.permute.xlu0 %595 }
 0x4ab   :  { %v2099_v52 = vpop.eup %2098 }
 0x4ac   :  { %v589_v63 = vsub.f32 1.0, %v2099_v52  ;;  %v598_v1 = vmul.f32 %v2099_v52, %v596_v59 }
 0x50b   :  { %v556_v56 = vpop.permute.xlu1 %555 }
 0x50c   :  { %v558_v58 = vmul.f32 %v556_v56, %v553_v51  ;;  %v645_v22 = vpop.permute.xlu0 %644  ;;  %v2699_v56 = vld [vmem:[%s3099_s1 + $0x28] sm:$0xff] }
 0x50d   :  { %v837_v59 = vsub.f32 1.0, %v2699_v56 }
 0x50e   :  { %v563_v62 = vadd.f32 %v562_v57, %v558_v58  ;;  %v825_v58 = vsub.f32 1.0, %v2694_v41 }
 0x50f   :  { %v592_v50 = vpop.permute.xlu1 %591 }
 0x510   :  { %v594_v7 = vmul.f32 %v592_v50, %v589_v63  ;;  %v2657_v9 = vmul.f32 %v607_v37, %v563_v62  ;;  %v735_v50 = vld [vmem:[#allocation2 + $0x58] sm:$0xff] }
 0x512   :  { %v599_v54 = vadd.f32 %v598_v1, %v594_v7 }
 0x513   :  { %v633_v40 = vpop.permute.xlu1 %632 }
 0x514   :  { %v621_v13 = vmul.f32 %v619_v49, %v599_v54  ;;  %v635_v29 = vadd.f32 %v633_v40, %v2657_v9 }
 0x516   :  { %623 = vst.msk [vmem:[#allocation8 + $0x70] sm:$0xff] %vm89_vm0, %v621_v13  ;;  %649 = vrot.lane.b32.xlu1 %v635_v29, %s2311_s20  ;;  %v647_v3 = vadd.f32 %v645_v22, %v621_v13 }
 0x518   :  { %653 = vrot.lane.b32.xlu0 %v647_v3, %s2312_s21 }
 0x588   :  { %v650_v30 = vpop.permute.xlu1 %649 }
 0x58a   :  { %v654_v31 = vpop.permute.xlu0 %653 }
 0x58b   :  { %v2664_v32 = vsel %vm89_vm0, %v650_v30, %v654_v31 }
 0x58c   :  { %1987 = vmatmul.mubr.msk.f32.vlgmr.msra.gmra.mxu0 %vm228_vm1, %v2664_v32 }
 0x58d   :  { %1079 = vmatpush1.msra.mxu0 %v2386_v4  ;;  %1126 = vmatprep.mubr.f32.mxu0 %v2308_v0 }
 0x58e   :  { %1080 = vmatprep.subr.mxu0 %v2391_v6 }
 0x58f   :  { %1081 = vmatpush1.msra.mxu0 %v2397_v8 }
 0x590   :  { %1082 = vmatprep.subr.mxu0 %v2403_v10 }
 0x591   :  { %1083 = vmatpush1.msra.mxu0 %v2408_v12 }
 0x592   :  { %1084 = vmatprep.subr.mxu0 %v2414_v14 }
 0x593   :  { %1085 = vmatpush1.msra.mxu0 %v2420_v16 }
 0x594   :  { %1086 = vmatprep.subr.mxu0 %v2426_v18 }
 0x595   :  { %1087 = vmatpush1.msra.mxu0 %v2432_v19 }
 0x596   :  { %1088 = vmatprep.subr.mxu0 %v2438_v20 }
 0x597   :  { %1089 = vmatpush1.msra.mxu0 %v2445_v21 }
 0x598   :  { %1090 = vmatprep.subr.mxu0 %v2452_v23 }
 0x599   :  { %1091 = vmatpush1.msra.mxu0 %v2458_v24 }
 0x59a   :  { %1092 = vmatprep.subr.mxu0 %v2465_v25 }
 0x59b   :  { %1093 = vmatpush1.msra.mxu0 %v2473_v26 }
 0x59c   :  { %1472 = vmatprep.subr.mxu0 %v2380_v2 }
 0x64c   :  { %v726_v33 = vpop.f32.mrf.mxu0 }
 0x64d   :  { %v727_v34 = vadd.f32 %v726_v33, %v2541_v47 }
 0x64e   :  { %v728_v35 = vpop.f32.mrf.mxu0 }
 0x64f   :  { %v729_v36 = vadd.f32 %v728_v35, %v2549_v55  ;;  %744 = vrot.lane.b32.xlu1 %v727_v34, %s2310_s3  ;;  %v736_v60 = vadd.f32 %v727_v34, %v2546_v53  ;;  %v765_v39 = vadd.f32 %v727_v34, %v2574_v17 }
 0x651   :  { %780 = vrot.lane.b32.xlu0 %v729_v36, %s2310_s3  ;;  %v1988_v42 = vmul.f32 -1.442695, %v736_v60  ;;  %v1989_v43 = vmul.f32 -1.442695, %v765_v39 }
 0x653   :  { %2100 = vpow2.f32 %v1988_v42 }
 0x654   :  { %2102 = vpow2.f32 %v1989_v43 }
 0x660   :  { %v2101_v46 = vpop.eup %2100 }
 0x661   :  { %v2103_v44 = vpop.eup %2102  ;;  %v740_v45 = vadd.f32 1.0, %v2101_v46 }
 0x662   :  { %v769_v48 = vadd.f32 1.0, %v2103_v44 }
 0x663   :  { %2104 = vrcp.f32 %v740_v45 }
 0x664   :  { %2106 = vrcp.f32 %v769_v48 }
 0x670   :  { %v2105_v49 = vpop.eup %2104 }
 0x671   :  { %v2107_v52 = vpop.eup %2106  ;;  %v754_v39 = vsub.f32 1.0, %v2105_v49 }
 0x6c1   :  { %v745_v37 = vpop.permute.xlu1 %744 }
 0x6c2   :  { %v747_v51 = vmul.f32 %v2105_v49, %v745_v37 }
 0x6c3   :  { %v781_v17 = vpop.permute.xlu0 %780 }
 0x6c4   :  { %v783_v57 = vmul.f32 %v2107_v52, %v781_v17  ;;  %749 = vrot.lane.b32.xlu1 %v747_v51, %s2310_s3 }
 0x6c6   :  { %785 = vrot.lane.b32.xlu0 %v783_v57, %s2310_s3 }
 0x6c8   :  { %828 = vperm.xlu1 %2067, %v825_v58  }
 0x6ca   :  { %840 = vperm.xlu0 %2066, %v837_v59  }
 0x6cc   :  { %807 = vperm.xlu1 %2067, %v2694_v41  }
 0x6ce   :  { %819 = vperm.xlu0 %2066, %v2699_v56  }
 0x6d2   :  { %760 = vrot.lane.b32.xlu0 %v2664_v32, %s2312_s21 }
 0x6d6   :  { %796 = vrot.lane.b32.xlu0 %v2664_v32, %s2311_s20 }
 0x736   :  { %v750_v62 = vpop.permute.xlu1 %749 }
 0x737   :  { %v752_v63 = vadd.f32 %v750_v62, %v2546_v53  ;;  %v772_v53 = vadd.f32 %v735_v50, %v729_v36 }
 0x738   :  { %v786_v1 = vpop.permute.xlu0 %785 }
 0x739   :  { %2108 = vtanh.f32 %v752_v63  ;;  %v788_v7 = vadd.f32 %v786_v1, %v735_v50  ;;  %v1990_v30 = vmul.f32 -1.442695, %v772_v53 }
 0x73b   :  { %2110 = vtanh.f32 %v788_v7 }
 0x73c   :  { %2112 = vpow2.f32 %v1990_v30 }
 0x743   :  { %v829_v22 = vpop.permute.xlu1 %828 }
 0x744   :  { %v831_v3 = vmul.f32 %v829_v22, %v2664_v32 }
 0x745   :  { %v841_v54 = vpop.permute.xlu0 %840 }
 0x746   :  { %v2109_v40 = vpop.eup %2108  ;;  %v843_v13 = vmul.f32 %v841_v54, %v2664_v32 }
 0x747   :  { %756 = vrot.lane.b32.xlu1 %v2109_v40, %s2311_s20  ;;  %v808_v35 = vpop.permute.xlu1 %807 }
 0x748   :  { %845 = vrot.lane.b32.xlu0 %v843_v13, %s2311_s20  ;;  %v2111_v29 = vpop.eup %2110 }
 0x749   :  { %v2113_v31 = vpop.eup %2112  ;;  %v820_v34 = vpop.permute.xlu0 %819 }
 0x74a   :  { %v776_v33 = vadd.f32 1.0, %v2113_v31 }
 0x74b   :  { %792 = vrot.lane.b32.xlu1 %v2111_v29, %s2311_s20  ;;  %v2764_v29 = vld [vmem:[%s3099_s1 + $0x20] sm:$0xff] }
 0x74c   :  { %2114 = vrcp.f32 %v776_v33  ;;  %v1038_v53 = vsub.f32 1.0, %v2764_v29  ;;  %v936_v33 = vld [vmem:[#allocation2 + $0x48] sm:$0xff] }
 0x74d   :  { %v761_v60 = vpop.permute.xlu0 %760 }
 0x74e   :  { %v763_v46 = vmul.f32 %v2105_v49, %v761_v60 }
 0x74f   :  { %833 = vrot.lane.b32.xlu1 %v831_v3, %s2312_s21 }
 0x751   :  { %v797_v45 = vpop.permute.xlu0 %796 }
 0x759   :  { %v2115_v42 = vpop.eup %2114 }
 0x75a   :  { %v790_v37 = vsub.f32 1.0, %v2115_v42  ;;  %v799_v51 = vmul.f32 %v2115_v42, %v797_v45 }
 0x7b9   :  { %v757_v43 = vpop.permute.xlu1 %756 }
 0x7ba   :  { %v759_v44 = vmul.f32 %v757_v43, %v754_v39  ;;  %v846_v50 = vpop.permute.xlu0 %845 }
 0x7bc   :  { %v764_v48 = vadd.f32 %v763_v46, %v759_v44 }
 0x7bd   :  { %v793_v32 = vpop.permute.xlu1 %792 }
 0x7be   :  { %v795_v52 = vmul.f32 %v793_v32, %v790_v37  ;;  %v2722_v17 = vmul.f32 %v808_v35, %v764_v48 }
 0x7c0   :  { %v800_v36 = vadd.f32 %v799_v51, %v795_v52 }
 0x7c1   :  { %v834_v57 = vpop.permute.xlu1 %833 }
 0x7c2   :  { %v822_v62 = vmul.f32 %v820_v34, %v800_v36  ;;  %v836_v63 = vadd.f32 %v834_v57, %v2722_v17 }
 0x7c4   :  { %824 = vst.msk [vmem:[#allocation8 + $0x68] sm:$0xff] %vm89_vm0, %v822_v62  ;;  %850 = vrot.lane.b32.xlu1 %v836_v63, %s2311_s20  ;;  %v848_v49 = vadd.f32 %v846_v50, %v822_v62 }
 0x7c6   :  { %854 = vrot.lane.b32.xlu0 %v848_v49, %s2312_s21 }
 0x836   :  { %v851_v1 = vpop.permute.xlu1 %850 }
 0x838   :  { %v855_v7 = vpop.permute.xlu0 %854 }
 0x839   :  { %v2729_v54 = vsel %vm89_vm0, %v851_v1, %v855_v7 }
 0x83a   :  { %1993 = vmatmul.mubr.msk.f32.vlgmr.msra.gmra.mxu1 %vm228_vm1, %v2729_v54 }
 0x83b   :  { %1276 = vmatpush1.msra.mxu1 %v2386_v4  ;;  %1323 = vmatprep.mubr.f32.mxu1 %v2308_v0 }
 0x83c   :  { %1277 = vmatprep.subr.mxu1 %v2391_v6 }
 0x83d   :  { %1278 = vmatpush1.msra.mxu1 %v2397_v8 }
 0x83e   :  { %1279 = vmatprep.subr.mxu1 %v2403_v10 }
 0x83f   :  { %1280 = vmatpush1.msra.mxu1 %v2408_v12 }
 0x840   :  { %1281 = vmatprep.subr.mxu1 %v2414_v14 }
 0x841   :  { %1282 = vmatpush1.msra.mxu1 %v2420_v16 }
 0x842   :  { %1283 = vmatprep.subr.mxu1 %v2426_v18 }
 0x843   :  { %1284 = vmatpush1.msra.mxu1 %v2432_v19 }
 0x844   :  { %1285 = vmatprep.subr.mxu1 %v2438_v20 }
 0x845   :  { %1286 = vmatpush1.msra.mxu1 %v2445_v21 }
 0x846   :  { %1287 = vmatprep.subr.mxu1 %v2452_v23 }
 0x847   :  { %1288 = vmatpush1.msra.mxu1 %v2458_v24 }
 0x848   :  { %1289 = vmatprep.subr.mxu1 %v2465_v25  ;;  %v2759_v25 = vld [vmem:[%s3099_s1 + $0x18] sm:$0xff] }
 0x849   :  { %1290 = vmatpush1.msra.mxu1 %v2473_v26  ;;  %v1026_v3 = vsub.f32 1.0, %v2759_v25 }
 0x84a   :  { %1669 = vmatprep.subr.mxu1 %v2380_v2 }
 0x8fa   :  { %v927_v4 = vpop.f32.mrf.mxu1 }
 0x8fb   :  { %v928_v6 = vadd.f32 %v927_v4, %v2541_v47 }
 0x8fc   :  { %v929_v8 = vpop.f32.mrf.mxu1 }
 0x8fd   :  { %v930_v10 = vadd.f32 %v929_v8, %v2549_v55  ;;  %945 = vrot.lane.b32.xlu1 %v928_v6, %s2310_s3  ;;  %v937_v12 = vadd.f32 %v928_v6, %v2558_v61  ;;  %v966_v14 = vadd.f32 %v928_v6, %v2567_v5 }
 0x8ff   :  { %981 = vrot.lane.b32.xlu0 %v930_v10, %s2310_s3  ;;  %v1994_v16 = vmul.f32 -1.442695, %v937_v12  ;;  %v1995_v18 = vmul.f32 -1.442695, %v966_v14  ;;  %v973_v45 = vadd.f32 %v936_v33, %v930_v10 }
 0x901   :  { %2116 = vpow2.f32 %v1994_v16  ;;  %v1996_v48 = vmul.f32 -1.442695, %v973_v45 }
 0x902   :  { %2118 = vpow2.f32 %v1995_v18 }
 0x90e   :  { %v2117_v19 = vpop.eup %2116 }
 0x90f   :  { %v2119_v2 = vpop.eup %2118  ;;  %v941_v20 = vadd.f32 1.0, %v2117_v19 }
 0x910   :  { %v970_v21 = vadd.f32 1.0, %v2119_v2 }
 0x911   :  { %2120 = vrcp.f32 %v941_v20 }
 0x912   :  { %2122 = vrcp.f32 %v970_v21 }
 0x91e   :  { %v2121_v23 = vpop.eup %2120 }
 0x91f   :  { %v2123_v40 = vpop.eup %2122  ;;  %v955_v57 = vsub.f32 1.0, %v2121_v23 }
 0x96f   :  { %v946_v24 = vpop.permute.xlu1 %945 }
 0x970   :  { %v948_v26 = vmul.f32 %v2121_v23, %v946_v24  ;;  %v2801_v24 = vld [vmem:[%s3102_s4 + $0x70] sm:$0xff] }
 0x971   :  { %v982_v13 = vpop.permute.xlu0 %981 }
 0x972   :  { %v984_v22 = vmul.f32 %v2123_v40, %v982_v13  ;;  %950 = vrot.lane.b32.xlu1 %v948_v26, %s2310_s3  ;;  %v2808_v26 = vld [vmem:[%s3102_s4 + $0x68] sm:$0xff]  ;;  %v2814_v40 = vld [vmem:[%s3102_s4 + $0x60] sm:$0xff]  ;;  %v2820_v13 = vld [vmem:[%s3102_s4 + $0x58] sm:$0xff] }
 0x974   :  { %986 = vrot.lane.b32.xlu0 %v984_v22, %s2310_s3  ;;  %v2826_v22 = vld [vmem:[%s3102_s4 + $0x50] sm:$0xff] }
 0x976   :  { %1029 = vperm.xlu1 %2067, %v1026_v3  }
 0x978   :  { %1041 = vperm.xlu0 %2066, %v1038_v53  }
 0x97a   :  { %1008 = vperm.xlu1 %2067, %v2759_v25  }
 0x97c   :  { %1020 = vperm.xlu0 %2066, %v2764_v29  }
 0x980   :  { %961 = vrot.lane.b32.xlu0 %v2729_v54, %s2312_s21 }
 0x984   :  { %997 = vrot.lane.b32.xlu0 %v2729_v54, %s2311_s20 }
 0x9e4   :  { %v951_v30 = vpop.permute.xlu1 %950 }
 0x9e5   :  { %v953_v31 = vadd.f32 %v951_v30, %v2558_v61  ;;  %v2832_v30 = vld [vmem:[%s3102_s4 + $0x48] sm:$0xff] }
 0x9e6   :  { %v987_v34 = vpop.permute.xlu0 %986 }
 0x9e7   :  { %2124 = vtanh.f32 %v953_v31  ;;  %v989_v35 = vadd.f32 %v987_v34, %v936_v33  ;;  %v2838_v31 = vld [vmem:[%s3102_s4 + $0x40] sm:$0xff]  ;;  %v2844_v33 = vld [vmem:[%s3102_s4 + $0x38] sm:$0xff]  ;;  %v2850_v34 = vld [vmem:[%s3102_s4 + $0x30] sm:$0xff] }
 0x9e9   :  { %2126 = vtanh.f32 %v989_v35  ;;  %v2856_v35 = vld [vmem:[%s3102_s4 + $0x28] sm:$0xff] }
 0x9ea   :  { %2128 = vpow2.f32 %v1996_v48 }
 0x9f1   :  { %v1030_v46 = vpop.permute.xlu1 %1029 }
 0x9f2   :  { %v1032_v44 = vmul.f32 %v1030_v46, %v2729_v54  ;;  %v2886_v46 = vld [vmem:[%s3102_s4] sm:$0xff] }
 0x9f3   :  { %v1042_v60 = vpop.permute.xlu0 %1041 }
 0x9f4   :  { %v2125_v39 = vpop.eup %2124  ;;  %v1044_v42 = vmul.f32 %v1042_v60, %v2729_v54  ;;  %v2862_v60 = vld [vmem:[%s3102_s4 + $0x20] sm:$0xff] }
 0x9f5   :  { %957 = vrot.lane.b32.xlu1 %v2125_v39, %s2311_s20  ;;  %v1009_v52 = vpop.permute.xlu1 %1008  ;;  %v2868_v39 = vld [vmem:[%s3102_s4 + $0x18] sm:$0xff] }
 0x9f6   :  { %1046 = vrot.lane.b32.xlu0 %v1044_v42, %s2311_s20  ;;  %v2127_v43 = vpop.eup %2126  ;;  %v2874_v42 = vld [vmem:[%s3102_s4 + $0x10] sm:$0xff] }
 0x9f7   :  { %v2129_v37 = vpop.eup %2128  ;;  %v1021_v51 = vpop.permute.xlu0 %1020 }
 0x9f8   :  { %v977_v32 = vadd.f32 1.0, %v2129_v37 }
 0x9f9   :  { %993 = vrot.lane.b32.xlu1 %v2127_v43, %s2311_s20  ;;  %v2880_v43 = vld [vmem:[%s3102_s4 + $0x8] sm:$0xff] }
 0x9fa   :  { %2130 = vrcp.f32 %v977_v32 }
 0x9fb   :  { %v962_v36 = vpop.permute.xlu0 %961 }
 0x9fc   :  { %v964_v50 = vmul.f32 %v2121_v23, %v962_v36 }
 0x9fd   :  { %1034 = vrot.lane.b32.xlu1 %v1032_v44, %s2312_s21 }
 0x9ff   :  { %v998_v1 = vpop.permute.xlu0 %997 }
 0xa07   :  { %v2131_v62 = vpop.eup %2130 }
 0xa08   :  { %v991_v4 = vsub.f32 1.0, %v2131_v62  ;;  %v1000_v6 = vmul.f32 %v2131_v62, %v998_v1 }
 0xa67   :  { %v958_v63 = vpop.permute.xlu1 %957 }
 0xa68   :  { %v960_v49 = vmul.f32 %v958_v63, %v955_v57  ;;  %v1047_v19 = vpop.permute.xlu0 %1046 }
 0xa6a   :  { %v965_v7 = vadd.f32 %v964_v50, %v960_v49 }
 0xa6b   :  { %v994_v54 = vpop.permute.xlu1 %993 }
 0xa6c   :  { %v996_v8 = vmul.f32 %v994_v54, %v991_v4  ;;  %v2787_v12 = vmul.f32 %v1009_v52, %v965_v7 }
 0xa6e   :  { %v1001_v10 = vadd.f32 %v1000_v6, %v996_v8 }
 0xa6f   :  { %v1035_v14 = vpop.permute.xlu1 %1034 }
 0xa70   :  { %v1023_v16 = vmul.f32 %v1021_v51, %v1001_v10  ;;  %v1037_v18 = vadd.f32 %v1035_v14, %v2787_v12  ;;  %v1135_v10 = vld [vmem:[#allocation2 + $0x38] sm:$0xff] }
 0xa72   :  { %1025 = vst.msk [vmem:[#allocation8 + $0x60] sm:$0xff] %vm89_vm0, %v1023_v16  ;;  %1051 = vrot.lane.b32.xlu1 %v1037_v18, %s2311_s20  ;;  %v1049_v2 = vadd.f32 %v1047_v19, %v1023_v16 }
 0xa74   :  { %1055 = vrot.lane.b32.xlu0 %v1049_v2, %s2312_s21 }
 0xae4   :  { %v1052_v20 = vpop.permute.xlu1 %1051 }
 0xae6   :  { %v1056_v21 = vpop.permute.xlu0 %1055 }
 0xae7   :  { %v2794_v23 = vsel %vm89_vm0, %v1052_v20, %v1056_v21 }
 0xae8   :  { %1999 = vmatmul.mubr.msk.f32.vlgmr.msra.gmra.mxu0 %vm228_vm1, %v2794_v23 }
 0xae9   :  { %1473 = vmatpush1.msra.mxu0 %v2801_v24  ;;  %1520 = vmatprep.mubr.f32.mxu0 %v2308_v0 }
 0xaea   :  { %1474 = vmatprep.subr.mxu0 %v2808_v26 }
 0xaeb   :  { %1475 = vmatpush1.msra.mxu0 %v2814_v40 }
 0xaec   :  { %1476 = vmatprep.subr.mxu0 %v2820_v13 }
 0xaed   :  { %1477 = vmatpush1.msra.mxu0 %v2826_v22 }
 0xaee   :  { %1478 = vmatprep.subr.mxu0 %v2832_v30 }
 0xaef   :  { %1479 = vmatpush1.msra.mxu0 %v2838_v31 }
 0xaf0   :  { %1480 = vmatprep.subr.mxu0 %v2844_v33 }
 0xaf1   :  { %1481 = vmatpush1.msra.mxu0 %v2850_v34 }
 0xaf2   :  { %1482 = vmatprep.subr.mxu0 %v2856_v35 }
 0xaf3   :  { %1483 = vmatpush1.msra.mxu0 %v2862_v60 }
 0xaf4   :  { %1484 = vmatprep.subr.mxu0 %v2868_v39 }
 0xaf5   :  { %1485 = vmatpush1.msra.mxu0 %v2874_v42 }
 0xaf6   :  { %1486 = vmatprep.subr.mxu0 %v2880_v43 }
 0xaf7   :  { %1487 = vmatpush1.msra.mxu0 %v2886_v46 }
 0xaf8   :  { %2033 = vmatprep.subr.mxu0 %v2308_v0 }
 0xba8   :  { %v1128_v44 = vpop.f32.mrf.mxu0 }
 0xba9   :  { %v1129_v45 = vadd.f32 %v1128_v44, %v2541_v47 }
 0xbaa   :  { %v1130_v48 = vpop.f32.mrf.mxu0 }
 0xbab   :  { %v1131_v37 = vadd.f32 %v1130_v48, %v2549_v55  ;;  %1144 = vrot.lane.b32.xlu1 %v1129_v45, %s2310_s3  ;;  %v1136_v32 = vadd.f32 %v1129_v45, %v2567_v5  ;;  %v1165_v51 = vadd.f32 %v1129_v45, %v2558_v61 }
 0xbad   :  { %1180 = vrot.lane.b32.xlu0 %v1131_v37, %s2310_s3  ;;  %v2000_v52 = vmul.f32 -1.442695, %v1136_v32  ;;  %v2001_v36 = vmul.f32 -1.442695, %v1165_v51 }
 0xbaf   :  { %2132 = vpow2.f32 %v2000_v52 }
 0xbb0   :  { %2134 = vpow2.f32 %v2001_v36 }
 0xbbc   :  { %v2133_v57 = vpop.eup %2132 }
 0xbbd   :  { %v2135_v62 = vpop.eup %2134  ;;  %v1140_v63 = vadd.f32 1.0, %v2133_v57 }
 0xbbe   :  { %v1169_v50 = vadd.f32 1.0, %v2135_v62 }
 0xbbf   :  { %2136 = vrcp.f32 %v1140_v63 }
 0xbc0   :  { %2138 = vrcp.f32 %v1169_v50 }
 0xbcc   :  { %v2137_v49 = vpop.eup %2136 }
 0xbcd   :  { %v2139_v4 = vpop.eup %2138  ;;  %v1154_v32 = vsub.f32 1.0, %v2137_v49 }
 0xc1d   :  { %v1145_v1 = vpop.permute.xlu1 %1144 }
 0xc1e   :  { %v1147_v7 = vmul.f32 %v2137_v49, %v1145_v1 }
 0xc1f   :  { %v1181_v54 = vpop.permute.xlu0 %1180 }
 0xc20   :  { %v1183_v6 = vmul.f32 %v2139_v4, %v1181_v54  ;;  %1149 = vrot.lane.b32.xlu1 %v1147_v7, %s2310_s3 }
 0xc22   :  { %1185 = vrot.lane.b32.xlu0 %v1183_v6, %s2310_s3 }
 0xc24   :  { %1226 = vperm.xlu1 %2067, %v1038_v53  }
 0xc26   :  { %1238 = vperm.xlu0 %2066, %v1026_v3  }
 0xc28   :  { %1205 = vperm.xlu1 %2067, %v2764_v29  }
 0xc2a   :  { %1217 = vperm.xlu0 %2066, %v2759_v25  }
 0xc2e   :  { %1160 = vrot.lane.b32.xlu0 %v2794_v23, %s2312_s21 }
 0xc32   :  { %1196 = vrot.lane.b32.xlu0 %v2794_v23, %s2311_s20 }
 0xc92   :  { %v1150_v61 = vpop.permute.xlu1 %1149 }
 0xc93   :  { %v1152_v8 = vadd.f32 %v1150_v61, %v2567_v5  ;;  %v1172_v5 = vadd.f32 %v1135_v10, %v1131_v37 }
 0xc94   :  { %v1186_v14 = vpop.permute.xlu0 %1185 }
 0xc95   :  { %2140 = vtanh.f32 %v1152_v8  ;;  %v1188_v53 = vadd.f32 %v1186_v14, %v1135_v10  ;;  %v2002_v2 = vmul.f32 -1.442695, %v1172_v5 }
 0xc97   :  { %2142 = vtanh.f32 %v1188_v53 }
 0xc98   :  { %2144 = vpow2.f32 %v2002_v2  ;;  %v1332_v2 = vld [vmem:[#allocation2 + $0x28] sm:$0xff] }
 0xc9f   :  { %v1227_v18 = vpop.permute.xlu1 %1226 }
 0xca0   :  { %v1229_v19 = vmul.f32 %v1227_v18, %v2794_v23 }
 0xca1   :  { %v1239_v16 = vpop.permute.xlu0 %1238 }
 0xca2   :  { %v2141_v3 = vpop.eup %2140  ;;  %v1241_v29 = vmul.f32 %v1239_v16, %v2794_v23 }
 0xca3   :  { %1156 = vrot.lane.b32.xlu1 %v2141_v3, %s2311_s20  ;;  %v1206_v45 = vpop.permute.xlu1 %1205 }
 0xca4   :  { %1243 = vrot.lane.b32.xlu0 %v1241_v29, %s2311_s20  ;;  %v2143_v25 = vpop.eup %2142 }
 0xca5   :  { %v2145_v20 = vpop.eup %2144  ;;  %v1218_v44 = vpop.permute.xlu0 %1217 }
 0xca6   :  { %v1176_v21 = vadd.f32 1.0, %v2145_v20 }
 0xca7   :  { %1192 = vrot.lane.b32.xlu1 %v2143_v25, %s2311_s20 }
 0xca8   :  { %2146 = vrcp.f32 %v1176_v21 }
 0xca9   :  { %v1161_v48 = vpop.permute.xlu0 %1160 }
 0xcaa   :  { %v1163_v36 = vmul.f32 %v2137_v49, %v1161_v48 }
 0xcab   :  { %1231 = vrot.lane.b32.xlu1 %v1229_v19, %s2312_s21 }
 0xcad   :  { %v1197_v62 = vpop.permute.xlu0 %1196 }
 0xcb5   :  { %v2147_v51 = vpop.eup %2146 }
 0xcb6   :  { %v1190_v50 = vsub.f32 1.0, %v2147_v51  ;;  %v1199_v1 = vmul.f32 %v2147_v51, %v1197_v62 }
 0xd15   :  { %v1157_v52 = vpop.permute.xlu1 %1156 }
 0xd16   :  { %v1159_v57 = vmul.f32 %v1157_v52, %v1154_v32  ;;  %v1244_v8 = vpop.permute.xlu0 %1243 }
 0xd18   :  { %v1164_v63 = vadd.f32 %v1163_v36, %v1159_v57 }
 0xd19   :  { %v1193_v23 = vpop.permute.xlu1 %1192 }
 0xd1a   :  { %v1195_v7 = vmul.f32 %v1193_v23, %v1190_v50  ;;  %v2915_v4 = vmul.f32 %v1206_v45, %v1164_v63 }
 0xd1c   :  { %v1200_v37 = vadd.f32 %v1199_v1, %v1195_v7 }
 0xd1d   :  { %v1232_v54 = vpop.permute.xlu1 %1231 }
 0xd1e   :  { %v1220_v6 = vmul.f32 %v1218_v44, %v1200_v37  ;;  %v1234_v61 = vadd.f32 %v1232_v54, %v2915_v4 }
 0xd20   :  { %1222 = vst.msk [vmem:[#allocation8 + $0x58] sm:$0xff] %vm89_vm0, %v1220_v6  ;;  %1248 = vrot.lane.b32.xlu1 %v1234_v61, %s2311_s20  ;;  %v1246_v49 = vadd.f32 %v1244_v8, %v1220_v6 }
 0xd22   :  { %1252 = vrot.lane.b32.xlu0 %v1246_v49, %s2312_s21 }
 0xd92   :  { %v1249_v10 = vpop.permute.xlu1 %1248 }
 0xd94   :  { %v1253_v14 = vpop.permute.xlu0 %1252 }
 0xd95   :  { %v2922_v53 = vsel %vm89_vm0, %v1249_v10, %v1253_v14 }
 0xd96   :  { %2005 = vmatmul.mubr.msk.f32.vlgmr.msra.gmra.mxu1 %vm228_vm1, %v2922_v53 }
 0xd97   :  { %1670 = vmatpush1.msra.mxu1 %v2801_v24  ;;  %1717 = vmatprep.mubr.f32.mxu1 %v2308_v0 }
 0xd98   :  { %1671 = vmatprep.subr.mxu1 %v2808_v26 }
 0xd99   :  { %1672 = vmatpush1.msra.mxu1 %v2814_v40 }
 0xd9a   :  { %1673 = vmatprep.subr.mxu1 %v2820_v13 }
 0xd9b   :  { %1674 = vmatpush1.msra.mxu1 %v2826_v22  ;;  %v2213_v22 = vld [vmem:[#allocation2 + $0x50] sm:$0xff] }
 0xd9c   :  { %1675 = vmatprep.subr.mxu1 %v2832_v30 }
 0xd9d   :  { %1676 = vmatpush1.msra.mxu1 %v2838_v31  ;;  %v1331_v31 = vld [vmem:[#allocation2 + $0x20] sm:$0xff] }
 0xd9e   :  { %1677 = vmatprep.subr.mxu1 %v2844_v33 }
 0xd9f   :  { %1678 = vmatpush1.msra.mxu1 %v2850_v34 }
 0xda0   :  { %1679 = vmatprep.subr.mxu1 %v2856_v35 }
 0xda1   :  { %1680 = vmatpush1.msra.mxu1 %v2862_v60 }
 0xda2   :  { %1681 = vmatprep.subr.mxu1 %v2868_v39 }
 0xda3   :  { %1682 = vmatpush1.msra.mxu1 %v2874_v42 }
 0xda4   :  { %1683 = vmatprep.subr.mxu1 %v2880_v43 }
 0xda5   :  { %1684 = vmatpush1.msra.mxu1 %v2886_v46 }
 0xe56   :  { %v1325_v24 = vpop.f32.mrf.mxu1 }
 0xe57   :  { %v1326_v26 = vadd.f32 %v1325_v24, %v2541_v47 }
 0xe58   :  { %v1327_v40 = vpop.f32.mrf.mxu1 }
 0xe59   :  { %v1328_v13 = vadd.f32 %v1327_v40, %v2549_v55  ;;  %1341 = vrot.lane.b32.xlu1 %v1326_v26, %s2310_s3  ;;  %v1333_v30 = vadd.f32 %v2213_v22, %v1326_v26  ;;  %v1362_v33 = vadd.f32 %v1331_v31, %v1326_v26 }
 0xe5b   :  { %1377 = vrot.lane.b32.xlu0 %v1328_v13, %s2310_s3  ;;  %v2006_v34 = vmul.f32 -1.442695, %v1333_v30  ;;  %v2007_v35 = vmul.f32 -1.442695, %v1362_v33  ;;  %v1369_v48 = vadd.f32 %v1332_v2, %v1328_v13 }
 0xe5d   :  { %2148 = vpow2.f32 %v2006_v34  ;;  %v2008_v32 = vmul.f32 -1.442695, %v1369_v48 }
 0xe5e   :  { %2150 = vpow2.f32 %v2007_v35 }
 0xe6a   :  { %v2149_v60 = vpop.eup %2148 }
 0xe6b   :  { %v2151_v39 = vpop.eup %2150  ;;  %v1337_v42 = vadd.f32 1.0, %v2149_v60 }
 0xe6c   :  { %v1366_v43 = vadd.f32 1.0, %v2151_v39  ;;  %v1527_v39 = vld [vmem:[#allocation2 + $0x60] sm:$0xff] }
 0xe6d   :  { %2152 = vrcp.f32 %v1337_v42 }
 0xe6e   :  { %2154 = vrcp.f32 %v1366_v43  ;;  %v1528_v43 = vld [vmem:[#allocation2 + $0x10] sm:$0xff] }
 0xe7a   :  { %v2153_v46 = vpop.eup %2152 }
 0xe7b   :  { %v2155_v29 = vpop.eup %2154  ;;  %v1351_v63 = vsub.f32 1.0, %v2153_v46 }
 0xecb   :  { %v1342_v16 = vpop.permute.xlu1 %1341 }
 0xecc   :  { %v1344_v3 = vmul.f32 %v2153_v46, %v1342_v16 }
 0xecd   :  { %v1378_v25 = vpop.permute.xlu0 %1377 }
 0xece   :  { %v1380_v18 = vmul.f32 %v2155_v29, %v1378_v25  ;;  %1346 = vrot.lane.b32.xlu1 %v1344_v3, %s2310_s3 }
 0xed0   :  { %1382 = vrot.lane.b32.xlu0 %v1380_v18, %s2310_s3 }
 0xed2   :  { %1423 = vperm.xlu1 %2067, %v837_v59  }
 0xed4   :  { %1435 = vperm.xlu0 %2066, %v825_v58  }
 0xed6   :  { %1402 = vperm.xlu1 %2067, %v2699_v56  }
 0xed8   :  { %1414 = vperm.xlu0 %2066, %v2694_v41  }
 0xedc   :  { %1357 = vrot.lane.b32.xlu0 %v2922_v53, %s2312_s21 }
 0xee0   :  { %1393 = vrot.lane.b32.xlu0 %v2922_v53, %s2311_s20 }
 0xf40   :  { %v1347_v19 = vpop.permute.xlu1 %1346 }
 0xf41   :  { %v1349_v5 = vadd.f32 %v2213_v22, %v1347_v19 }
 0xf42   :  { %v1383_v20 = vpop.permute.xlu0 %1382 }
 0xf43   :  { %2156 = vtanh.f32 %v1349_v5  ;;  %v1385_v21 = vadd.f32 %v1383_v20, %v1332_v2 }
 0xf45   :  { %2158 = vtanh.f32 %v1385_v21 }
 0xf46   :  { %2160 = vpow2.f32 %v2008_v32 }
 0xf4d   :  { %v1424_v56 = vpop.permute.xlu1 %1423 }
 0xf4e   :  { %v1426_v45 = vmul.f32 %v1424_v56, %v2922_v53  ;;  %v1529_v56 = vld [vmem:[#allocation2 + $0x18] sm:$0xff] }
 0xf4f   :  { %v1436_v59 = vpop.permute.xlu0 %1435 }
 0xf50   :  { %v2157_v44 = vpop.eup %2156  ;;  %v1438_v58 = vmul.f32 %v1436_v59, %v2922_v53 }
 0xf51   :  { %1353 = vrot.lane.b32.xlu1 %v2157_v44, %s2311_s20  ;;  %v1403_v57 = vpop.permute.xlu1 %1402 }
 0xf52   :  { %1440 = vrot.lane.b32.xlu0 %v1438_v58, %s2311_s20  ;;  %v2159_v41 = vpop.eup %2158 }
 0xf53   :  { %v2161_v51 = vpop.eup %2160  ;;  %v1415_v36 = vpop.permute.xlu0 %1414 }
 0xf54   :  { %v1373_v52 = vadd.f32 1.0, %v2161_v51 }
 0xf55   :  { %1389 = vrot.lane.b32.xlu1 %v2159_v41, %s2311_s20 }
 0xf56   :  { %2162 = vrcp.f32 %v1373_v52 }
 0xf57   :  { %v1358_v62 = vpop.permute.xlu0 %1357 }
 0xf58   :  { %v1360_v1 = vmul.f32 %v2153_v46, %v1358_v62 }
 0xf59   :  { %1428 = vrot.lane.b32.xlu1 %v1426_v45, %s2312_s21 }
 0xf5b   :  { %v1394_v37 = vpop.permute.xlu0 %1393 }
 0xf63   :  { %v2163_v50 = vpop.eup %2162 }
 0xf64   :  { %v1387_v6 = vsub.f32 1.0, %v2163_v50  ;;  %v1396_v8 = vmul.f32 %v2163_v50, %v1394_v37 }
 0xfc3   :  { %v1354_v23 = vpop.permute.xlu1 %1353 }
 0xfc4   :  { %v1356_v7 = vmul.f32 %v1354_v23, %v1351_v63  ;;  %v1441_v40 = vpop.permute.xlu0 %1440 }
 0xfc6   :  { %v1361_v54 = vadd.f32 %v1360_v1, %v1356_v7 }
 0xfc7   :  { %v1390_v61 = vpop.permute.xlu1 %1389 }
 0xfc8   :  { %v1392_v49 = vmul.f32 %v1390_v61, %v1387_v6  ;;  %v2964_v14 = vmul.f32 %v1403_v57, %v1361_v54 }
 0xfca   :  { %v1397_v10 = vadd.f32 %v1396_v8, %v1392_v49 }
 0xfcb   :  { %v1429_v53 = vpop.permute.xlu1 %1428 }
 0xfcc   :  { %v1417_v24 = vmul.f32 %v1415_v36, %v1397_v10  ;;  %v1431_v26 = vadd.f32 %v1429_v53, %v2964_v14 }
 0xfce   :  { %1419 = vst.msk [vmem:[#allocation8 + $0x50] sm:$0xff] %vm89_vm0, %v1417_v24  ;;  %1445 = vrot.lane.b32.xlu1 %v1431_v26, %s2311_s20  ;;  %v1443_v13 = vadd.f32 %v1441_v40, %v1417_v24 }
 0xfd0   :  { %1449 = vrot.lane.b32.xlu0 %v1443_v13, %s2312_s21 }
0x1040   :  { %v1446_v22 = vpop.permute.xlu1 %1445 }
0x1042   :  { %v1450_v30 = vpop.permute.xlu0 %1449 }
0x1043   :  { %v1452_v31 = vsel %vm89_vm0, %v1446_v22, %v1450_v30 }
0x1044   :  { %2011 = vmatmul.mubr.msk.f32.vlgmr.msra.gmra.mxu0 %vm228_vm1, %v1452_v31 }
0x1045   :  { %2049 = vmatprep.mubr.msk.f32.mxu0 %vm2313_vm2, %v2308_v0 }
0x1104   :  { %v1522_v33 = vpop.f32.mrf.mxu0 }
0x1105   :  { %v1523_v34 = vadd.f32 %v1522_v33, %v2541_v47 }
0x1106   :  { %v1524_v35 = vpop.f32.mrf.mxu0 }
0x1107   :  { %v1525_v60 = vadd.f32 %v1524_v35, %v2549_v55  ;;  %1538 = vrot.lane.b32.xlu1 %v1523_v34, %s2310_s3  ;;  %v1530_v42 = vadd.f32 %v1527_v39, %v1523_v34  ;;  %v1559_v46 = vadd.f32 %v1528_v43, %v1523_v34 }
0x1109   :  { %1574 = vrot.lane.b32.xlu0 %v1525_v60, %s2310_s3  ;;  %v2012_v16 = vmul.f32 -1.442695, %v1530_v42  ;;  %v2013_v3 = vmul.f32 -1.442695, %v1559_v46  ;;  %v1566_v52 = vadd.f32 %v1529_v56, %v1525_v60 }
0x110b   :  { %2164 = vpow2.f32 %v2012_v16  ;;  %v2014_v36 = vmul.f32 -1.442695, %v1566_v52  ;;  %v1724_v16 = vld [vmem:[#allocation2 + $0x70] sm:$0xff] }
0x110c   :  { %2166 = vpow2.f32 %v2013_v3 }
0x1118   :  { %v2165_v29 = vpop.eup %2164 }
0x1119   :  { %v2167_v25 = vpop.eup %2166  ;;  %v1534_v18 = vadd.f32 1.0, %v2165_v29  ;;  %v1725_v29 = vld [vmem:[#allocation2] sm:$0xff] }
0x111a   :  { %v1563_v19 = vadd.f32 1.0, %v2167_v25 }
0x111b   :  { %2168 = vrcp.f32 %v1534_v18 }
0x111c   :  { %2170 = vrcp.f32 %v1563_v19 }
0x1128   :  { %v2169_v5 = vpop.eup %2168 }
0x1129   :  { %v2171_v21 = vpop.eup %2170  ;;  %v1548_v1 = vsub.f32 1.0, %v2169_v5 }
0x1179   :  { %v1539_v2 = vpop.permute.xlu1 %1538 }
0x117a   :  { %v1541_v20 = vmul.f32 %v2169_v5, %v1539_v2 }
0x117b   :  { %v1575_v59 = vpop.permute.xlu0 %1574 }
0x117c   :  { %v1577_v44 = vmul.f32 %v2171_v21, %v1575_v59  ;;  %1543 = vrot.lane.b32.xlu1 %v1541_v20, %s2310_s3  ;;  %v2021_v59 = vld [vmem:[%s3099_s1 + $0x38] sm:$0xff] }
0x117e   :  { %1579 = vrot.lane.b32.xlu0 %v1577_v44, %s2310_s3 }
0x1180   :  { %1620 = vperm.xlu1 %2067, %v636_v28  }
0x1182   :  { %1632 = vperm.xlu0 %2066, %v624_v27  }
0x1184   :  { %1599 = vperm.xlu1 %2067, %v2634_v15  }
0x1186   :  { %1611 = vperm.xlu0 %2066, %v2629_v11  }
0x118a   :  { %1554 = vrot.lane.b32.xlu0 %v1452_v31, %s2312_s21 }
0x118e   :  { %1590 = vrot.lane.b32.xlu0 %v1452_v31, %s2311_s20 }
0x11ee   :  { %v1544_v58 = vpop.permute.xlu1 %1543 }
0x11ef   :  { %v1546_v41 = vadd.f32 %v1544_v58, %v1527_v39 }
0x11f0   :  { %v1580_v45 = vpop.permute.xlu0 %1579 }
0x11f1   :  { %2172 = vtanh.f32 %v1546_v41  ;;  %v1582_v48 = vadd.f32 %v1580_v45, %v1529_v56  ;;  %v1793_v56 = vld [vmem:[%s3099_s1] sm:$0xff] }
0x11f3   :  { %2174 = vtanh.f32 %v1582_v48  ;;  %v1814_v48 = vsub.f32 1.0, %v2021_v59 }
0x11f4   :  { %2176 = vpow2.f32 %v2014_v36 }
0x11fb   :  { %v1621_v11 = vpop.permute.xlu1 %1620 }
0x11fc   :  { %v1623_v27 = vmul.f32 %v1621_v11, %v1452_v31 }
0x11fd   :  { %v1633_v32 = vpop.permute.xlu0 %1632 }
0x11fe   :  { %v2173_v28 = vpop.eup %2172  ;;  %v1635_v51 = vmul.f32 %v1633_v32, %v1452_v31  ;;  %v1826_v32 = vsub.f32 1.0, %v1793_v56 }
0x11ff   :  { %1550 = vrot.lane.b32.xlu1 %v2173_v28, %s2311_s20  ;;  %v1600_v50 = vpop.permute.xlu1 %1599 }
0x1200   :  { %1637 = vrot.lane.b32.xlu0 %v1635_v51, %s2311_s20  ;;  %v2175_v15 = vpop.eup %2174 }
0x1201   :  { %v2177_v57 = vpop.eup %2176  ;;  %v1612_v63 = vpop.permute.xlu0 %1611 }
0x1202   :  { %v1570_v62 = vadd.f32 1.0, %v2177_v57 }
0x1203   :  { %1586 = vrot.lane.b32.xlu1 %v2175_v15, %s2311_s20  ;;  %v1726_v15 = vld [vmem:[#allocation2 + $0x8] sm:$0xff] }
0x1204   :  { %2178 = vrcp.f32 %v1570_v62 }
0x1205   :  { %v1555_v23 = vpop.permute.xlu0 %1554 }
0x1206   :  { %v1557_v54 = vmul.f32 %v2169_v5, %v1555_v23  ;;  %v1854_v23 = vld [vmem:[%s3104_s6 + $0x38] sm:$0xff] }
0x1207   :  { %1625 = vrot.lane.b32.xlu1 %v1623_v27, %s2312_s21  ;;  %2034 = vmatpush3.msra.mxu0 %v1854_v23 }
0x1208   :  { %2035 = vmatprep.subr.mxu0 %v2308_v0 }
0x1209   :  { %v1591_v61 = vpop.permute.xlu0 %1590 }
0x1211   :  { %v2179_v7 = vpop.eup %2178 }
0x1212   :  { %v1584_v49 = vsub.f32 1.0, %v2179_v7  ;;  %v1593_v53 = vmul.f32 %v2179_v7, %v1591_v61  ;;  %v1852_v7 = vld [vmem:[%s3104_s6 + $0x28] sm:$0xff] }
0x1271   :  { %v1551_v37 = vpop.permute.xlu1 %1550 }
0x1272   :  { %v1553_v6 = vmul.f32 %v1551_v37, %v1548_v1  ;;  %v1638_v31 = vpop.permute.xlu0 %1637  ;;  %v1853_v1 = vld [vmem:[%s3104_s6 + $0x30] sm:$0xff]  ;;  %v1851_v37 = vld [vmem:[%s3104_s6 + $0x20] sm:$0xff] }
0x1273   :  { %2036 = vmatpush3.msra.mxu0 %v1853_v1 }
0x1274   :  { %v1558_v8 = vadd.f32 %v1557_v54, %v1553_v6  ;;  %2037 = vmatprep.subr.mxu0 %v2308_v0  ;;  %v1850_v54 = vld [vmem:[%s3104_s6 + $0x18] sm:$0xff]  ;;  %v1849_v6 = vld [vmem:[%s3104_s6 + $0x10] sm:$0xff] }
0x1275   :  { %v1587_v10 = vpop.permute.xlu1 %1586  ;;  %2038 = vmatpush3.msra.mxu0 %v1852_v7 }
0x1276   :  { %v1589_v24 = vmul.f32 %v1587_v10, %v1584_v49  ;;  %v2990_v40 = vmul.f32 %v1600_v50, %v1558_v8  ;;  %2039 = vmatprep.subr.mxu0 %v2308_v0 }
0x1277   :  { %2040 = vmatpush3.msra.mxu0 %v1851_v37 }
0x1278   :  { %v1594_v26 = vadd.f32 %v1593_v53, %v1589_v24  ;;  %2041 = vmatprep.subr.mxu0 %v2308_v0 }
0x1279   :  { %v1626_v13 = vpop.permute.xlu1 %1625  ;;  %2042 = vmatpush3.msra.mxu0 %v1850_v54 }
0x127a   :  { %v1614_v22 = vmul.f32 %v1612_v63, %v1594_v26  ;;  %v1628_v30 = vadd.f32 %v1626_v13, %v2990_v40  ;;  %2043 = vmatprep.subr.mxu0 %v2308_v0  ;;  %v1848_v13 = vld [vmem:[%s3104_s6 + $0x8] sm:$0xff] }
0x127b   :  { %2044 = vmatpush3.msra.mxu0 %v1849_v6 }
0x127c   :  { %1616 = vst.msk [vmem:[#allocation8 + $0x48] sm:$0xff] %vm89_vm0, %v1614_v22  ;;  %v1640_v33 = vadd.f32 %v1638_v31, %v1614_v22  ;;  %1642 = vrot.lane.b32.xlu1 %v1628_v30, %s2311_s20  ;;  %2045 = vmatprep.subr.mxu0 %v2308_v0 }
0x127d   :  { %2046 = vmatpush3.msra.mxu0 %v1848_v13 }
0x127e   :  { %1646 = vrot.lane.b32.xlu0 %v1640_v33, %s2312_s21  ;;  %2047 = vmatprep.subr.mxu0 %v2308_v0  ;;  %v1847_v33 = vld [vmem:[%s3104_s6] sm:$0xff]  ;;  %s2314_s6 = smov [#allocation8]  }
0x127f   :  { %2048 = vmatpush3.msra.mxu0 %v1847_v33 }
0x12ee   :  { %v1643_v34 = vpop.permute.xlu1 %1642 }
0x12f0   :  { %v1647_v35 = vpop.permute.xlu0 %1646 }
0x12f1   :  { %v1649_v60 = vsel %vm89_vm0, %v1643_v34, %v1647_v35 }
0x12f2   :  { %2017 = vmatmul.mubr.msk.f32.vlgmr.msra.gmra.mxu1 %vm228_vm1, %v1649_v60 }
0x13b2   :  { %v1719_v39 = vpop.f32.mrf.mxu1 }
0x13b3   :  { %v1720_v42 = vadd.f32 %v1719_v39, %v2541_v47 }
0x13b4   :  { %v1721_v43 = vpop.f32.mrf.mxu1 }
0x13b5   :  { %v3000_v46 = vadd.f32 %v1721_v43, %v2549_v55  ;;  %1735 = vrot.lane.b32.xlu1 %v1720_v42, %s2310_s3  ;;  %v1727_v3 = vadd.f32 %v1724_v16, %v1720_v42  ;;  %v1756_v25 = vadd.f32 %v1725_v29, %v1720_v42 }
0x13b7   :  { %1771 = vrot.lane.b32.xlu0 %v3000_v46, %s2310_s3  ;;  %v2018_v18 = vmul.f32 -1.442695, %v1727_v3  ;;  %v2019_v19 = vmul.f32 -1.442695, %v1756_v25  ;;  %v1763_v61 = vadd.f32 %v1726_v15, %v3000_v46 }
0x13b9   :  { %2180 = vpow2.f32 %v2018_v18  ;;  %v2020_v8 = vmul.f32 -1.442695, %v1763_v61 }
0x13ba   :  { %2182 = vpow2.f32 %v2019_v19 }
0x13c6   :  { %v2181_v5 = vpop.eup %2180 }
0x13c7   :  { %v2183_v2 = vpop.eup %2182  ;;  %v1731_v47 = vadd.f32 1.0, %v2181_v5 }
0x13c8   :  { %v1760_v20 = vadd.f32 1.0, %v2183_v2 }
0x13c9   :  { %2184 = vrcp.f32 %v1731_v47 }
0x13ca   :  { %2186 = vrcp.f32 %v1760_v20 }
0x13d6   :  { %v3005_v55 = vpop.eup %2184 }
0x13d7   :  { %v2187_v58 = vpop.eup %2186  ;;  %v1745_v22 = vsub.f32 1.0, %v3005_v55 }
0x1427   :  { %v1736_v21 = vpop.permute.xlu1 %1735 }
0x1428   :  { %v1738_v44 = vmul.f32 %v3005_v55, %v1736_v21 }
0x1429   :  { %v1772_v41 = vpop.permute.xlu0 %1771 }
0x142a   :  { %v1774_v45 = vmul.f32 %v2187_v58, %v1772_v41  ;;  %1740 = vrot.lane.b32.xlu1 %v1738_v44, %s2310_s3 }
0x142c   :  { %1776 = vrot.lane.b32.xlu0 %v1774_v45, %s2310_s3 }
0x142e   :  { %1817 = vperm.xlu1 %2067, %v1814_v48  }
0x1430   :  { %1829 = vperm.xlu0 %2066, %v1826_v32  }
0x1432   :  { %1796 = vperm.xlu1 %2067, %v2021_v59  }
0x1434   :  { %1808 = vperm.xlu0 %2066, %v1793_v56  }
0x1438   :  { %1751 = vrot.lane.b32.xlu0 %v1649_v60, %s2312_s21 }
0x143c   :  { %1787 = vrot.lane.b32.xlu0 %v1649_v60, %s2311_s20 }
0x149c   :  { %v1741_v28 = vpop.permute.xlu1 %1740 }
0x149d   :  { %v1743_v51 = vadd.f32 %v1741_v28, %v1724_v16 }
0x149e   :  { %v1777_v11 = vpop.permute.xlu0 %1776 }
0x149f   :  { %2188 = vtanh.f32 %v1743_v51  ;;  %v1779_v27 = vadd.f32 %v1777_v11, %v1726_v15 }
0x14a1   :  { %2190 = vtanh.f32 %v1779_v27 }
0x14a2   :  { %2192 = vpow2.f32 %v2020_v8 }
0x14a9   :  { %v1818_v63 = vpop.permute.xlu1 %1817 }
0x14aa   :  { %v1820_v50 = vmul.f32 %v1818_v63, %v1649_v60 }
0x14ab   :  { %v1830_v52 = vpop.permute.xlu0 %1829 }
0x14ac   :  { %v2189_v36 = vpop.eup %2188  ;;  %v1832_v57 = vmul.f32 %v1830_v52, %v1649_v60 }
0x14ad   :  { %1747 = vrot.lane.b32.xlu1 %v2189_v36, %s2311_s20  ;;  %v1797_v24 = vpop.permute.xlu1 %1796 }
0x14ae   :  { %1834 = vrot.lane.b32.xlu0 %v1832_v57, %s2311_s20  ;;  %v2191_v62 = vpop.eup %2190 }
0x14af   :  { %v2193_v49 = vpop.eup %2192  ;;  %v1809_v53 = vpop.permute.xlu0 %1808 }
0x14b0   :  { %v1767_v10 = vadd.f32 1.0, %v2193_v49 }
0x14b1   :  { %1783 = vrot.lane.b32.xlu1 %v2191_v62, %s2311_s20 }
0x14b2   :  { %2194 = vrcp.f32 %v1767_v10 }
0x14b3   :  { %v1752_v26 = vpop.permute.xlu0 %1751 }
0x14b4   :  { %v1754_v34 = vmul.f32 %v3005_v55, %v1752_v26 }
0x14b5   :  { %1822 = vrot.lane.b32.xlu1 %v1820_v50, %s2312_s21 }
0x14b7   :  { %v1788_v60 = vpop.permute.xlu0 %1787 }
0x14bf   :  { %v2195_v30 = vpop.eup %2194 }
0x14c0   :  { %v1781_v42 = vsub.f32 1.0, %v2195_v30  ;;  %v1790_v46 = vmul.f32 %v2195_v30, %v1788_v60 }
0x151f   :  { %v1748_v31 = vpop.permute.xlu1 %1747 }
0x1520   :  { %v1750_v35 = vmul.f32 %v1748_v31, %v1745_v22  ;;  %v1835_v5 = vpop.permute.xlu0 %1834 }
0x1522   :  { %v1755_v39 = vadd.f32 %v1754_v34, %v1750_v35 }
0x1523   :  { %v1784_v43 = vpop.permute.xlu1 %1783 }
0x1524   :  { %v1786_v16 = vmul.f32 %v1784_v43, %v1781_v42  ;;  %v1799_v29 = vmul.f32 %v1797_v24, %v1755_v39 }
0x1526   :  { %v1791_v3 = vadd.f32 %v1790_v46, %v1786_v16 }
0x1527   :  { %v1823_v25 = vpop.permute.xlu1 %1822 }
0x1528   :  { %v1811_v18 = vmul.f32 %v1809_v53, %v1791_v3  ;;  %v1825_v19 = vadd.f32 %v1823_v25, %v1799_v29 }
0x152a   :  { %1813 = vst.msk [vmem:[#allocation8 + $0x40] sm:$0xff] %vm89_vm0, %v1811_v18  ;;  %v1837_v2 = vadd.f32 %v1835_v5, %v1811_v18  ;;  %1839 = vrot.lane.b32.xlu1 %v1825_v19, %s2311_s20 }
0x152c   :  { %1843 = vrot.lane.b32.xlu0 %v1837_v2, %s2312_s21 }
0x152e   :  { %419 = vrot.lane.b32.xlu1 %v2592_v38, %s2311_s20 }
0x1530   :  { %611 = vrot.lane.b32.xlu0 %v2657_v9, %s2311_s20 }
0x1532   :  { %812 = vrot.lane.b32.xlu1 %v2722_v17, %s2311_s20 }
0x1534   :  { %1013 = vrot.lane.b32.xlu0 %v2787_v12, %s2311_s20 }
0x1536   :  { %1210 = vrot.lane.b32.xlu1 %v2915_v4, %s2311_s20 }
0x1538   :  { %1407 = vrot.lane.b32.xlu0 %v2964_v14, %s2311_s20 }
0x153a   :  { %1604 = vrot.lane.b32.xlu1 %v2990_v40, %s2311_s20 }
0x153c   :  { %1801 = vrot.lane.b32.xlu0 %v1799_v29, %s2311_s20  ;;  %s1942_s20 = sshll.u32 %s2314_s6, 4  ;;  %s1943_s20 = int_to_ptr.vmem [resolvable:$true] %s1942_s20 }
0x153d   :  { %s2254_s21 = scalar_lea.vmem %s1943_s20, 2048  ;;  %p2259_p11 = scmp.lt.s32.totalorder %s1943_s20, %s1943_s20 }
0x153e   :  { %p2255_p10 = scmp.ne.s32.totalorder %s1943_s20, %s2254_s21  ;;  %p2260_p12 = scmp.lt.s32.totalorder %s2254_s21, %s2254_s21 }
0x1540   :  { %p2261_p13 = por %p2260_p12, %p2259_p11 }
0x1542   :  { %p2262_p0 = pnand %p2261_p13, %p2255_p10 }
0x159c   :  { %v1840_v0 = vpop.permute.xlu1 %1839 }
0x159e   :  { %v1844_v38 = vpop.permute.xlu0 %1843 }
0x159f   :  { %v1846_v9 = vsel %vm89_vm0, %v1840_v0, %v1844_v38 }
0x15a0   :  { %2050 = vmatmul.mubr.msk.f32.vlgmr.msra.gmra.mxu0 %vm228_vm1, %v1846_v9  ;;  %v420_v17 = vpop.permute.xlu1 %419 }
0x15a1   :  { %422 = vst.msk [vmem:[#allocation8] sm:$0xff] %vm89_vm0, %v420_v17 }
0x15a2   :  { %v612_v12 = vpop.permute.xlu0 %611 }
0x15a3   :  { %615 = vst.msk [vmem:[#allocation8 + $0x8] sm:$0xff] %vm89_vm0, %v612_v12 }
0x15a4   :  { %v813_v4 = vpop.permute.xlu1 %812 }
0x15a5   :  { %816 = vst.msk [vmem:[#allocation8 + $0x10] sm:$0xff] %vm89_vm0, %v813_v4 }
0x15a6   :  { %v1014_v14 = vpop.permute.xlu0 %1013 }
0x15a7   :  { %1017 = vst.msk [vmem:[#allocation8 + $0x18] sm:$0xff] %vm89_vm0, %v1014_v14 }
0x15a8   :  { %v1211_v40 = vpop.permute.xlu1 %1210 }
0x15a9   :  { %1214 = vst.msk [vmem:[#allocation8 + $0x20] sm:$0xff] %vm89_vm0, %v1211_v40 }
0x15aa   :  { %v1408_v47 = vpop.permute.xlu0 %1407 }
0x15ab   :  { %1411 = vst.msk [vmem:[#allocation8 + $0x28] sm:$0xff] %vm89_vm0, %v1408_v47 }
0x15ac   :  { %v1605_v20 = vpop.permute.xlu1 %1604 }
0x15ad   :  { %1608 = vst.msk [vmem:[#allocation8 + $0x30] sm:$0xff] %vm89_vm0, %v1605_v20 }
0x15ae   :  { %v1802_v55 = vpop.permute.xlu0 %1801 }
0x15af   :  { %1805 = vst.msk [vmem:[#allocation8 + $0x38] sm:$0xff] %vm89_vm0, %v1802_v55 }
0x15b0   :  { %2265 = shalt.err (!%p2262_p0)
}
0x15b1   :  { %1948 = dma.vmem_to_hbm [thread:$0]  %s1943_s20, 2048, %s3106_s8, [#allocation5], %s2303_s12, %s2303_s12, %s2304_s13  }
0x15b2   :  { %v2022_v21 = vld [vmem:[%s3105_s7] ss:$0 sm:$0xff]  ;;  %s2315_s23 = smov [#allocation9]  }
0x15b3   :  { %s1955_s2 = sshll.u32 %s2315_s23, 4  ;;  %s1956_s2 = int_to_ptr.vmem [resolvable:$true] %s1955_s2 }
0x15b4   :  { %s2274_s24 = scalar_lea.vmem %s1956_s2, 128  ;;  %p2279_p2 = scmp.lt.s32.totalorder %s1956_s2, %s1956_s2 }
0x15b5   :  { %p2275_p1 = scmp.ne.s32.totalorder %s1956_s2, %s2274_s24  ;;  %p2280_p3 = scmp.lt.s32.totalorder %s2274_s24, %s2274_s24 }
0x15b7   :  { %p2281_p4 = por %p2280_p3, %p2279_p2 }
0x15b9   :  { %p2282_p5 = pnand %p2281_p4, %p2275_p1 }
0x1660   :  { %v1931_v59 = vpop.f32.mrf.mxu0 }
0x1661   :  { %v1932_v44 = vadd.f32 %v2022_v21, %v1931_v59 }
0x1662   :  { %v2051_v58 = vpop.f32.mrf.mxu0 }
0x1663   :  { %2196 = vtanh.f32 %v1932_v44 }
0x1670   :  { %v2197_v41 = vpop.eup %2196 }
0x1671   :  { %1936 = vst.msk [vmem:[#allocation9] sm:$0xff] %vm89_vm0, %v2197_v41 }
0x1672   :  { %2285 = shalt.err (!%p2282_p5)
}
0x1673   :  { %1958 = dma.vmem_to_hbm [thread:$0]  %s1956_s2, 128, %s3107_s9, [#allocation10]  }
0x1674   :  { %2298 = dma.done.wait [#allocation5], 2048  }
0x1675   :  { %2299 = vsyncadd [#allocation5], 4294965248 }
0x1676   :  { %2300 = dma.done.wait [#allocation10], 128  }
0x1677   :  { %2301 = vsyncadd [#allocation10], 4294967168 }
0x1678   :  { %1965 = vsyncpa [#allocation4], 1 }
0x1679   :  { %1966 = vsyncpa [#allocation7], 1 }
0x167a   :  { %1967 = vsyncpa [#allocation5], 1 }
0x167b   :  { %1968 = vsyncpa [#allocation10], 1 }

</bundles_post_ra>
